<compile_context>
chip_gen: v7x
topology: tpu7x:2x2x1
jax: 0.10.0
libtpu: 0.0.40
codegen_flags: <defaults>
</compile_context>

<pallas_src>
import numpy as np
import jax
import jax.numpy as jnp
from jax.experimental import pallas as pl
from jax.experimental.pallas import tpu as pltpu

LANES = 128
NEG_INF = -1e30


def _round_up(v, m):
    return ((v + m - 1) // m) * m


def _vmem_limit_bytes():
    """Chip-aware VMEM budget: ~3/4 of physical, capped at 96 MiB."""
    cap = 128 * 1024 * 1024
    try:
        info = pltpu.get_tpu_info()
        cap = int(getattr(info, "vmem_capacity_bytes", cap))
    except Exception:
        pass
    return int(min(96 * 1024 * 1024, cap * 3 // 4))


# ------------------------------ Pallas kernels ----------------------------- #
def hop1_kernel(a1_ref, a2_ref, xk_ref, w1_ref, b1_ref, r1_ref,
                acc1_ref, acc2_ref):
    """r1_raw = [A1q @ h | A2q @ h] with h = relu(x @ W1p + b1p) fused in."""
    k = pl.program_id(1)

    @pl.when(k == 0)
    def _():
        acc1_ref[...] = jnp.zeros_like(acc1_ref)
        acc2_ref[...] = jnp.zeros_like(acc2_ref)

    # Hidden block for this K slice (recomputed per step: tk*F*Hp flops,
    # negligible vs the A-tile DMA which dominates the mem-bound hop).
    hk = jnp.maximum(
        jnp.dot(xk_ref[...], w1_ref[...], preferred_element_type=jnp.float32)
        + b1_ref[...], 0.0).astype(jnp.bfloat16)

    # Dequantize int8 adjacency tiles to bf16 in VMEM (values are exact in
    # bf16); the per-matrix scale is folded into the classifier weights.
    a1 = a1_ref[...].astype(jnp.float32).astype(jnp.bfloat16)
    a2 = a2_ref[...].astype(jnp.float32).astype(jnp.bfloat16)

    acc1_ref[...] += jnp.dot(a1, hk, preferred_element_type=jnp.float32)
    acc2_ref[...] += jnp.dot(a2, hk, preferred_element_type=jnp.float32)

    @pl.when(k == pl.num_programs(1) - 1)
    def _():
        hp = acc1_ref.shape[1]
        r1_ref[:, :hp] = acc1_ref[...].astype(r1_ref.dtype)
        r1_ref[:, hp:] = acc2_ref[...].astype(r1_ref.dtype)


def hop2_cls_kernel(a1_ref, a2_ref, r1k_ref, xrow_ref, r1row_ref,
                    w1_ref, b1_ref, w2h_ref, w2r1_ref, w2r2a_ref, w2r2b_ref,
                    b2_ref, out_ref, acc1_ref, acc2_ref):
    """r2_raw = [A1q @ r1_raw | A2q @ r1_raw]; split-K classifier + log_softmax."""
    k = pl.program_id(1)

    @pl.when(k == 0)
    def _():
        acc1_ref[...] = jnp.zeros_like(acc1_ref)
        acc2_ref[...] = jnp.zeros_like(acc2_ref)

    r1k = r1k_ref[...]  # (tk, 2*Hp) bf16, 128-lane dense
    a1 = a1_ref[...].astype(jnp.float32).astype(jnp.bfloat16)
    a2 = a2_ref[...].astype(jnp.float32).astype(jnp.bfloat16)
    acc1_ref[...] += jnp.dot(a1, r1k, preferred_element_type=jnp.float32)
    acc2_ref[...] += jnp.dot(a2, r1k, preferred_element_type=jnp.float32)

    @pl.when(k == pl.num_programs(1) - 1)
    def _():
        # h for this row tile (never materialized to HBM).
        h_row = jnp.maximum(
            jnp.dot(xrow_ref[...], w1_ref[...],
                    preferred_element_type=jnp.float32) + b1_ref[...], 0.0)
        r1_row = r1row_ref[...].astype(jnp.float32)
        # Split-K classifier: equivalent to [h|r1|r2] @ W2 + b2 with all
        # dequant scales pre-folded into the W2* blocks (f32, no bf16 round
        # trip of the accumulators, no lane concatenate).
        # TODO(synk): F.dropout(training=True) has no deterministic semantics;
        # inference mode (identity) is implemented here.
        logits = (jnp.dot(h_row, w2h_ref[...], preferred_element_type=jnp.float32)
                  + jnp.dot(r1_row, w2r1_ref[...], preferred_element_type=jnp.float32)
                  + jnp.dot(acc1_ref[...], w2r2a_ref[...], preferred_element_type=jnp.float32)
                  + jnp.dot(acc2_ref[...], w2r2b_ref[...], preferred_element_type=jnp.float32)
                  + b2_ref[...])
        # log_softmax over 128 padded lanes; pad classes carry -1e30 bias so
        # exp(.) underflows to 0 and the result matches the real-C softmax.
        m = jnp.max(logits, axis=1, keepdims=True)
        sh = logits - m
        lse = jnp.log(jnp.sum(jnp.exp(sh), axis=1, keepdims=True))
        out_ref[...] = sh - lse


# --------------------------------- wrapper --------------------------------- #
def _quantize_adj(a):
    """Symmetric int8 quantization with per-matrix scale (entries are >= 0)."""
    a = a.astype(jnp.float32)
    amax = jnp.maximum(jnp.max(jnp.abs(a)), 1e-30)
    scale = amax / 127.0
    q = jnp.clip(jnp.round(a / scale), -127.0, 127.0).astype(jnp.int8)
    return q, scale


def h2gcn_forward(x, w1, b1, a1, a2, w2, b2, *, tile_m=512, tile_k=512):
    f32 = jnp.float32
    n, f_in = x.shape
    h_dim = w1.shape[1]
    c = w2.shape[1]

    hp = _round_up(max(h_dim, 64), 64)          # lane-dense: 2*hp multiple of 128
    cpad = _round_up(max(c, LANES), LANES)

    # ---- tile selection ----
    tm = min(tile_m, n)
    if n // tm < 2 and n % 16 == 0 and n // 2 >= 128:
        tm = n // 2                              # give both v7x TCs a row tile
    tk = min(tile_k, n)
    assert n % tm == 0 and n % tk == 0, "N must be divisible by the tile sizes"
    gm, gk = n // tm, n // tk

    # ---- int8 adjacencies (2x less HBM traffic on the mem-bound hops) ----
    a1q, s1 = _quantize_adj(a1)
    a2q, s2 = _quantize_adj(a2)

    # ---- padded hidden-layer params (pad cols zero -> h pad cols are 0) ----
    w1p = jnp.zeros((f_in, hp), f32).at[:, :h_dim].set(w1.astype(f32))
    b1p = jnp.zeros((1, hp), f32).at[:, :h_dim].set(b1.astype(f32))

    # ---- classifier blocks, padded + dequant scales folded in ----
    # original W2 row order: [h (H) | r1 (2H) | A1@r1 (2H) | A2@r1 (2H)]
    def _pad_block(wblk):                        # (h_dim, c) -> (hp, cpad)
        return jnp.zeros((hp, cpad), f32).at[:h_dim, :c].set(wblk.astype(f32))

    blk = [w2[i * h_dim:(i + 1) * h_dim] for i in range(7)]
    w2_h = _pad_block(blk[0])
    w2_r1 = jnp.concatenate([_pad_block(blk[1]) * s1,
                             _pad_block(blk[2]) * s2], axis=0)
    w2_r2a = jnp.concatenate([_pad_block(blk[3]) * (s1 * s1),
                              _pad_block(blk[4]) * (s1 * s2)], axis=0)
    w2_r2b = jnp.concatenate([_pad_block(blk[5]) * (s2 * s1),
                              _pad_block(blk[6]) * (s2 * s2)], axis=0)
    b2p = jnp.full((1, cpad), NEG_INF, f32).at[:, :c].set(b2.astype(f32))

    mosaic = pltpu.CompilerParams(
        dimension_semantics=("parallel", "arbitrary"),
        vmem_limit_bytes=_vmem_limit_bytes())

    # ---- (1) hop1 with fused hidden layer ----
    hop1_cost = pl.CostEstimate(
        flops=4 * n * n * hp + 2 * gm * n * f_in * hp,
        transcendentals=0,
        bytes_accessed=(2 * n * n * 1 + gm * n * f_in * 4
                        + n * 2 * hp * 2 + (f_in * hp + hp) * 4))
    r1 = pl.pallas_call(
        hop1_kernel,
        out_shape=jax.ShapeDtypeStruct((n, 2 * hp), jnp.bfloat16),
        grid_spec=pltpu.PrefetchScalarGridSpec(
            num_scalar_prefetch=0,
            grid=(gm, gk),
            in_specs=[
                pl.BlockSpec((tm, tk), lambda i, k: (i, k)),       # A1q tile
                pl.BlockSpec((tm, tk), lambda i, k: (i, k)),       # A2q tile
                pl.BlockSpec((tk, f_in), lambda i, k: (k, 0)),     # x K block
                pl.BlockSpec((f_in, hp), lambda i, k: (0, 0)),     # W1 padded
                pl.BlockSpec((1, hp), lambda i, k: (0, 0)),        # b1 padded
            ],
            out_specs=pl.BlockSpec((tm, 2 * hp), lambda i, k: (i, 0)),
            scratch_shapes=[pltpu.VMEM((tm, hp), jnp.float32),
                            pltpu.VMEM((tm, hp), jnp.float32)]),
        compiler_params=mosaic,
        cost_estimate=hop1_cost,
    )(a1q, a2q, x, w1p, b1p)

    # ---- (2) second hop + split-K classifier + log_softmax ----
    hop2_cost = pl.CostEstimate(
        flops=(8 * n * n * hp
               + 2 * n * (f_in * hp + hp * cpad + 3 * 2 * hp * cpad)),
        transcendentals=n * cpad + n,
        bytes_accessed=(2 * n * n * 1 + gm * n * 2 * hp * 2 + n * 2 * hp * 2
                        + n * f_in * 4 + n * cpad * 4 + 7 * hp * cpad * 4))
    out_padded = pl.pallas_call(
        hop2_cls_kernel,
        out_shape=jax.ShapeDtypeStruct((n, cpad), jnp.float32),
        grid_spec=pltpu.PrefetchScalarGridSpec(
            num_scalar_prefetch=0,
            grid=(gm, gk),
            in_specs=[
                pl.BlockSpec((tm, tk), lambda i, k: (i, k)),        # A1q tile
                pl.BlockSpec((tm, tk), lambda i, k: (i, k)),        # A2q tile
                pl.BlockSpec((tk, 2 * hp), lambda i, k: (k, 0)),    # r1 K block
                pl.BlockSpec((tm, f_in), lambda i, k: (i, 0)),      # x row block
                pl.BlockSpec((tm, 2 * hp), lambda i, k: (i, 0)),    # r1 row block
                pl.BlockSpec((f_in, hp), lambda i, k: (0, 0)),      # W1 padded
                pl.BlockSpec((1, hp), lambda i, k: (0, 0)),         # b1 padded
                pl.BlockSpec((hp, cpad), lambda i, k: (0, 0)),      # W2_h
                pl.BlockSpec((2 * hp, cpad), lambda i, k: (0, 0)),  # W2_r1 (scaled)
                pl.BlockSpec((2 * hp, cpad), lambda i, k: (0, 0)),  # W2_r2a (scaled)
                pl.BlockSpec((2 * hp, cpad), lambda i, k: (0, 0)),  # W2_r2b (scaled)
                pl.BlockSpec((1, cpad), lambda i, k: (0, 0)),       # b2 padded
            ],
            out_specs=pl.BlockSpec((tm, cpad), lambda i, k: (i, 0)),
            scratch_shapes=[pltpu.VMEM((tm, 2 * hp), jnp.float32),
                            pltpu.VMEM((tm, 2 * hp), jnp.float32)]),
        compiler_params=mosaic,
        cost_estimate=hop2_cost,
    )(a1q, a2q, r1, x, r1, w1p, b1p, w2_h, w2_r1, w2_r2a, w2_r2b, b2p)

    return out_padded[:, :c]


# ------------------------- graph preprocessing glue ------------------------ #
def gcn_norm_dense(adj01: np.ndarray) -> np.ndarray:
    """Symmetric GCN normalization with self loops: D^-1/2 (A+I) D^-1/2."""
    n = adj01.shape[0]
    a = np.minimum(adj01 + np.eye(n, dtype=np.float32), 1.0)
    deg = a.sum(axis=1)
    dinv = 1.0 / np.sqrt(np.maximum(deg, 1.0))
    return (a * dinv[:, None]) * dinv[None, :]


def build_adjacencies(edge_index: np.ndarray, n: int):
    """Replicates H2GCN.__init__ hop construction for layer_num=2."""
    a = np.zeros((n, n), dtype=np.float32)
    a[edge_index[0], edge_index[1]] = 1.0
    a_loop = np.minimum(a + np.eye(n, dtype=np.float32), 1.0)   # A + I
    a2 = (a_loop @ a_loop > 0).astype(np.float32)               # 2-hop reach
    a2 = a2 * (1.0 - np.eye(n, dtype=np.float32))               # drop self loops
    a2 = a2 * (1.0 - a)                                         # drop 1-hop edges
    return gcn_norm_dense(a), gcn_norm_dense(a2)


# -------------------------------- reference -------------------------------- #
def reference(x, w1, b1, a1, a2, w2, b2):
    h = jax.nn.relu(x @ w1 + b1)
    h1 = a1 @ h
    h2 = a2 @ h
    r1 = jnp.concatenate([h1, h2], axis=1)
    r2 = jnp.concatenate([a1 @ r1, a2 @ r1], axis=1)
    final = jnp.concatenate([h, r1, r2], axis=1)
    logits = final @ w2 + b2
    return jax.nn.log_softmax(logits, axis=1)


# ---------------------------------- main ----------------------------------- #
if __name__ == "__main__":
    N = 256           # nodes
    F_IN = 32         # num_features
    H = 32            # num_hidden
    C = 8             # num_classes

    key = jax.random.PRNGKey(0)
    kx, ke1, ke2, kw1, kb1, kw2, kb2 = jax.random.split(key, 7)

    # deterministic random undirected graph
    src = np.asarray(jax.random.randint(ke1, (512,), 0, N))
    dst = np.asarray(jax.random.randint(ke2, (512,), 0, N))
    keep = src != dst
    src, dst = src[keep], dst[keep]
    edge_index = np.stack(
        [np.concatenate([src, dst]), np.concatenate([dst, src])], axis=0)

    a1_np, a2_np = build_adjacencies(edge_index, N)

    # deterministic parameters (PyTorch Linear default init range)
    x = jax.random.normal(kx, (N, F_IN), jnp.float32)
    lim1 = 1.0 / np.sqrt(F_IN)
    w1 = jax.random.uniform(kw1, (F_IN, H), jnp.float32, -lim1, lim1)
    b1 = jax.random.uniform(kb1, (1, H), jnp.float32, -lim1, lim1)
    lim2 = 1.0 / np.sqrt(7 * H)
    w2 = jax.random.uniform(kw2, (7 * H, C), jnp.float32, -lim2, lim2)
    b2 = jax.random.uniform(kb2, (1, C), jnp.float32, -lim2, lim2)

    a1 = jnp.asarray(a1_np)
    a2 = jnp.asarray(a2_np)

    fwd = jax.jit(h2gcn_forward)
    out = jax.block_until_ready(fwd(x, w1, b1, a1, a2, w2, b2))

    ref = reference(x, w1, b1, a1, a2, w2, b2)
    # int8 adjacencies + bf16 hop matmuls (f32 accumulation) -> loosened tol
    np.testing.assert_allclose(np.asarray(out), np.asarray(ref),
                               rtol=2e-2, atol=5e-2)
    print("KERNEL_OK")
</pallas_src>

<mosaic_0001>
module attributes {stable_mosaic.version = 11 : i64} {
  func.func @hop1_kernel(%arg0: i32, %arg1: i32, %arg2: memref<128x256xi8, #tpu.memory_space<vmem>>, %arg3: memref<128x256xi8, #tpu.memory_space<vmem>>, %arg4: memref<256x32xf32, #tpu.memory_space<vmem>>, %arg5: memref<32x64xf32, #tpu.memory_space<vmem>>, %arg6: memref<1x64xf32, #tpu.memory_space<vmem>>, %arg7: memref<128x128xbf16, #tpu.memory_space<vmem>>, %arg8: memref<128x64xf32, #tpu.memory_space<vmem>>, %arg9: memref<128x64xf32, #tpu.memory_space<vmem>>) attributes {dimension_semantics = [#tpu.dimension_semantics<parallel>, #tpu.dimension_semantics<arbitrary>], iteration_bounds = array<i64: 2, 1>, scalar_prefetch = 0 : i64, scratch_operands = 2 : i64, tpu.core_type = #tpu.core_type<tc>, window_params = [{transform_indices = @transform_0, window_bounds = array<i64: 128, 256>}, {transform_indices = @transform_1, window_bounds = array<i64: 128, 256>}, {transform_indices = @transform_2, window_bounds = array<i64: 256, 32>}, {pipeline_mode = #tpu.pipeline_mode<synchronous>, transform_indices = @transform_3, window_bounds = array<i64: 32, 64>}, {pipeline_mode = #tpu.pipeline_mode<synchronous>, transform_indices = @transform_4, window_bounds = array<i64: 1, 64>}, {transform_indices = @transform_5, window_bounds = array<i64: 128, 128>}]} {
    %c0_i32 = arith.constant 0 : i32
    %0 = arith.cmpi eq, %arg1, %c0_i32 : i32
    %1 = arith.extui %0 : i1 to i32
    %c0_i32_0 = arith.constant 0 : i32
    %2 = arith.cmpi ne, %1, %c0_i32_0 : i32
    scf.if %2 {
      %cst_23 = arith.constant 0.000000e+00 : f32
      %29 = vector.broadcast %cst_23 : f32 to vector<128x64xf32>
      %c0_24 = arith.constant 0 : index
      %c0_25 = arith.constant 0 : index
      %30 = vector.load %arg8[%c0_24, %c0_25] : memref<128x64xf32, #tpu.memory_space<vmem>>, vector<128x64xf32>
      tpu.vector_store %arg8[%c0_24, %c0_25], %29 {strides = array<i32>} : memref<128x64xf32, #tpu.memory_space<vmem>>, vector<128x64xf32>,
      %cst_26 = arith.constant 0.000000e+00 : f32
      %31 = vector.broadcast %cst_26 : f32 to vector<128x64xf32>
      %c0_27 = arith.constant 0 : index
      %c0_28 = arith.constant 0 : index
      %32 = vector.load %arg9[%c0_27, %c0_28] : memref<128x64xf32, #tpu.memory_space<vmem>>, vector<128x64xf32>
      tpu.vector_store %arg9[%c0_27, %c0_28], %31 {strides = array<i32>} : memref<128x64xf32, #tpu.memory_space<vmem>>, vector<128x64xf32>,
    } else {
    }
    %c0 = arith.constant 0 : index
    %c0_1 = arith.constant 0 : index
    %3 = vector.load %arg4[%c0, %c0_1] : memref<256x32xf32, #tpu.memory_space<vmem>>, vector<256x32xf32>
    %c0_2 = arith.constant 0 : index
    %c0_3 = arith.constant 0 : index
    %4 = vector.load %arg5[%c0_2, %c0_3] : memref<32x64xf32, #tpu.memory_space<vmem>>, vector<32x64xf32>
    %cst = arith.constant dense<0.000000e+00> : vector<256x64xf32>
    %5 = tpu.matmul %3, %4, %cst {dimension_numbers = #tpu.dot_dimension_numbers<[1], [0], [0], [1], [0, 0, 1, 1], [], []>} : vector<256x32xf32>, vector<32x64xf32>, vector<256x64xf32> -> vector<256x64xf32>
    %c0_4 = arith.constant 0 : index
    %c0_5 = arith.constant 0 : index
    %6 = vector.load %arg6[%c0_4, %c0_5] : memref<1x64xf32, #tpu.memory_space<vmem>>, vector<1x64xf32>
    %7 = vector.broadcast %6 : vector<1x64xf32> to vector<256x64xf32>
    %8 = arith.addf %5, %7 : vector<256x64xf32>
    %cst_6 = arith.constant 0.000000e+00 : f32
    %9 = vector.broadcast %cst_6 : f32 to vector<256x64xf32>
    %10 = arith.maximumf %8, %9 : vector<256x64xf32>
    %11 = arith.truncf %10 : vector<256x64xf32> to vector<256x64xbf16>
    %c0_7 = arith.constant 0 : index
    %c0_8 = arith.constant 0 : index
    %12 = vector.load %arg2[%c0_7, %c0_8] : memref<128x256xi8, #tpu.memory_space<vmem>>, vector<128x256xi8>
    %13 = arith.sitofp %12 : vector<128x256xi8> to vector<128x256xf32>
    %14 = arith.truncf %13 : vector<128x256xf32> to vector<128x256xbf16>
    %c0_9 = arith.constant 0 : index
    %c0_10 = arith.constant 0 : index
    %15 = vector.load %arg3[%c0_9, %c0_10] : memref<128x256xi8, #tpu.memory_space<vmem>>, vector<128x256xi8>
    %16 = arith.sitofp %15 : vector<128x256xi8> to vector<128x256xf32>
    %17 = arith.truncf %16 : vector<128x256xf32> to vector<128x256xbf16>
    %c0_11 = arith.constant 0 : index
    %c0_12 = arith.constant 0 : index
    %18 = vector.load %arg8[%c0_11, %c0_12] : memref<128x64xf32, #tpu.memory_space<vmem>>, vector<128x64xf32>
    %cst_13 = arith.constant dense<0.000000e+00> : vector<128x64xf32>
    %19 = tpu.matmul %14, %11, %cst_13 {dimension_numbers = #tpu.dot_dimension_numbers<[1], [0], [0], [1], [0, 0, 1, 1], [], []>} : vector<128x256xbf16>, vector<256x64xbf16>, vector<128x64xf32> -> vector<128x64xf32>
    %20 = arith.addf %18, %19 : vector<128x64xf32>
    %c0_14 = arith.constant 0 : index
    %c0_15 = arith.constant 0 : index
    %21 = vector.load %arg8[%c0_14, %c0_15] : memref<128x64xf32, #tpu.memory_space<vmem>>, vector<128x64xf32>
    tpu.vector_store %arg8[%c0_14, %c0_15], %20 {strides = array<i32>} : memref<128x64xf32, #tpu.memory_space<vmem>>, vector<128x64xf32>,
    %c0_16 = arith.constant 0 : index
    %c0_17 = arith.constant 0 : index
    %22 = vector.load %arg9[%c0_16, %c0_17] : memref<128x64xf32, #tpu.memory_space<vmem>>, vector<128x64xf32>
    %cst_18 = arith.constant dense<0.000000e+00> : vector<128x64xf32>
    %23 = tpu.matmul %17, %11, %cst_18 {dimension_numbers = #tpu.dot_dimension_numbers<[1], [0], [0], [1], [0, 0, 1, 1], [], []>} : vector<128x256xbf16>, vector<256x64xbf16>, vector<128x64xf32> -> vector<128x64xf32>
    %24 = arith.addf %22, %23 : vector<128x64xf32>
    %c0_19 = arith.constant 0 : index
    %c0_20 = arith.constant 0 : index
    %25 = vector.load %arg9[%c0_19, %c0_20] : memref<128x64xf32, #tpu.memory_space<vmem>>, vector<128x64xf32>
    tpu.vector_store %arg9[%c0_19, %c0_20], %24 {strides = array<i32>} : memref<128x64xf32, #tpu.memory_space<vmem>>, vector<128x64xf32>,
    %c0_i32_21 = arith.constant 0 : i32
    %26 = arith.cmpi eq, %arg1, %c0_i32_21 : i32
    %27 = arith.extui %26 : i1 to i32
    %c0_i32_22 = arith.constant 0 : i32
    %28 = arith.cmpi ne, %27, %c0_i32_22 : i32
    scf.if %28 {
      %c0_23 = arith.constant 0 : index
      %c0_24 = arith.constant 0 : index
      %29 = vector.load %arg8[%c0_23, %c0_24] : memref<128x64xf32, #tpu.memory_space<vmem>>, vector<128x64xf32>
      %30 = arith.truncf %29 : vector<128x64xf32> to vector<128x64xbf16>
      %c0_25 = arith.constant 0 : index
      %c0_26 = arith.constant 0 : index
      %31 = vector.load %arg7[%c0_25, %c0_26] : memref<128x128xbf16, #tpu.memory_space<vmem>>, vector<128x64xbf16>
      tpu.vector_store %arg7[%c0_25, %c0_26], %30 {strides = array<i32>} : memref<128x128xbf16, #tpu.memory_space<vmem>>, vector<128x64xbf16>,
      %c0_27 = arith.constant 0 : index
      %c0_28 = arith.constant 0 : index
      %32 = vector.load %arg9[%c0_27, %c0_28] : memref<128x64xf32, #tpu.memory_space<vmem>>, vector<128x64xf32>
      %33 = arith.truncf %32 : vector<128x64xf32> to vector<128x64xbf16>
      %c0_29 = arith.constant 0 : index
      %c64 = arith.constant 64 : index
      %34 = vector.load %arg7[%c0_29, %c64] : memref<128x128xbf16, #tpu.memory_space<vmem>>, vector<128x64xbf16>
      tpu.vector_store %arg7[%c0_29, %c64], %33 {strides = array<i32>} : memref<128x128xbf16, #tpu.memory_space<vmem>>, vector<128x64xbf16>,
    } else {
    }
    return
  }
  func.func @transform_0(%arg0: i32, %arg1: i32) -> (i32, i32) {
    %c0_i32 = arith.constant 0 : i32
    return %arg0, %arg1 : i32, i32
  }
  func.func @transform_1(%arg0: i32, %arg1: i32) -> (i32, i32) {
    %c0_i32 = arith.constant 0 : i32
    return %arg0, %arg1 : i32, i32
  }
  func.func @transform_2(%arg0: i32, %arg1: i32) -> (i32, i32) {
    %c0_i32 = arith.constant 0 : i32
    %c0_i32_0 = arith.constant 0 : i32
    return %arg1, %c0_i32 : i32, i32
  }
  func.func @transform_3(%arg0: i32, %arg1: i32) -> (i32, i32) {
    %c0_i32 = arith.constant 0 : i32
    %c0_i32_0 = arith.constant 0 : i32
    %c0_i32_1 = arith.constant 0 : i32
    return %c0_i32, %c0_i32_0 : i32, i32
  }
  func.func @transform_4(%arg0: i32, %arg1: i32) -> (i32, i32) {
    %c0_i32 = arith.constant 0 : i32
    %c0_i32_0 = arith.constant 0 : i32
    %c0_i32_1 = arith.constant 0 : i32
    return %c0_i32, %c0_i32_0 : i32, i32
  }
  func.func @transform_5(%arg0: i32, %arg1: i32) -> (i32, i32) {
    %c0_i32 = arith.constant 0 : i32
    %c0_i32_0 = arith.constant 0 : i32
    return %arg0, %c0_i32 : i32, i32
  }
}

module attributes {stable_mosaic.version = 11 : i64} {
  func.func @hop2_cls_kernel(%arg0: i32, %arg1: i32, %arg2: memref<128x256xi8, #tpu.memory_space<vmem>>, %arg3: memref<128x256xi8, #tpu.memory_space<vmem>>, %arg4: memref<256x128xbf16, #tpu.memory_space<vmem>>, %arg5: memref<128x32xf32, #tpu.memory_space<vmem>>, %arg6: memref<128x128xbf16, #tpu.memory_space<vmem>>, %arg7: memref<32x64xf32, #tpu.memory_space<vmem>>, %arg8: memref<1x64xf32, #tpu.memory_space<vmem>>, %arg9: memref<64x128xf32, #tpu.memory_space<vmem>>, %arg10: memref<128x128xf32, #tpu.memory_space<vmem>>, %arg11: memref<128x128xf32, #tpu.memory_space<vmem>>, %arg12: memref<128x128xf32, #tpu.memory_space<vmem>>, %arg13: memref<1x128xf32, #tpu.memory_space<vmem>>, %arg14: memref<128x128xf32, #tpu.memory_space<vmem>>, %arg15: memref<128x128xf32, #tpu.memory_space<vmem>>, %arg16: memref<128x128xf32, #tpu.memory_space<vmem>>) attributes {dimension_semantics = [#tpu.dimension_semantics<parallel>, #tpu.dimension_semantics<arbitrary>], iteration_bounds = array<i64: 2, 1>, scalar_prefetch = 0 : i64, scratch_operands = 2 : i64, tpu.core_type = #tpu.core_type<tc>, window_params = [{transform_indices = @transform_0, window_bounds = array<i64: 128, 256>}, {transform_indices = @transform_1, window_bounds = array<i64: 128, 256>}, {transform_indices = @transform_2, window_bounds = array<i64: 256, 128>}, {transform_indices = @transform_3, window_bounds = array<i64: 128, 32>}, {transform_indices = @transform_4, window_bounds = array<i64: 128, 128>}, {pipeline_mode = #tpu.pipeline_mode<synchronous>, transform_indices = @transform_5, window_bounds = array<i64: 32, 64>}, {pipeline_mode = #tpu.pipeline_mode<synchronous>, transform_indices = @transform_6, window_bounds = array<i64: 1, 64>}, {pipeline_mode = #tpu.pipeline_mode<synchronous>, transform_indices = @transform_7, window_bounds = array<i64: 64, 128>}, {pipeline_mode = #tpu.pipeline_mode<synchronous>, transform_indices = @transform_8, window_bounds = array<i64: 128, 128>}, {pipeline_mode = #tpu.pipeline_mode<synchronous>, transform_indices = @transform_9, window_bounds = array<i64: 128, 128>}, {pipeline_mode = #tpu.pipeline_mode<synchronous>, transform_indices = @transform_10, window_bounds = array<i64: 128, 128>}, {pipeline_mode = #tpu.pipeline_mode<synchronous>, transform_indices = @transform_11, window_bounds = array<i64: 1, 128>}, {transform_indices = @transform_12, window_bounds = array<i64: 128, 128>}]} {
    %c0_i32 = arith.constant 0 : i32
    %0 = arith.cmpi eq, %arg1, %c0_i32 : i32
    %1 = arith.extui %0 : i1 to i32
    %c0_i32_0 = arith.constant 0 : i32
    %2 = arith.cmpi ne, %1, %c0_i32_0 : i32
    scf.if %2 {
      %cst_17 = arith.constant 0.000000e+00 : f32
      %21 = vector.broadcast %cst_17 : f32 to vector<128x128xf32>
      %c0_18 = arith.constant 0 : index
      %c0_19 = arith.constant 0 : index
      %22 = vector.load %arg15[%c0_18, %c0_19] : memref<128x128xf32, #tpu.memory_space<vmem>>, vector<128x128xf32>
      tpu.vector_store %arg15[%c0_18, %c0_19], %21 {strides = array<i32>} : memref<128x128xf32, #tpu.memory_space<vmem>>, vector<128x128xf32>,
      %cst_20 = arith.constant 0.000000e+00 : f32
      %23 = vector.broadcast %cst_20 : f32 to vector<128x128xf32>
      %c0_21 = arith.constant 0 : index
      %c0_22 = arith.constant 0 : index
      %24 = vector.load %arg16[%c0_21, %c0_22] : memref<128x128xf32, #tpu.memory_space<vmem>>, vector<128x128xf32>
      tpu.vector_store %arg16[%c0_21, %c0_22], %23 {strides = array<i32>} : memref<128x128xf32, #tpu.memory_space<vmem>>, vector<128x128xf32>,
    } else {
    }
    %c0 = arith.constant 0 : index
    %c0_1 = arith.constant 0 : index
    %3 = vector.load %arg4[%c0, %c0_1] : memref<256x128xbf16, #tpu.memory_space<vmem>>, vector<256x128xbf16>
    %c0_2 = arith.constant 0 : index
    %c0_3 = arith.constant 0 : index
    %4 = vector.load %arg2[%c0_2, %c0_3] : memref<128x256xi8, #tpu.memory_space<vmem>>, vector<128x256xi8>
    %5 = arith.sitofp %4 : vector<128x256xi8> to vector<128x256xf32>
    %6 = arith.truncf %5 : vector<128x256xf32> to vector<128x256xbf16>
    %c0_4 = arith.constant 0 : index
    %c0_5 = arith.constant 0 : index
    %7 = vector.load %arg3[%c0_4, %c0_5] : memref<128x256xi8, #tpu.memory_space<vmem>>, vector<128x256xi8>
    %8 = arith.sitofp %7 : vector<128x256xi8> to vector<128x256xf32>
    %9 = arith.truncf %8 : vector<128x256xf32> to vector<128x256xbf16>
    %c0_6 = arith.constant 0 : index
    %c0_7 = arith.constant 0 : index
    %10 = vector.load %arg15[%c0_6, %c0_7] : memref<128x128xf32, #tpu.memory_space<vmem>>, vector<128x128xf32>
    %cst = arith.constant dense<0.000000e+00> : vector<128x128xf32>
    %11 = tpu.matmul %6, %3, %cst {dimension_numbers = #tpu.dot_dimension_numbers<[1], [0], [0], [1], [0, 0, 1, 1], [], []>} : vector<128x256xbf16>, vector<256x128xbf16>, vector<128x128xf32> -> vector<128x128xf32>
    %12 = arith.addf %10, %11 : vector<128x128xf32>
    %c0_8 = arith.constant 0 : index
    %c0_9 = arith.constant 0 : index
    %13 = vector.load %arg15[%c0_8, %c0_9] : memref<128x128xf32, #tpu.memory_space<vmem>>, vector<128x128xf32>
    tpu.vector_store %arg15[%c0_8, %c0_9], %12 {strides = array<i32>} : memref<128x128xf32, #tpu.memory_space<vmem>>, vector<128x128xf32>,
    %c0_10 = arith.constant 0 : index
    %c0_11 = arith.constant 0 : index
    %14 = vector.load %arg16[%c0_10, %c0_11] : memref<128x128xf32, #tpu.memory_space<vmem>>, vector<128x128xf32>
    %cst_12 = arith.constant dense<0.000000e+00> : vector<128x128xf32>
    %15 = tpu.matmul %9, %3, %cst_12 {dimension_numbers = #tpu.dot_dimension_numbers<[1], [0], [0], [1], [0, 0, 1, 1], [], []>} : vector<128x256xbf16>, vector<256x128xbf16>, vector<128x128xf32> -> vector<128x128xf32>
    %16 = arith.addf %14, %15 : vector<128x128xf32>
    %c0_13 = arith.constant 0 : index
    %c0_14 = arith.constant 0 : index
    %17 = vector.load %arg16[%c0_13, %c0_14] : memref<128x128xf32, #tpu.memory_space<vmem>>, vector<128x128xf32>
    tpu.vector_store %arg16[%c0_13, %c0_14], %16 {strides = array<i32>} : memref<128x128xf32, #tpu.memory_space<vmem>>, vector<128x128xf32>,
    %c0_i32_15 = arith.constant 0 : i32
    %18 = arith.cmpi eq, %arg1, %c0_i32_15 : i32
    %19 = arith.extui %18 : i1 to i32
    %c0_i32_16 = arith.constant 0 : i32
    %20 = arith.cmpi ne, %19, %c0_i32_16 : i32
    scf.if %20 {
      %c0_17 = arith.constant 0 : index
      %c0_18 = arith.constant 0 : index
      %21 = vector.load %arg5[%c0_17, %c0_18] : memref<128x32xf32, #tpu.memory_space<vmem>>, vector<128x32xf32>
      %c0_19 = arith.constant 0 : index
      %c0_20 = arith.constant 0 : index
      %22 = vector.load %arg7[%c0_19, %c0_20] : memref<32x64xf32, #tpu.memory_space<vmem>>, vector<32x64xf32>
      %cst_21 = arith.constant dense<0.000000e+00> : vector<128x64xf32>
      %23 = tpu.matmul %21, %22, %cst_21 {dimension_numbers = #tpu.dot_dimension_numbers<[1], [0], [0], [1], [0, 0, 1, 1], [], []>} : vector<128x32xf32>, vector<32x64xf32>, vector<128x64xf32> -> vector<128x64xf32>
      %c0_22 = arith.constant 0 : index
      %c0_23 = arith.constant 0 : index
      %24 = vector.load %arg8[%c0_22, %c0_23] : memref<1x64xf32, #tpu.memory_space<vmem>>, vector<1x64xf32>
      %25 = vector.broadcast %24 : vector<1x64xf32> to vector<128x64xf32>
      %26 = arith.addf %23, %25 : vector<128x64xf32>
      %cst_24 = arith.constant 0.000000e+00 : f32
      %27 = vector.broadcast %cst_24 : f32 to vector<128x64xf32>
      %28 = arith.maximumf %26, %27 : vector<128x64xf32>
      %c0_25 = arith.constant 0 : index
      %c0_26 = arith.constant 0 : index
      %29 = vector.load %arg6[%c0_25, %c0_26] : memref<128x128xbf16, #tpu.memory_space<vmem>>, vector<128x128xbf16>
      %30 = arith.extf %29 : vector<128x128xbf16> to vector<128x128xf32>
      %c0_27 = arith.constant 0 : index
      %c0_28 = arith.constant 0 : index
      %31 = vector.load %arg9[%c0_27, %c0_28] : memref<64x128xf32, #tpu.memory_space<vmem>>, vector<64x128xf32>
      %cst_29 = arith.constant dense<0.000000e+00> : vector<128x128xf32>
      %32 = tpu.matmul %28, %31, %cst_29 {dimension_numbers = #tpu.dot_dimension_numbers<[1], [0], [0], [1], [0, 0, 1, 1], [], []>} : vector<128x64xf32>, vector<64x128xf32>, vector<128x128xf32> -> vector<128x128xf32>
      %c0_30 = arith.constant 0 : index
      %c0_31 = arith.constant 0 : index
      %33 = vector.load %arg10[%c0_30, %c0_31] : memref<128x128xf32, #tpu.memory_space<vmem>>, vector<128x128xf32>
      %cst_32 = arith.constant dense<0.000000e+00> : vector<128x128xf32>
      %34 = tpu.matmul %30, %33, %cst_32 {dimension_numbers = #tpu.dot_dimension_numbers<[1], [0], [0], [1], [0, 0, 1, 1], [], []>} : vector<128x128xf32>, vector<128x128xf32>, vector<128x128xf32> -> vector<128x128xf32>
      %35 = arith.addf %32, %34 : vector<128x128xf32>
      %c0_33 = arith.constant 0 : index
      %c0_34 = arith.constant 0 : index
      %36 = vector.load %arg15[%c0_33, %c0_34] : memref<128x128xf32, #tpu.memory_space<vmem>>, vector<128x128xf32>
      %c0_35 = arith.constant 0 : index
      %c0_36 = arith.constant 0 : index
      %37 = vector.load %arg11[%c0_35, %c0_36] : memref<128x128xf32, #tpu.memory_space<vmem>>, vector<128x128xf32>
      %cst_37 = arith.constant dense<0.000000e+00> : vector<128x128xf32>
      %38 = tpu.matmul %36, %37, %cst_37 {dimension_numbers = #tpu.dot_dimension_numbers<[1], [0], [0], [1], [0, 0, 1, 1], [], []>} : vector<128x128xf32>, vector<128x128xf32>, vector<128x128xf32> -> vector<128x128xf32>
      %39 = arith.addf %35, %38 : vector<128x128xf32>
      %c0_38 = arith.constant 0 : index
      %c0_39 = arith.constant 0 : index
      %40 = vector.load %arg16[%c0_38, %c0_39] : memref<128x128xf32, #tpu.memory_space<vmem>>, vector<128x128xf32>
      %c0_40 = arith.constant 0 : index
      %c0_41 = arith.constant 0 : index
      %41 = vector.load %arg12[%c0_40, %c0_41] : memref<128x128xf32, #tpu.memory_space<vmem>>, vector<128x128xf32>
      %cst_42 = arith.constant dense<0.000000e+00> : vector<128x128xf32>
      %42 = tpu.matmul %40, %41, %cst_42 {dimension_numbers = #tpu.dot_dimension_numbers<[1], [0], [0], [1], [0, 0, 1, 1], [], []>} : vector<128x128xf32>, vector<128x128xf32>, vector<128x128xf32> -> vector<128x128xf32>
      %43 = arith.addf %39, %42 : vector<128x128xf32>
      %c0_43 = arith.constant 0 : index
      %c0_44 = arith.constant 0 : index
      %44 = vector.load %arg13[%c0_43, %c0_44] : memref<1x128xf32, #tpu.memory_space<vmem>>, vector<1x128xf32>
      %45 = vector.broadcast %44 : vector<1x128xf32> to vector<128x128xf32>
      %46 = arith.addf %43, %45 : vector<128x128xf32>
      %cst_45 = arith.constant dense<0xFF800000> : vector<128xf32>
      %47 = vector.multi_reduction <maximumf>, %46, %cst_45 [1] : vector<128x128xf32> to vector<128xf32>
      %48 = vector.shape_cast %47 : vector<128xf32> to vector<128x1xf32>
      %49 = vector.broadcast %48 : vector<128x1xf32> to vector<128x128xf32>
      %50 = arith.subf %46, %49 : vector<128x128xf32>
      %51 = math.exp %50 : vector<128x128xf32>
      %cst_46 = arith.constant dense<0.000000e+00> : vector<128xf32>
      %52 = vector.multi_reduction <add>, %51, %cst_46 [1] : vector<128x128xf32> to vector<128xf32>
      %53 = vector.shape_cast %52 : vector<128xf32> to vector<128x1xf32>
      %54 = math.log %53 : vector<128x1xf32>
      %55 = vector.broadcast %54 : vector<128x1xf32> to vector<128x128xf32>
      %56 = arith.subf %50, %55 : vector<128x128xf32>
      %c0_47 = arith.constant 0 : index
      %c0_48 = arith.constant 0 : index
      %57 = vector.load %arg14[%c0_47, %c0_48] : memref<128x128xf32, #tpu.memory_space<vmem>>, vector<128x128xf32>
      tpu.vector_store %arg14[%c0_47, %c0_48], %56 {strides = array<i32>} : memref<128x128xf32, #tpu.memory_space<vmem>>, vector<128x128xf32>,
    } else {
    }
    return
  }
  func.func @transform_0(%arg0: i32, %arg1: i32) -> (i32, i32) {
    %c0_i32 = arith.constant 0 : i32
    return %arg0, %arg1 : i32, i32
  }
  func.func @transform_1(%arg0: i32, %arg1: i32) -> (i32, i32) {
    %c0_i32 = arith.constant 0 : i32
    return %arg0, %arg1 : i32, i32
  }
  func.func @transform_2(%arg0: i32, %arg1: i32) -> (i32, i32) {
    %c0_i32 = arith.constant 0 : i32
    %c0_i32_0 = arith.constant 0 : i32
    return %arg1, %c0_i32 : i32, i32
  }
  func.func @transform_3(%arg0: i32, %arg1: i32) -> (i32, i32) {
    %c0_i32 = arith.constant 0 : i32
    %c0_i32_0 = arith.constant 0 : i32
    return %arg0, %c0_i32 : i32, i32
  }
  func.func @transform_4(%arg0: i32, %arg1: i32) -> (i32, i32) {
    %c0_i32 = arith.constant 0 : i32
    %c0_i32_0 = arith.constant 0 : i32
    return %arg0, %c0_i32 : i32, i32
  }
  func.func @transform_5(%arg0: i32, %arg1: i32) -> (i32, i32) {
    %c0_i32 = arith.constant 0 : i32
    %c0_i32_0 = arith.constant 0 : i32
    %c0_i32_1 = arith.constant 0 : i32
    return %c0_i32, %c0_i32_0 : i32, i32
  }
  func.func @transform_6(%arg0: i32, %arg1: i32) -> (i32, i32) {
    %c0_i32 = arith.constant 0 : i32
    %c0_i32_0 = arith.constant 0 : i32
    %c0_i32_1 = arith.constant 0 : i32
    return %c0_i32, %c0_i32_0 : i32, i32
  }
  func.func @transform_7(%arg0: i32, %arg1: i32) -> (i32, i32) {
    %c0_i32 = arith.constant 0 : i32
    %c0_i32_0 = arith.constant 0 : i32
    %c0_i32_1 = arith.constant 0 : i32
    return %c0_i32, %c0_i32_0 : i32, i32
  }
  func.func @transform_8(%arg0: i32, %arg1: i32) -> (i32, i32) {
    %c0_i32 = arith.constant 0 : i32
    %c0_i32_0 = arith.constant 0 : i32
    %c0_i32_1 = arith.constant 0 : i32
    return %c0_i32, %c0_i32_0 : i32, i32
  }
  func.func @transform_9(%arg0: i32, %arg1: i32) -> (i32, i32) {
    %c0_i32 = arith.constant 0 : i32
    %c0_i32_0 = arith.constant 0 : i32
    %c0_i32_1 = arith.constant 0 : i32
    return %c0_i32, %c0_i32_0 : i32, i32
  }
  func.func @transform_10(%arg0: i32, %arg1: i32) -> (i32, i32) {
    %c0_i32 = arith.constant 0 : i32
    %c0_i32_0 = arith.constant 0 : i32
    %c0_i32_1 = arith.constant 0 : i32
    return %c0_i32, %c0_i32_0 : i32, i32
  }
  func.func @transform_11(%arg0: i32, %arg1: i32) -> (i32, i32) {
    %c0_i32 = arith.constant 0 : i32
    %c0_i32_0 = arith.constant 0 : i32
    %c0_i32_1 = arith.constant 0 : i32
    return %c0_i32, %c0_i32_0 : i32, i32
  }
  func.func @transform_12(%arg0: i32, %arg1: i32) -> (i32, i32) {
    %c0_i32 = arith.constant 0 : i32
    %c0_i32_0 = arith.constant 0 : i32
    return %arg0, %c0_i32 : i32, i32
  }
}

</mosaic_0001>

<bundles_post_ra>
// kernel: h2gcn_forward.2
= control target key start
LH: loop header
LB: loop body
LE: loop exit
PB: predicated region body
PF: predicated region fallthrough
CT: control target
= control target key end

     0   :  { %s2859_s0 = inlined_call_operand.hbm [shape: s8[256,256], index: 0, kind: input, shape index: {}]   ;;  %s2860_s1 = inlined_call_operand.hbm [shape: s8[256,256], index: 1, kind: input, shape index: {}]   ;;  %s2861_s2 = inlined_call_operand.hbm [shape: f32[256,32], index: 2, kind: input, shape index: {}]   ;;  %s2862_s3 = inlined_call_operand.hbm [shape: f32[32,64], index: 3, kind: input, shape index: {}]   ;;  %s2863_s4 = inlined_call_operand.hbm [shape: f32[1,64], index: 4, kind: input, shape index: {}]   ;;  %s2864_s5 = inlined_call_operand.hbm [shape: bf16[256,128], index: 5, kind: output, shape index: {}]  }
   0x1   :  { %2869 = sst [smem:[#allocation20_spill]] %s2859_s0 }
   0x2   :  { %2870 = sst [smem:[#allocation21_spill]] %s2861_s2 }
   0x3   :  { %2871 = sst [smem:[#allocation22_spill]] %s2862_s3 }
   0x4   :  { %10 = vsyncpa [#allocation5], 0 }
   0x5   :  { %12 = vsyncpa [#allocation5 + $0x1], 0 }
   0x6   :  { %13 = vsyncpa [#allocation8], 0 }
   0x7   :  { %15 = vsyncpa [#allocation8 + $0x1], 0 }
   0x8   :  { %16 = vsyncpa [#allocation11], 0 }
   0x9   :  { %17 = vsyncpa [#allocation6], 0 }
   0xa   :  { %19 = vsyncpa [#allocation6 + $0x1], 0  ;;  %s2282_s18 = smov 0   ;;  %s2284_s19 = smov 0  }
   0xb   :  { %s2286_s20 = smov 0   ;;  %s2288_s21 = smov 0  }
   0xc   :  { %s2290_s22 = smov 0   ;;  %s2292_s23 = smov 0  }
   0xd LB: > { %s2313_s24 = sadd.s32 4294967295, %s2237_s23   ;;  %s1534_s25 = sadd.s32 4294967294, %s2237_s23   ;;  %s2237_s23 = sphi %s2292_s23, %s25_s23   ;;  %s2233_s22 = sphi %s2290_s22, %s2897_s22   ;;  %s2229_s21 = sphi %s2288_s21, %s2896_s21   ;;  %s2225_s20 = sphi %s2286_s20, %s2895_s20   ;;  %s2221_s19 = sphi %s2284_s19, %s2894_s19   ;;  %s2217_s18 = sphi %s2282_s18, %s2893_s18  }
   0xe   : > { %p59_p0 = scmp.ne.s32.totalorder %s2221_s19, %s2217_s18  ;;  %p2865_p1 = scmp.eq.s32.totalorder %s2313_s24, 0 }
   0xf   : > { %p185_p3 = scmp.eq.s32.totalorder %s1534_s25, 1  ;;  %p1535_p5 = scmp.ge.s32.totalorder %s2237_s23, 1 }
  0x10   : > { %p2322_p4 = por %p2865_p1, %p59_p0  ;;  %p192_p7 = scmp.lt.s32.totalorder %s2237_s23, 3 }
  0x11   : > { %p2327_p6 = por %p185_p3, %p59_p0  ;;  %s2239_s29 = smov [#allocation9]  }
  0x12   : > { %s2872_s26 = scalar_select %p2322_p4, 1, 0 }
  0x13   : > { %s2873_s27 = scalar_select %p2327_p6, 1, 0 }
  0x14   : > { %p2332_p8 = pnand %p1535_p5, %p192_p7  ;;  %s207_s30 = sshll.u32 %s2239_s29, 4  ;;  %s2336_s30 = int_to_ptr.vmem [resolvable:$true] %s207_s30 }
  0x15   : > { %2874 = sst [smem:[#allocation19_spill]] %s2873_s27  ;;  %s2240_s7 = smov [#allocation10]  }
  0x16   : > { %s2875_s28 = scalar_select %p2332_p8, 1, 0 }
  0x17   : > { %p1912_p9 = pneg %p2332_p8  ;;  %s220_s8 = sshll.u32 %s2240_s7, 4  ;;  %s2347_s8 = int_to_ptr.vmem [resolvable:$true] %s220_s8 }
  0x18   : > { %s2241_s9 = smov [#allocation12]   ;;  %s2877_s2 = sld [smem:[#allocation21_spill]] }
  0x19   : > { %p2343_p11 = pnand %p1912_p9, %p2865_p1  ;;  %s2349_s10 = sshll.u32 %s2241_s9, 4  ;;  %s235_s10 = int_to_ptr.vmem [resolvable:$true] %s2349_s10 }
  0x1b   : > { %p2359_p13 = pneg %p2343_p11 }
  0x1e   : > { %s1999_s13 = scalar_lea.hbm %s2877_s2, 4096 }
  0x1f   : > { %p2000_p12 = scmp.ne.s32.totalorder %s2877_s2, %s1999_s13  ;;  %p2006_p5 = scmp.lt.u32.totalorder %s1999_s13, %s2877_s2 }
  0x21   : > { %p2002_p0 = pnand %p2359_p13, %p2000_p12 }
  0x23   : > { %p2003_p3 = pneg %p2002_p0 }
  0x25   : > { %p2008_p7 = pnand %p2006_p5, %p2003_p3 }
  0x27   : > { %2011 = shalt.err (!%p2008_p7)
}
  0x28   : > { %s2012_s29 = scalar_lea.vmem %s2336_s30, 4096  ;;  %p2020_p2 = scmp.lt.s32.totalorder %s2336_s30, %s2336_s30 }
  0x29   : > { %p2013_p9 = scmp.ne.s32.totalorder %s2336_s30, %s2012_s29  ;;  %p2021_p6 = scmp.lt.s32.totalorder %s2012_s29, %s2012_s29 }
  0x2b   : > { %p2015_p10 = pnand %p2013_p9, %p2359_p13  ;;  %p2022_p12 = por %p2021_p6, %p2020_p2 }
  0x2d   : > { %p2016_p1 = pneg %p2015_p10 }
  0x2f   : > { %p2023_p0 = pnand %p2022_p12, %p2016_p1 }
  0x31   : > { %2026 = shalt.err (!%p2023_p0)
}
  0x32   : > { %s2242_s7 = smov 128   ;;  %s2243_s9 = smov 8  }
  0x33   : > { %1915 = dma.hbm_to_vmem [thread:$0]  (!%p2343_p11), %s2877_s2, 4096, %s2336_s30, [#allocation8], %s2242_s7, %s2242_s7, %s2243_s9  }
  0x34   : > { %s2879_s3 = sld [smem:[#allocation22_spill]] }
  0x3a   : > { %s2027_s15 = scalar_lea.hbm %s2879_s3, 512 }
  0x3b   : > { %p2028_p2 = scmp.ne.s32.totalorder %s2879_s3, %s2027_s15  ;;  %p2034_p10 = scmp.lt.u32.totalorder %s2027_s15, %s2879_s3 }
  0x3d   : > { %p2030_p1 = pnand %p2028_p2, %p2359_p13 }
  0x3f   : > { %p2031_p6 = pneg %p2030_p1 }
  0x41   : > { %p2036_p3 = pnand %p2034_p10, %p2031_p6 }
  0x43   : > { %2039 = shalt.err (!%p2036_p3)
}
  0x44   : > { %s2040_s30 = scalar_lea.vmem %s2347_s8, 512  ;;  %p2048_p12 = scmp.lt.s32.totalorder %s2347_s8, %s2347_s8 }
  0x45   : > { %p2041_p5 = scmp.ne.s32.totalorder %s2347_s8, %s2040_s30  ;;  %p2049_p0 = scmp.lt.s32.totalorder %s2040_s30, %s2040_s30 }
  0x47   : > { %p2043_p7 = pnand %p2041_p5, %p2359_p13  ;;  %p2050_p2 = por %p2049_p0, %p2048_p12 }
  0x49   : > { %p2044_p9 = pneg %p2043_p7 }
  0x4b   : > { %p2051_p1 = pnand %p2050_p2, %p2044_p9 }
  0x4d   : > { %2054 = shalt.err (!%p2051_p1)
}
  0x4e   : > { %1918 = dma.hbm_to_vmem [thread:$0]  (!%p2343_p11), %s2879_s3, 512, %s2347_s8, [#allocation11], %s2242_s7, %s2242_s7, %s2243_s9  }
  0x4f   : > { %s2055_s14 = scalar_lea.hbm %s2863_s4, 16 }
  0x50   : > { %p2056_p6 = scmp.ne.s32.totalorder %s2863_s4, %s2055_s14  ;;  %p2062_p5 = scmp.lt.u32.totalorder %s2055_s14, %s2863_s4 }
  0x52   : > { %p2058_p10 = pnand %p2056_p6, %p2359_p13 }
  0x54   : > { %p2059_p3 = pneg %p2058_p10 }
  0x56   : > { %p2064_p7 = pnand %p2062_p5, %p2059_p3 }
  0x58   : > { %2067 = shalt.err (!%p2064_p7)
}
  0x59   : > { %s2068_s30 = scalar_lea.vmem %s235_s10, 16  ;;  %s2075_s8 = scalar_lea.vmem %s235_s10, 32 }
  0x5a   : > { %p2069_p9 = scmp.ne.s32.totalorder %s235_s10, %s2068_s30  ;;  %p2076_p2 = scmp.lt.s32.totalorder %s235_s10, %s235_s10 }
  0x5b   : > { %p2077_p1 = scmp.lt.s32.totalorder %s2075_s8, %s2068_s30 }
  0x5c   : > { %p2071_p12 = pnand %p2069_p9, %p2359_p13 }
  0x5d   : > { %p2078_p4 = por %p2077_p1, %p2076_p2 }
  0x5e   : > { %p2072_p0 = pneg %p2071_p12 }
  0x60   : > { %p2079_p8 = pnand %p2078_p4, %p2072_p0 }
  0x62   : > { %2082 = shalt.err (!%p2079_p8)
}
  0x63   : > { %1921 = dma.hbm_to_vmem [thread:$0]  (!%p2343_p11), %s2863_s4, 16, %s235_s10, [#allocation11]  }
  0x64   : > { %s46_s16 = sadd.s32 1, %s2225_s20  ;;  %s37_s27 = sadd.s32 1, %s2233_s22 }
  0x65   : > { %p53_p4 = scmp.ne.s32.totalorder %s2225_s20, %s2221_s19  ;;  %p39_p8 = scmp.ge.s32.totalorder %s37_s27, 2 }
  0x66   : > { %p54_p13 = scmp.eq.s32.totalorder %s2237_s23, 0  ;;  %p2880_p6 = scmp.eq.s32.totalorder %s2313_s24, 1 }
  0x67   : > { %p1936_p3 = scmp.lt.s32.totalorder %s2237_s23, 2  ;;  %s2899_s27 = smov (%p39_p8, %s37_s27), 0 }
  0x68   : > { %p2429_p10 = por %p2880_p6, %p53_p4  ;;  %p55_p5 = por %p54_p13, %p53_p4 }
  0x69   : > { %s245_s11 = sand.u32 1, %s2225_s20   ;;  %s41_s12 = ssub.s32 %s2233_s22, %s2899_s27 }
  0x6a   : > { %p44_p11 = scmp.eq.s32.totalorder %s41_s12, 0  ;;  %s2439_s10 = sshll.u32 %s245_s11, 6 }
  0x6b   : > { %s1626_s13 = sshll.u32 %s2233_s22, 10  ;;  %s2882_s0 = sld [smem:[#allocation20_spill]] }
  0x6c   : > { %s2443_s14 = scalar_select %p44_p11, %s2225_s20, %s46_s16  }
  0x6d   : > { %s249_s29 = scalar_lea.vmem [#allocation4], %s2439_s10  ;;  %p2457_p7 = pnand %p1936_p3, %p55_p5 }
  0x6e   : > { %s259_s30 = sshll.u32 %s249_s29, 4  ;;  %s2461_s7 = scalar_lea.sflag [#allocation5], %s245_s11  ;;  %s2453_s30 = int_to_ptr.vmem [resolvable:$true] %s259_s30 }
  0x6f   : > { %p2085_p12 = pneg %p2457_p7 }
  0x71   : > { %s2450_s25 = scalar_lea.hbm %s2882_s0, %s1626_s13  ;;  %s2088_s15 = scalar_lea.hbm %s2882_s0, 2048 }
  0x72   : > { %s2083_s9 = scalar_lea.hbm %s2450_s25, 1024  ;;  %p2089_p1 = scmp.lt.u32.totalorder %s2450_s25, %s2882_s0 }
  0x73   : > { %p2084_p9 = scmp.ne.s32.totalorder %s2450_s25, %s2083_s9  ;;  %p2090_p4 = scmp.lt.u32.totalorder %s2088_s15, %s2083_s9 }
  0x74   : > { %p2092_p13 = scmp.lt.u32.totalorder %s2083_s9, %s2450_s25 }
  0x75   : > { %p2086_p0 = pnand %p2085_p12, %p2084_p9  ;;  %p2091_p8 = por %p2090_p4, %p2089_p1 }
  0x77   : > { %p2087_p2 = pneg %p2086_p0  ;;  %p2093_p6 = por %p2092_p13, %p2091_p8 }
  0x79   : > { %p2094_p3 = pnand %p2093_p6, %p2087_p2 }
  0x7b   : > { %2097 = shalt.err (!%p2094_p3)
}
  0x7c   : > { %s2098_s11 = scalar_lea.vmem %s2453_s30, 1024  ;;  %s2244_s16 = smov [#allocation4]  }
  0x7d   : > { %p2099_p5 = scmp.ne.s32.totalorder %s2453_s30, %s2098_s11  ;;  %s2103_s12 = sshll.u32 %s2244_s16, 4  ;;  %s2104_s12 = int_to_ptr.vmem [resolvable:$false] %s2103_s12 }
  0x7e   : > { %s2105_s17 = scalar_lea.vmem %s2104_s12, 2048  ;;  %p2106_p0 = scmp.lt.s32.totalorder %s2453_s30, %s2104_s12 }
  0x7f   : > { %p2101_p11 = pnand %p2099_p5, %p2085_p12  ;;  %p2107_p1 = scmp.lt.s32.totalorder %s2105_s17, %s2098_s11 }
  0x81   : > { %p2102_p9 = pneg %p2101_p11  ;;  %p2108_p4 = por %p2107_p1, %p2106_p0 }
  0x83   : > { %p2109_p8 = pnand %p2108_p4, %p2102_p9 }
  0x85   : > { %2112 = shalt.err (!%p2109_p8)
}
  0x86   : > { %s2245_s9 = smov 256   ;;  %s2246_s15 = smov 16  }
  0x87   : > { %1925 = dma.hbm_to_vmem [thread:$0]  (!%p2457_p7), %s2450_s25, 1024, %s2453_s30, %s2461_s7, %s2245_s9, %s2245_s9, %s2246_s15  }
  0x88   : > { %s2497_s16 = scalar_lea.hbm %s2860_s1, %s1626_s13  ;;  %s273_s12 = scalar_lea.vmem [#allocation7], %s2439_s10 }
  0x89   : > { %s283_s17 = sshll.u32 %s273_s12, 4  ;;  %s269_s0 = sand.u32 1, %s2237_s23   ;;  %s2500_s17 = int_to_ptr.vmem [resolvable:$true] %s283_s17 }
  0x8a   : > { %s2503_s2 = scalar_lea.sflag [#allocation8], %s269_s0  ;;  %s2113_s3 = scalar_lea.hbm %s2497_s16, 1024 }
  0x8b   : > { %p2114_p2 = scmp.ne.s32.totalorder %s2497_s16, %s2113_s3  ;;  %s2118_s30 = scalar_lea.hbm %s2860_s1, 2048 }
  0x8c   : > { %p2119_p3 = scmp.lt.u32.totalorder %s2497_s16, %s2860_s1  ;;  %p2120_p5 = scmp.lt.u32.totalorder %s2118_s30, %s2113_s3 }
  0x8d   : > { %p2116_p13 = pnand %p2114_p2, %p2085_p12  ;;  %p2122_p9 = scmp.lt.u32.totalorder %s2113_s3, %s2497_s16 }
  0x8e   : > { %p2121_p11 = por %p2120_p5, %p2119_p3 }
  0x8f   : > { %p2117_p6 = pneg %p2116_p13 }
  0x90   : > { %p2123_p0 = por %p2122_p9, %p2121_p11 }
  0x92   : > { %p2124_p1 = pnand %p2123_p0, %p2117_p6 }
  0x94   : > { %2127 = shalt.err (!%p2124_p1)
}
  0x95   : > { %s2128_s0 = scalar_lea.vmem %s2500_s17, 1024  ;;  %s2247_s10 = smov [#allocation7]  }
  0x96   : > { %p2129_p4 = scmp.ne.s32.totalorder %s2500_s17, %s2128_s0  ;;  %s2133_s11 = sshll.u32 %s2247_s10, 4  ;;  %s2134_s11 = int_to_ptr.vmem [resolvable:$false] %s2133_s11 }
  0x97   : > { %s2135_s12 = scalar_lea.vmem %s2134_s11, 2048  ;;  %p2136_p13 = scmp.lt.s32.totalorder %s2500_s17, %s2134_s11 }
  0x98   : > { %p2131_p8 = pnand %p2129_p4, %p2085_p12  ;;  %p2137_p3 = scmp.lt.s32.totalorder %s2135_s12, %s2128_s0 }
  0x9a   : > { %p2132_p2 = pneg %p2131_p8  ;;  %p2138_p5 = por %p2137_p3, %p2136_p13 }
  0x9c   : > { %p2139_p11 = pnand %p2138_p5, %p2132_p2 }
  0x9e   : > { %2142 = shalt.err (!%p2139_p11)
}
  0x9f   : > { %1928 = dma.hbm_to_vmem [thread:$0]  (!%p2457_p7), %s2497_s16, 1024, %s2500_s17, %s2503_s2, %s2245_s9, %s2245_s9, %s2246_s15  }
  0xa0   : > { %p2884_p12 = scmp.ne.s32.totalorder %s2875_s28, 0 }
  0xa1   : > { %s2535_s3 = sand.u32 (!%p2884_p12), 1, %s2221_s19   ;;  %p2885_p6 = scmp.ne.s32.totalorder (!%p2884_p12), %s2872_s26, 0 }
  0xa2   : > { %295 = sbr.rel (%p2884_p12) target bundleno = 857 (0x359), region = 40  ;;  %s2538_s25 = sshll.u32 (!%p2884_p12), %s2535_s3, 6 }
  0xa3   : > { %s298_s8 = scalar_lea.sflag (!%p2884_p12), [#allocation5], %s2535_s3  ;;  %s2542_s13 = scalar_lea.vmem (!%p2884_p12), [#allocation4], %s2538_s25 }
  0xa9   : > { %2196 = dma.done.wait (%p2885_p6), %s298_s8, 1024  }
  0xaa   : > { %2198 = vsyncadd (%p2885_p6), %s298_s8, 4294966272  ;;  %s306_s2 = sand.u32 1, %s2313_s24   ;;  %s2550_s9 = scalar_lea.vmem [#allocation7], %s2538_s25 }
  0xab   : > { %s307_s28 = scalar_lea.sflag [#allocation8], %s306_s2 }
  0xac   : > { %2200 = dma.done.wait (%p2885_p6), %s307_s28, 1024  }
  0xad   : > { %2202 = vsyncadd (%p2885_p6), %s307_s28, 4294966272  ;;  %p2886_p7 = scmp.eq.s32.totalorder %s2313_s24, 0 }
  0xaf   : > { %2204 = dma.done.wait (%p2886_p7), [#allocation8], 4096   ;;  %p2887_p9 = pmov %p2886_p7 }
  0xb0   : > { %p2888_p0 = pmov %p2886_p7 }
  0xb1   : > { %2206 = vsyncadd (%p2887_p9), [#allocation8], 4294963200 }
  0xb2   : > { %2208 = dma.done.wait (%p2888_p0), [#allocation11], 528   ;;  %p2889_p1 = pmov %p2888_p0 }
  0xb3   : > { %vm441_vm0 = vcmask 261120   ;;  %v430_v0 = vld [vmem:[#allocation10] sm:$0xff]  ;;  %v431_v1 = vld [vmem:[#allocation10 + $0x8] sm:$0xff]  ;;  %v432_v2 = vld [vmem:[#allocation10 + $0x10] sm:$0xff]  ;;  %vm365_vm1 = vcmask 523264   ;;  %vm1233_vm2 = vcmask 519168  }
  0xb4   : > { %2210 = vsyncadd (%p2889_p1), [#allocation11], 4294966768  ;;  %v1882_v3 = vpack.c.bf16 %v431_v1, %v430_v0  ;;  %v433_v4 = vld [vmem:[#allocation10 + $0x18] sm:$0xff]  ;;  %v398_v5 = vld [vmem:[#allocation9] sm:$0xff]  ;;  %s2249_s24 = smov 64   ;;  %s2696_s26 = scalar_lea.vmem [#allocation13], %s2538_s25 }
  0xb5   : > { %v414_v6 = vld [vmem:[#allocation9 + $0x80] sm:$0xff]  ;;  %v1886_v7 = vpack.c.bf16 %v433_v4, %v432_v2  ;;  %1834 = vmatprep.mubr.msk.f32.mxu0 %vm441_vm0, %v398_v5  ;;  %v399_v8 = vld [vmem:[#allocation9 + $0x8] sm:$0xff]  ;;  %v400_v10 = vld [vmem:[#allocation9 + $0x10] sm:$0xff]  ;;  %vm1362_vm3 = vcmask 1043968   ;;  %s1661_s15 = sshll.u32 %s2229_s21, 10  ;;  %s1393_s16 = sshll.u32 %s2696_s26, 4  ;;  %s2806_s16 = int_to_ptr.vmem [resolvable:$true] %s1393_s16 }
  0xb6   : > { %1858 = vmatprep.mubr.msk.f32.mxu1 %vm441_vm0, %v414_v6  ;;  %1883 = vmatprep.subr.bf16.mxu0 %v1882_v3  ;;  %v415_v9 = vld [vmem:[#allocation9 + $0x88] sm:$0xff]  ;;  %v416_v11 = vld [vmem:[#allocation9 + $0x90] sm:$0xff]  ;;  %v401_v12 = vld [vmem:[#allocation9 + $0x18] sm:$0xff]  ;;  %s2802_s7 = scalar_lea.hbm %s2864_s5, %s1661_s15  ;;  %s1380_s29 = scalar_lea.sflag [#allocation6], %s2535_s3 }
  0xb7   : > { %1890 = vmatprep.subr.bf16.mxu1 %v1882_v3  ;;  %1885 = vmatpush3.bf16.msra.mxu0 %v1882_v3  ;;  %v417_v13 = vld [vmem:[#allocation9 + $0x98] sm:$0xff]  ;;  %v402_v14 = vld [vmem:[#allocation9 + $0x20] sm:$0xff]  ;;  %v403_v16 = vld [vmem:[#allocation9 + $0x28] sm:$0xff]  ;;  %s2143_s0 = scalar_lea.vmem %s2806_s16, 1024  ;;  %s2250_s21 = smov [#allocation13]  }
  0xb8   : > { %1892 = vmatpush3.bf16.msra.mxu1 %v1882_v3  ;;  %1887 = vmatprep.subr.bf16.mxu0 %v1886_v7  ;;  %v418_v15 = vld [vmem:[#allocation9 + $0xa0] sm:$0xff]  ;;  %v419_v17 = vld [vmem:[#allocation9 + $0xa8] sm:$0xff]  ;;  %v404_v18 = vld [vmem:[#allocation9 + $0x30] sm:$0xff]  ;;  %p2144_p4 = scmp.ne.s32.totalorder %s2806_s16, %s2143_s0  ;;  %s2147_s10 = sshll.u32 %s2250_s21, 4  ;;  %s2148_s10 = int_to_ptr.vmem [resolvable:$false] %s2147_s10 }
  0xb9   : > { %1891 = vmatprep.subr.bf16.mxu1 %v1886_v7  ;;  %v420_v19 = vld [vmem:[#allocation9 + $0xb0] sm:$0xff]  ;;  %v405_v20 = vld [vmem:[#allocation9 + $0x38] sm:$0xff]  ;;  %v406_v22 = vld [vmem:[#allocation9 + $0x40] sm:$0xff]  ;;  %s2149_s11 = scalar_lea.vmem %s2148_s10, 2048  ;;  %p2150_p13 = scmp.lt.s32.totalorder %s2806_s16, %s2148_s10 }
  0xba   : > { %v421_v21 = vld [vmem:[#allocation9 + $0xb8] sm:$0xff]  ;;  %v422_v23 = vld [vmem:[#allocation9 + $0xc0] sm:$0xff]  ;;  %v407_v24 = vld [vmem:[#allocation9 + $0x48] sm:$0xff]  ;;  %p2145_p8 = pnand %p2144_p4, %p2429_p10  ;;  %p2151_p3 = scmp.lt.s32.totalorder %s2149_s11, %s2143_s0 }
  0xbb   : > { %1889 = vmatpush3.bf16.msra.mxu0 %v1886_v7  ;;  %v423_v25 = vld [vmem:[#allocation9 + $0xc8] sm:$0xff]  ;;  %v408_v26 = vld [vmem:[#allocation9 + $0x50] sm:$0xff]  ;;  %v409_v28 = vld [vmem:[#allocation9 + $0x58] sm:$0xff] }
  0xbc   : > { %1893 = vmatpush3.bf16.msra.mxu1 %v1886_v7  ;;  %v424_v27 = vld [vmem:[#allocation9 + $0xd0] sm:$0xff]  ;;  %v425_v29 = vld [vmem:[#allocation9 + $0xd8] sm:$0xff]  ;;  %v410_v30 = vld [vmem:[#allocation9 + $0x60] sm:$0xff]  ;;  %p2146_p2 = pneg %p2145_p8  ;;  %p2152_p5 = por %p2151_p3, %p2150_p13 }
  0xbd   : > { %v426_v31 = vld [vmem:[#allocation9 + $0xe0] sm:$0xff]  ;;  %v411_v32 = vld [vmem:[#allocation9 + $0x68] sm:$0xff]  ;;  %v412_v34 = vld [vmem:[#allocation9 + $0x70] sm:$0xff] }
  0xbe   : > { %1835 = vmatmul.mubr.msk.f32.vlgmr.msra.gmra.mrb[0].mxu0 %vm441_vm0, %v399_v8  ;;  %v427_v33 = vld [vmem:[#allocation9 + $0xe8] sm:$0xff]  ;;  %v428_v35 = vld [vmem:[#allocation9 + $0xf0] sm:$0xff]  ;;  %v413_v36 = vld [vmem:[#allocation9 + $0x78] sm:$0xff]  ;;  %p2153_p11 = pnand %p2152_p5, %p2146_p2 }
  0xbf   : > { %1859 = vmatmul.mubr.msk.f32.vlgmr.msra.gmra.mrb[0].mxu1 %vm441_vm0, %v415_v9  ;;  %1837 = vmatprep.mubr.msk.f32.mxu0 %vm441_vm0, %v400_v10  ;;  %v429_v37 = vld [vmem:[#allocation9 + $0xf8] sm:$0xff]  ;;  %v2597_v38 = vld [vmem:[%s2550_s9 + $0x8] sm:$0xff]  ;;  %v2604_v42 = vld [vmem:[#allocation12] ss:$0 sm:$0xff] }
  0xc0   : > { %1861 = vmatprep.mubr.msk.f32.mxu1 %vm441_vm0, %v416_v11  ;;  %v844_v39 = vunpack.c.l.s8.bf16 %v2597_v38  ;;  %v2601_v40 = vld [vmem:[%s2542_s13 + $0x8] sm:$0xff] }
  0xc1   : > { %v820_v41 = vunpack.c.l.s8.bf16 %v2601_v40 }
  0xc2   : > { %1838 = vmatmul.mubr.msk.f32.gmra.mrb[2].mxu0 %vm441_vm0, %v401_v12 }
  0xc3   : > { %1862 = vmatmul.mubr.msk.f32.gmra.mrb[2].mxu1 %vm441_vm0, %v417_v13  ;;  %1840 = vmatprep.mubr.msk.f32.mxu0 %vm441_vm0, %v402_v14 }
  0xc4   : > { %1864 = vmatprep.mubr.msk.f32.mxu1 %vm441_vm0, %v418_v15 }
  0xc6   : > { %1841 = vmatmul.mubr.msk.f32.gmra.mrb[4].mxu0 %vm441_vm0, %v403_v16 }
  0xc7   : > { %1865 = vmatmul.mubr.msk.f32.gmra.mrb[4].mxu1 %vm441_vm0, %v419_v17  ;;  %1843 = vmatprep.mubr.msk.f32.mxu0 %vm441_vm0, %v404_v18 }
  0xc8   : > { %1867 = vmatprep.mubr.msk.f32.mxu1 %vm441_vm0, %v420_v19 }
  0xca   : > { %1844 = vmatmul.mubr.msk.f32.gmra.mrb[6].mxu0 %vm441_vm0, %v405_v20 }
  0xcb   : > { %1868 = vmatmul.mubr.msk.f32.gmra.mrb[6].mxu1 %vm441_vm0, %v421_v21  ;;  %1846 = vmatprep.mubr.msk.f32.mxu0 %vm441_vm0, %v406_v22 }
  0xcc   : > { %1870 = vmatprep.mubr.msk.f32.mxu1 %vm441_vm0, %v422_v23 }
  0xce   : > { %1847 = vmatmul.mubr.msk.f32.gmra.mrb[8].mxu0 %vm441_vm0, %v407_v24 }
  0xcf   : > { %1871 = vmatmul.mubr.msk.f32.gmra.mrb[8].mxu1 %vm441_vm0, %v423_v25  ;;  %1849 = vmatprep.mubr.msk.f32.mxu0 %vm441_vm0, %v408_v26 }
  0xd0   : > { %1873 = vmatprep.mubr.msk.f32.mxu1 %vm441_vm0, %v424_v27 }
  0xd2   : > { %1850 = vmatmul.mubr.msk.f32.gmra.mrb[10].mxu0 %vm441_vm0, %v409_v28 }
  0xd3   : > { %1874 = vmatmul.mubr.msk.f32.gmra.mrb[10].mxu1 %vm441_vm0, %v425_v29  ;;  %1852 = vmatprep.mubr.msk.f32.mxu0 %vm441_vm0, %v410_v30 }
  0xd4   : > { %1876 = vmatprep.mubr.msk.f32.mxu1 %vm441_vm0, %v426_v31 }
  0xd6   : > { %1853 = vmatmul.mubr.msk.f32.gmra.mrb[12].mxu0 %vm441_vm0, %v411_v32 }
  0xd7   : > { %1877 = vmatmul.mubr.msk.f32.gmra.mrb[12].mxu1 %vm441_vm0, %v427_v33  ;;  %1855 = vmatprep.mubr.msk.f32.mxu0 %vm441_vm0, %v412_v34 }
  0xd8   : > { %1879 = vmatprep.mubr.msk.f32.mxu1 %vm441_vm0, %v428_v35 }
  0xda   : > { %1856 = vmatmul.mubr.msk.f32.gmra.mrb[14].mxu0 %vm441_vm0, %v413_v36 }
  0xdb   : > { %1880 = vmatmul.mubr.msk.f32.gmra.mrb[14].mxu1 %vm441_vm0, %v429_v37  ;;  %1053 = vmatprep.mubr.bf16.mxu0 %v844_v39 }
  0xdc   : > { %907 = vmatprep.mubr.bf16.mxu1 %v820_v41 }
 0x191   : > { %v1836_v43 = vpop.f32.mrb[0].mxu0 }
 0x192   : > { %v1860_v44 = vpop.f32.mrb[0].mxu1  ;;  %v610_v45 = vadd.f32 %v1836_v43, %v2604_v42  ;;  %v604_v47 = vpop.f32.mrb[1].mxu0 }
 0x193   : > { %v690_v46 = vadd.f32 %v1860_v44, %v2604_v42  ;;  %v684_v48 = vpop.f32.mrb[1].mxu1  ;;  %v605_v49 = vadd.f32 %v2604_v42, %v604_v47 }
 0x194   : > { %v685_v50 = vadd.f32 %v2604_v42, %v684_v48  ;;  %v764_v51 = vmax.f32 %v610_v45, 0.0 }
 0x195   : > { %v780_v52 = vmax.f32 %v690_v46, 0.0  ;;  %v763_v53 = vmax.f32 %v605_v49, 0.0  ;;  %v1839_v55 = vpop.f32.mrb[2].mxu0 }
 0x196   : > { %v779_v54 = vmax.f32 %v685_v50, 0.0  ;;  %v1863_v56 = vpop.f32.mrb[2].mxu1  ;;  %v620_v57 = vadd.f32 %v1839_v55, %v2604_v42  ;;  %v614_v59 = vpop.f32.mrb[3].mxu0 }
 0x197   : > { %v700_v58 = vadd.f32 %v1863_v56, %v2604_v42  ;;  %v694_v60 = vpop.f32.mrb[3].mxu1  ;;  %v795_v61 = vpack.c.bf16 %v764_v51, %v763_v53  ;;  %v615_v63 = vadd.f32 %v2604_v42, %v614_v59 }
 0x198   : > { %v803_v62 = vpack.c.bf16 %v780_v52, %v779_v54  ;;  %v695_v0 = vadd.f32 %v2604_v42, %v694_v60  ;;  %v766_v1 = vmax.f32 %v620_v57, 0.0 }
 0x199   : > { %v782_v2 = vmax.f32 %v700_v58, 0.0  ;;  %v765_v3 = vmax.f32 %v615_v63, 0.0  ;;  %v1842_v5 = vpop.f32.mrb[4].mxu0 }
 0x19a   : > { %v781_v4 = vmax.f32 %v695_v0, 0.0  ;;  %v1866_v6 = vpop.f32.mrb[4].mxu1  ;;  %1698 = vmatprep.subr.bf16.mxu1 %v803_v62  ;;  %1762 = vmatprep.subr.bf16.mxu0 %v803_v62  ;;  %v630_v7 = vadd.f32 %v1842_v5, %v2604_v42  ;;  %v624_v9 = vpop.f32.mrb[5].mxu0 }
 0x19b   : > { %v710_v8 = vadd.f32 %v1866_v6, %v2604_v42  ;;  %v704_v10 = vpop.f32.mrb[5].mxu1  ;;  %1699 = vmatpush3.bf16.msra.mxu1 %v795_v61  ;;  %1763 = vmatpush3.bf16.msra.mxu0 %v795_v61  ;;  %v796_v11 = vpack.c.bf16 %v766_v1, %v765_v3  ;;  %v625_v13 = vadd.f32 %v2604_v42, %v624_v9 }
 0x19c   : > { %v804_v12 = vpack.c.bf16 %v782_v2, %v781_v4  ;;  %v705_v14 = vadd.f32 %v2604_v42, %v704_v10  ;;  %v768_v15 = vmax.f32 %v630_v7, 0.0 }
 0x19d   : > { %v784_v16 = vmax.f32 %v710_v8, 0.0  ;;  %v767_v17 = vmax.f32 %v625_v13, 0.0  ;;  %v1845_v19 = vpop.f32.mrb[6].mxu0 }
 0x19e   : > { %v783_v18 = vmax.f32 %v705_v14, 0.0  ;;  %v1869_v20 = vpop.f32.mrb[6].mxu1  ;;  %1700 = vmatprep.subr.bf16.mxu1 %v804_v12  ;;  %1764 = vmatprep.subr.bf16.mxu0 %v804_v12  ;;  %v640_v21 = vadd.f32 %v1845_v19, %v2604_v42  ;;  %v634_v23 = vpop.f32.mrb[7].mxu0 }
 0x19f   : > { %v720_v22 = vadd.f32 %v1869_v20, %v2604_v42  ;;  %v714_v24 = vpop.f32.mrb[7].mxu1  ;;  %1701 = vmatpush3.bf16.msra.mxu1 %v796_v11  ;;  %1765 = vmatpush3.bf16.msra.mxu0 %v796_v11  ;;  %v797_v25 = vpack.c.bf16 %v768_v15, %v767_v17  ;;  %v635_v27 = vadd.f32 %v2604_v42, %v634_v23 }
 0x1a0   : > { %v805_v26 = vpack.c.bf16 %v784_v16, %v783_v18  ;;  %v715_v28 = vadd.f32 %v2604_v42, %v714_v24  ;;  %v770_v29 = vmax.f32 %v640_v21, 0.0 }
 0x1a1   : > { %v786_v30 = vmax.f32 %v720_v22, 0.0  ;;  %v769_v31 = vmax.f32 %v635_v27, 0.0  ;;  %v1848_v33 = vpop.f32.mrb[8].mxu0 }
 0x1a2   : > { %v785_v32 = vmax.f32 %v715_v28, 0.0  ;;  %v1872_v34 = vpop.f32.mrb[8].mxu1  ;;  %1702 = vmatprep.subr.bf16.mxu1 %v805_v26  ;;  %1766 = vmatprep.subr.bf16.mxu0 %v805_v26  ;;  %v650_v35 = vadd.f32 %v1848_v33, %v2604_v42  ;;  %v644_v37 = vpop.f32.mrb[9].mxu0  ;;  %v835_v28 = vld [vmem:[%s2550_s9] sm:$0xff] }
 0x1a3   : > { %v730_v36 = vadd.f32 %v1872_v34, %v2604_v42  ;;  %v724_v39 = vpop.f32.mrb[9].mxu1  ;;  %1703 = vmatpush3.bf16.msra.mxu1 %v797_v25  ;;  %1767 = vmatpush3.bf16.msra.mxu0 %v797_v25  ;;  %v798_v41 = vpack.c.bf16 %v770_v29, %v769_v31  ;;  %v645_v44 = vadd.f32 %v2604_v42, %v644_v37  ;;  %v811_v29 = vld [vmem:[%s2542_s13] sm:$0xff]  ;;  %v822_v34 = vunpack.c.h.s8.bf16 %v2601_v40 }
 0x1a4   : > { %v806_v43 = vpack.c.bf16 %v786_v30, %v785_v32  ;;  %v725_v45 = vadd.f32 %v2604_v42, %v724_v39  ;;  %v772_v46 = vmax.f32 %v650_v35, 0.0  ;;  %v843_v32 = vunpack.c.l.s8.bf16 %v835_v28  ;;  %v838_v35 = vld [vmem:[%s2550_s9 + $0x18] sm:$0xff] }
 0x1a5   : > { %v788_v47 = vmax.f32 %v730_v36, 0.0  ;;  %v771_v48 = vmax.f32 %v645_v44, 0.0  ;;  %v1851_v50 = vpop.f32.mrb[10].mxu0  ;;  %v819_v33 = vunpack.c.l.s8.bf16 %v811_v29  ;;  %v814_v36 = vld [vmem:[%s2542_s13 + $0x18] sm:$0xff]  ;;  %v845_v37 = vunpack.c.h.s8.bf16 %v835_v28  ;;  %v837_v44 = vld [vmem:[%s2550_s9 + $0x10] sm:$0xff] }
 0x1a6   : > { %v787_v49 = vmax.f32 %v725_v45, 0.0  ;;  %v1875_v51 = vpop.f32.mrb[10].mxu1  ;;  %1704 = vmatprep.subr.bf16.mxu1 %v806_v43  ;;  %1768 = vmatprep.subr.bf16.mxu0 %v806_v43  ;;  %v660_v52 = vadd.f32 %v1851_v50, %v2604_v42  ;;  %v654_v54 = vpop.f32.mrb[11].mxu0  ;;  %v821_v39 = vunpack.c.h.s8.bf16 %v811_v29  ;;  %v824_v43 = vunpack.c.l.s8.bf16 %v814_v36 }
 0x1a7   : > { %v740_v53 = vadd.f32 %v1875_v51, %v2604_v42  ;;  %v734_v55 = vpop.f32.mrb[11].mxu1  ;;  %1705 = vmatpush3.bf16.msra.mxu1 %v798_v41  ;;  %1769 = vmatpush3.bf16.msra.mxu0 %v798_v41  ;;  %v799_v56 = vpack.c.bf16 %v772_v46, %v771_v48  ;;  %v655_v58 = vadd.f32 %v2604_v42, %v654_v54  ;;  %v848_v41 = vunpack.c.l.s8.bf16 %v838_v35  ;;  %v840_v48 = vld [vmem:[%s2550_s9 + $0x28] sm:$0xff]  ;;  %v839_v54 = vld [vmem:[%s2550_s9 + $0x20] sm:$0xff] }
 0x1a8   : > { %v807_v57 = vpack.c.bf16 %v788_v47, %v787_v49  ;;  %v735_v59 = vadd.f32 %v2604_v42, %v734_v55  ;;  %v774_v60 = vmax.f32 %v660_v52, 0.0  ;;  %v847_v40 = vunpack.c.l.s8.bf16 %v837_v44  ;;  %v816_v49 = vld [vmem:[%s2542_s13 + $0x28] sm:$0xff]  ;;  %v815_v55 = vld [vmem:[%s2542_s13 + $0x20] sm:$0xff] }
 0x1a9   : > { %v790_v61 = vmax.f32 %v740_v53, 0.0  ;;  %v773_v62 = vmax.f32 %v655_v58, 0.0  ;;  %v1854_v0 = vpop.f32.mrb[12].mxu0  ;;  %v850_v46 = vunpack.c.h.s8.bf16 %v838_v35  ;;  %v826_v47 = vunpack.c.h.s8.bf16 %v814_v36 }
 0x1aa   : > { %v789_v63 = vmax.f32 %v735_v59, 0.0  ;;  %v1878_v1 = vpop.f32.mrb[12].mxu1  ;;  %1706 = vmatprep.subr.bf16.mxu1 %v807_v57  ;;  %1770 = vmatprep.subr.bf16.mxu0 %v807_v57  ;;  %v670_v2 = vadd.f32 %v1854_v0, %v2604_v42  ;;  %v664_v4 = vpop.f32.mrb[13].mxu0  ;;  %v849_v50 = vunpack.c.h.s8.bf16 %v837_v44  ;;  %v852_v52 = vunpack.c.l.s8.bf16 %v840_v48 }
 0x1ab   : > { %v750_v3 = vadd.f32 %v1878_v1, %v2604_v42  ;;  %v744_v5 = vpop.f32.mrb[13].mxu1  ;;  %1707 = vmatpush3.bf16.msra.mxu1 %v799_v56  ;;  %1771 = vmatpush3.bf16.msra.mxu0 %v799_v56  ;;  %v800_v6 = vpack.c.bf16 %v774_v60, %v773_v62  ;;  %v665_v8 = vadd.f32 %v2604_v42, %v664_v4  ;;  %v828_v53 = vunpack.c.l.s8.bf16 %v816_v49  ;;  %v842_v60 = vld [vmem:[%s2550_s9 + $0x38] sm:$0xff] }
 0x1ac   : > { %v808_v7 = vpack.c.bf16 %v790_v61, %v789_v63  ;;  %v745_v9 = vadd.f32 %v2604_v42, %v744_v5  ;;  %v776_v10 = vmax.f32 %v670_v2, 0.0  ;;  %v851_v56 = vunpack.c.l.s8.bf16 %v839_v54  ;;  %v818_v61 = vld [vmem:[%s2542_s13 + $0x38] sm:$0xff]  ;;  %v841_v2 = vld [vmem:[%s2550_s9 + $0x30] sm:$0xff] }
 0x1ad   : > { %v792_v11 = vmax.f32 %v750_v3, 0.0  ;;  %v775_v12 = vmax.f32 %v665_v8, 0.0  ;;  %v1857_v14 = vpop.f32.mrb[14].mxu0  ;;  %v827_v57 = vunpack.c.l.s8.bf16 %v815_v55  ;;  %v854_v58 = vunpack.c.h.s8.bf16 %v840_v48  ;;  %v817_v3 = vld [vmem:[%s2542_s13 + $0x30] sm:$0xff] }
 0x1ae   : > { %v791_v13 = vmax.f32 %v745_v9, 0.0  ;;  %v1881_v15 = vpop.f32.mrb[14].mxu1  ;;  %1708 = vmatprep.subr.bf16.mxu1 %v808_v7  ;;  %1772 = vmatprep.subr.bf16.mxu0 %v808_v7  ;;  %v680_v16 = vadd.f32 %v1857_v14, %v2604_v42  ;;  %v674_v18 = vpop.f32.mrb[15].mxu0  ;;  %v830_v59 = vunpack.c.h.s8.bf16 %v816_v49  ;;  %v853_v62 = vunpack.c.h.s8.bf16 %v839_v54 }
 0x1af   : > { %v760_v17 = vadd.f32 %v1881_v15, %v2604_v42  ;;  %v754_v19 = vpop.f32.mrb[15].mxu1  ;;  %1709 = vmatpush3.bf16.msra.mxu1 %v800_v6  ;;  %1773 = vmatpush3.bf16.msra.mxu0 %v800_v6  ;;  %v801_v20 = vpack.c.bf16 %v776_v10, %v775_v12  ;;  %v675_v22 = vadd.f32 %v2604_v42, %v674_v18  ;;  %v829_v63 = vunpack.c.h.s8.bf16 %v815_v55 }
 0x1b0   : > { %v809_v21 = vpack.c.bf16 %v792_v11, %v791_v13  ;;  %v755_v23 = vadd.f32 %v2604_v42, %v754_v19  ;;  %v778_v24 = vmax.f32 %v680_v16, 0.0  ;;  %v846_v42 = vunpack.c.h.s8.bf16 %v2597_v38  ;;  %v813_v38 = vld [vmem:[%s2542_s13 + $0x10] sm:$0xff] }
 0x1b1   : > { %v794_v25 = vmax.f32 %v760_v17, 0.0  ;;  %v777_v26 = vmax.f32 %v675_v22, 0.0  ;;  %v823_v45 = vunpack.c.l.s8.bf16 %v813_v38  ;;  %v825_v51 = vunpack.c.h.s8.bf16 %v813_v38 }
 0x1b2   : > { %v793_v27 = vmax.f32 %v755_v23, 0.0  ;;  %1710 = vmatprep.subr.bf16.mxu1 %v809_v21  ;;  %1774 = vmatprep.subr.bf16.mxu0 %v809_v21  ;;  %v856_v0 = vunpack.c.l.s8.bf16 %v842_v60  ;;  %v832_v1 = vunpack.c.l.s8.bf16 %v818_v61  ;;  %v855_v4 = vunpack.c.l.s8.bf16 %v841_v2 }
 0x1b3   : > { %1711 = vmatpush3.bf16.msra.mxu1 %v801_v20  ;;  %1775 = vmatpush3.bf16.msra.mxu0 %v801_v20  ;;  %v802_v30 = vpack.c.bf16 %v778_v24, %v777_v26  ;;  %v831_v5 = vunpack.c.l.s8.bf16 %v817_v3  ;;  %v858_v6 = vunpack.c.h.s8.bf16 %v842_v60  ;;  %v834_v7 = vunpack.c.h.s8.bf16 %v818_v61 }
 0x1b4   : > { %v810_v31 = vpack.c.bf16 %v794_v25, %v793_v27  ;;  %v857_v8 = vunpack.c.h.s8.bf16 %v841_v2  ;;  %v833_v9 = vunpack.c.h.s8.bf16 %v817_v3  ;;  %v2248_v10 = vmov 0.0  }
 0x1b5   : > { %382 = vst.msk [vmem:[#allocation3] sm:$0xff] %vm365_vm1, %v2248_v10  ;;  %366 = vst.msk [vmem:[#allocation2] sm:$0xff] %vm365_vm1, %v2248_v10 }
 0x1b6   : > { %1712 = vmatprep.subr.bf16.mxu1 %v810_v31  ;;  %1776 = vmatprep.subr.bf16.mxu0 %v810_v31  ;;  %367 = vst.msk [vmem:[#allocation2 + $0x8] sm:$0xff] %vm365_vm1, %v2248_v10  ;;  %368 = vst.msk [vmem:[#allocation2 + $0x10] sm:$0xff] %vm365_vm1, %v2248_v10 }
 0x1b7   : > { %1713 = vmatpush3.bf16.msra.mxu1 %v802_v30  ;;  %1777 = vmatpush3.bf16.msra.mxu0 %v802_v30  ;;  %369 = vst.msk [vmem:[#allocation2 + $0x18] sm:$0xff] %vm365_vm1, %v2248_v10  ;;  %370 = vst.msk [vmem:[#allocation2 + $0x20] sm:$0xff] %vm365_vm1, %v2248_v10 }
 0x1b8   : > { %371 = vst.msk [vmem:[#allocation2 + $0x28] sm:$0xff] %vm365_vm1, %v2248_v10  ;;  %372 = vst.msk [vmem:[#allocation2 + $0x30] sm:$0xff] %vm365_vm1, %v2248_v10 }
 0x1b9   : > { %373 = vst.msk [vmem:[#allocation2 + $0x38] sm:$0xff] %vm365_vm1, %v2248_v10  ;;  %374 = vst.msk [vmem:[#allocation2 + $0x40] sm:$0xff] %vm365_vm1, %v2248_v10 }
 0x1ba   : > { %1054 = vmatmul.mubr.bf16.vlgmr.msra.gmra.mrb[16].mxu0 %v843_v32  ;;  %908 = vmatmul.mubr.bf16.vlgmr.msra.gmra.mrb[16].mxu1 %v819_v33  ;;  %375 = vst.msk [vmem:[#allocation2 + $0x48] sm:$0xff] %vm365_vm1, %v2248_v10  ;;  %376 = vst.msk [vmem:[#allocation2 + $0x50] sm:$0xff] %vm365_vm1, %v2248_v10 }
 0x1bb   : > { %1061 = vmatprep.mubr.bf16.mxu0 %v846_v42  ;;  %915 = vmatprep.mubr.bf16.mxu1 %v822_v34  ;;  %377 = vst.msk [vmem:[#allocation2 + $0x58] sm:$0xff] %vm365_vm1, %v2248_v10  ;;  %378 = vst.msk [vmem:[#allocation2 + $0x60] sm:$0xff] %vm365_vm1, %v2248_v10 }
 0x1bc   : > { %379 = vst.msk [vmem:[#allocation2 + $0x68] sm:$0xff] %vm365_vm1, %v2248_v10  ;;  %380 = vst.msk [vmem:[#allocation2 + $0x70] sm:$0xff] %vm365_vm1, %v2248_v10  ;;  %v1005_v13 = vld [vmem:[#allocation3] sm:$0xff] }
 0x1bd   : > { %381 = vst.msk [vmem:[#allocation2 + $0x78] sm:$0xff] %vm365_vm1, %v2248_v10  ;;  %383 = vst.msk [vmem:[#allocation3 + $0x8] sm:$0xff] %vm365_vm1, %v2248_v10  ;;  %v859_v15 = vld [vmem:[#allocation2] sm:$0xff]  ;;  %v860_v23 = vld [vmem:[#allocation2 + $0x8] sm:$0xff] }
 0x1be   : > { %384 = vst.msk [vmem:[#allocation3 + $0x10] sm:$0xff] %vm365_vm1, %v2248_v10  ;;  %385 = vst.msk [vmem:[#allocation3 + $0x18] sm:$0xff] %vm365_vm1, %v2248_v10  ;;  %v861_v34 = vld [vmem:[#allocation2 + $0x10] sm:$0xff]  ;;  %v862_v38 = vld [vmem:[#allocation2 + $0x18] sm:$0xff] }
 0x1bf   : > { %386 = vst.msk [vmem:[#allocation3 + $0x20] sm:$0xff] %vm365_vm1, %v2248_v10  ;;  %387 = vst.msk [vmem:[#allocation3 + $0x28] sm:$0xff] %vm365_vm1, %v2248_v10 }
 0x1c0   : > { %388 = vst.msk [vmem:[#allocation3 + $0x30] sm:$0xff] %vm365_vm1, %v2248_v10  ;;  %389 = vst.msk [vmem:[#allocation3 + $0x38] sm:$0xff] %vm365_vm1, %v2248_v10 }
 0x1c1   : > { %390 = vst.msk [vmem:[#allocation3 + $0x40] sm:$0xff] %vm365_vm1, %v2248_v10  ;;  %391 = vst.msk [vmem:[#allocation3 + $0x48] sm:$0xff] %vm365_vm1, %v2248_v10 }
 0x1c2   : > { %1062 = vmatmul.mubr.bf16.gmra.mrb[20].mxu0 %v845_v37  ;;  %916 = vmatmul.mubr.bf16.gmra.mrb[20].mxu1 %v821_v39  ;;  %392 = vst.msk [vmem:[#allocation3 + $0x50] sm:$0xff] %vm365_vm1, %v2248_v10  ;;  %393 = vst.msk [vmem:[#allocation3 + $0x58] sm:$0xff] %vm365_vm1, %v2248_v10 }
 0x1c3   : > { %1069 = vmatprep.mubr.bf16.mxu0 %v848_v41  ;;  %923 = vmatprep.mubr.bf16.mxu1 %v824_v43  ;;  %394 = vst.msk [vmem:[#allocation3 + $0x60] sm:$0xff] %vm365_vm1, %v2248_v10  ;;  %395 = vst.msk [vmem:[#allocation3 + $0x68] sm:$0xff] %vm365_vm1, %v2248_v10 }
 0x1c4   : > { %396 = vst.msk [vmem:[#allocation3 + $0x70] sm:$0xff] %vm365_vm1, %v2248_v10  ;;  %397 = vst.msk [vmem:[#allocation3 + $0x78] sm:$0xff] %vm365_vm1, %v2248_v10  ;;  %v1006_v21 = vld [vmem:[#allocation3 + $0x8] sm:$0xff] }
 0x1c5   : > { %v1007_v33 = vld [vmem:[#allocation3 + $0x10] sm:$0xff]  ;;  %v1008_v43 = vld [vmem:[#allocation3 + $0x18] sm:$0xff] }
 0x1c6   : > { %v1009_v60 = vld [vmem:[#allocation3 + $0x20] sm:$0xff] }
 0x1ca   : > { %1070 = vmatmul.mubr.bf16.gmra.mrb[24].mxu0 %v847_v40  ;;  %924 = vmatmul.mubr.bf16.gmra.mrb[24].mxu1 %v823_v45 }
 0x1cb   : > { %1077 = vmatprep.mubr.bf16.mxu0 %v850_v46  ;;  %931 = vmatprep.mubr.bf16.mxu1 %v826_v47 }
 0x1d2   : > { %1078 = vmatmul.mubr.bf16.gmra.mrb[28].mxu0 %v849_v50  ;;  %932 = vmatmul.mubr.bf16.gmra.mrb[28].mxu1 %v825_v51 }
 0x1d3   : > { %1085 = vmatprep.mubr.bf16.mxu0 %v852_v52  ;;  %939 = vmatprep.mubr.bf16.mxu1 %v828_v53 }
 0x1da   : > { %1086 = vmatmul.mubr.bf16.gmra.mrb[32].mxu0 %v851_v56  ;;  %940 = vmatmul.mubr.bf16.gmra.mrb[32].mxu1 %v827_v57 }
 0x1db   : > { %1093 = vmatprep.mubr.bf16.mxu0 %v854_v58  ;;  %947 = vmatprep.mubr.bf16.mxu1 %v830_v59 }
 0x1e2   : > { %1094 = vmatmul.mubr.bf16.gmra.mrb[36].mxu0 %v853_v62  ;;  %948 = vmatmul.mubr.bf16.gmra.mrb[36].mxu1 %v829_v63  ;;  %v863_v62 = vld [vmem:[#allocation2 + $0x20] sm:$0xff] }
 0x1e3   : > { %1101 = vmatprep.mubr.bf16.mxu0 %v856_v0  ;;  %955 = vmatprep.mubr.bf16.mxu1 %v832_v1 }
 0x1ea   : > { %1102 = vmatmul.mubr.bf16.gmra.mrb[40].mxu0 %v855_v4  ;;  %956 = vmatmul.mubr.bf16.gmra.mrb[40].mxu1 %v831_v5  ;;  %v1010_v5 = vld [vmem:[#allocation3 + $0x28] sm:$0xff] }
 0x1eb   : > { %1109 = vmatprep.mubr.bf16.mxu0 %v858_v6  ;;  %963 = vmatprep.mubr.bf16.mxu1 %v834_v7  ;;  %v864_v7 = vld [vmem:[#allocation2 + $0x28] sm:$0xff] }
 0x1f2   : > { %1110 = vmatmul.mubr.bf16.gmra.mrb[44].mxu0 %v857_v8  ;;  %964 = vmatmul.mubr.bf16.gmra.mrb[44].mxu1 %v833_v9 }
 0x28d   : > { %v1778_v11 = vpop.f32.mrb[16].mxu0  ;;  %v1714_v12 = vpop.f32.mrb[16].mxu1 }
 0x28e   : > { %v1779_v14 = vpop.f32.mrb[17].mxu0  ;;  %v1715_v16 = vpop.f32.mrb[17].mxu1 }
 0x28f   : > { %v1780_v17 = vadd.f32 %v1779_v14, %v1778_v11  ;;  %v1781_v18 = vpop.f32.mrb[18].mxu0  ;;  %v1716_v19 = vadd.f32 %v1715_v16, %v1714_v12  ;;  %v1717_v20 = vpop.f32.mrb[18].mxu1 }
 0x290   : > { %v1782_v22 = vpop.f32.mrb[19].mxu0  ;;  %v1718_v24 = vpop.f32.mrb[19].mxu1 }
 0x291   : > { %v1118_v25 = vadd.f32 %v1780_v17, %v1005_v13  ;;  %v1783_v26 = vadd.f32 %v1782_v22, %v1781_v18  ;;  %v972_v27 = vadd.f32 %v1716_v19, %v859_v15  ;;  %v1719_v28 = vadd.f32 %v1718_v24, %v1717_v20  ;;  %v1011_v24 = vld [vmem:[#allocation3 + $0x30] sm:$0xff] }
 0x293   : > { %1134 = vst.msk [vmem:[#allocation3] sm:$0xff] %vm365_vm1, %v1118_v25  ;;  %v1119_v29 = vadd.f32 %v1783_v26, %v1006_v21  ;;  %989 = vst.msk [vmem:[#allocation2] sm:$0xff] %vm365_vm1, %v972_v27  ;;  %v973_v30 = vadd.f32 %v1719_v28, %v860_v23  ;;  %v865_v26 = vld [vmem:[#allocation2 + $0x30] sm:$0xff] }
 0x295   : > { %1135 = vst.msk [vmem:[#allocation3 + $0x8] sm:$0xff] %vm365_vm1, %v1119_v29  ;;  %v1784_v31 = vpop.f32.mrb[20].mxu0  ;;  %990 = vst.msk [vmem:[#allocation2 + $0x8] sm:$0xff] %vm365_vm1, %v973_v30  ;;  %v1720_v32 = vpop.f32.mrb[20].mxu1 }
 0x296   : > { %v1785_v42 = vpop.f32.mrb[21].mxu0  ;;  %v1721_v35 = vpop.f32.mrb[21].mxu1 }
 0x297   : > { %v1786_v36 = vadd.f32 %v1785_v42, %v1784_v31  ;;  %v1787_v37 = vpop.f32.mrb[22].mxu0  ;;  %v1722_v39 = vadd.f32 %v1721_v35, %v1720_v32  ;;  %v1723_v41 = vpop.f32.mrb[22].mxu1 }
 0x298   : > { %v1788_v44 = vpop.f32.mrb[23].mxu0  ;;  %v1724_v40 = vpop.f32.mrb[23].mxu1 }
 0x299   : > { %v1120_v45 = vadd.f32 %v1786_v36, %v1007_v33  ;;  %v1789_v46 = vadd.f32 %v1788_v44, %v1787_v37  ;;  %v974_v47 = vadd.f32 %v1722_v39, %v861_v34  ;;  %v1725_v48 = vadd.f32 %v1724_v40, %v1723_v41  ;;  %v1012_v33 = vld [vmem:[#allocation3 + $0x38] sm:$0xff] }
 0x29a   : > { %v1250_v49 = vld [vmem:[#allocation3] sm:$0xff]  ;;  %v866_v34 = vld [vmem:[#allocation2 + $0x38] sm:$0xff] }
 0x29b   : > { %v1153_v50 = vld [vmem:[#allocation2] sm:$0xff]  ;;  %1136 = vst.msk [vmem:[#allocation3 + $0x10] sm:$0xff] %vm365_vm1, %v1120_v45  ;;  %v1121_v51 = vadd.f32 %v1789_v46, %v1008_v43  ;;  %v1645_v52 = vpack.c.bf16 %v1250_v49, %v1250_v49  ;;  %991 = vst.msk [vmem:[#allocation2 + $0x10] sm:$0xff] %vm365_vm1, %v974_v47  ;;  %v975_v53 = vadd.f32 %v1725_v48, %v862_v38 }
 0x29c   : > { %v1629_v54 = vpack.c.bf16 %v1153_v50, %v1153_v50  ;;  %v1251_v55 = vld [vmem:[#allocation3 + $0x8] sm:$0xff] }
 0x29d   : > { %v1154_v56 = vld [vmem:[#allocation2 + $0x8] sm:$0xff]  ;;  %1137 = vst.msk [vmem:[#allocation3 + $0x18] sm:$0xff] %vm365_vm1, %v1121_v51  ;;  %v1790_v57 = vpop.f32.mrb[24].mxu0  ;;  %1314 = vrot.lane.b32.xlu0 %v1645_v52, %s2249_s24  ;;  %992 = vst.msk [vmem:[#allocation2 + $0x18] sm:$0xff] %vm365_vm1, %v975_v53  ;;  %v1726_v58 = vpop.f32.mrb[24].mxu1  ;;  %v1646_v2 = vpack.c.bf16 %v1251_v55, %v1251_v55  ;;  %v1013_v53 = vld [vmem:[#allocation3 + $0x40] sm:$0xff] }
 0x29e   : > { %1234 = vst.msk [vmem:[%s2696_s26] sm:$0xf] %vm1233_vm2, %v1629_v54  ;;  %v1630_v59 = vpack.c.bf16 %v1154_v56, %v1154_v56  ;;  %v1791_v61 = vpop.f32.mrb[25].mxu0  ;;  %v1727_v63 = vpop.f32.mrb[25].mxu1  ;;  %v867_v55 = vld [vmem:[#allocation2 + $0x40] sm:$0xff] }
 0x29f   : > { %v1792_v0 = vadd.f32 %v1791_v61, %v1790_v57  ;;  %v1793_v1 = vpop.f32.mrb[26].mxu0  ;;  %v1728_v3 = vadd.f32 %v1727_v63, %v1726_v58  ;;  %v1729_v4 = vpop.f32.mrb[26].mxu1  ;;  %v1014_v61 = vld [vmem:[#allocation3 + $0x48] sm:$0xff] }
 0x2a0   : > { %1235 = vst.msk [vmem:[%s2696_s26 + $0x4] sm:$0xf] %vm1233_vm2, %v1630_v59  ;;  %v1794_v6 = vpop.f32.mrb[27].mxu0  ;;  %v1730_v8 = vpop.f32.mrb[27].mxu1  ;;  %v868_v63 = vld [vmem:[#allocation2 + $0x48] sm:$0xff] }
 0x2a1   : > { %v1122_v9 = vadd.f32 %v1792_v0, %v1009_v60  ;;  %v1795_v10 = vadd.f32 %v1794_v6, %v1793_v1  ;;  %1316 = vrot.lane.b32.xlu0 %v1646_v2, %s2249_s24  ;;  %v976_v11 = vadd.f32 %v1728_v3, %v863_v62  ;;  %v1731_v12 = vadd.f32 %v1730_v8, %v1729_v4 }
 0x2a2   : > { %v1252_v13 = vld [vmem:[#allocation3 + $0x10] sm:$0xff] }
 0x2a3   : > { %v1155_v14 = vld [vmem:[#allocation2 + $0x10] sm:$0xff]  ;;  %1138 = vst.msk [vmem:[#allocation3 + $0x20] sm:$0xff] %vm365_vm1, %v1122_v9  ;;  %v1123_v15 = vadd.f32 %v1795_v10, %v1010_v5  ;;  %v1647_v16 = vpack.c.bf16 %v1252_v13, %v1252_v13  ;;  %993 = vst.msk [vmem:[#allocation2 + $0x20] sm:$0xff] %vm365_vm1, %v976_v11  ;;  %v977_v17 = vadd.f32 %v1731_v12, %v864_v7 }
 0x2a4   : > { %v1631_v18 = vpack.c.bf16 %v1155_v14, %v1155_v14  ;;  %v1253_v19 = vld [vmem:[#allocation3 + $0x18] sm:$0xff] }
 0x2a5   : > { %v1156_v20 = vld [vmem:[#allocation2 + $0x18] sm:$0xff]  ;;  %1139 = vst.msk [vmem:[#allocation3 + $0x28] sm:$0xff] %vm365_vm1, %v1123_v15  ;;  %v1796_v21 = vpop.f32.mrb[28].mxu0  ;;  %1318 = vrot.lane.b32.xlu1 %v1647_v16, %s2249_s24  ;;  %994 = vst.msk [vmem:[#allocation2 + $0x28] sm:$0xff] %vm365_vm1, %v977_v17  ;;  %v1732_v22 = vpop.f32.mrb[28].mxu1  ;;  %v1648_v30 = vpack.c.bf16 %v1253_v19, %v1253_v19  ;;  %v1015_v17 = vld [vmem:[#allocation3 + $0x50] sm:$0xff] }
 0x2a6   : > { %1236 = vst.msk [vmem:[%s2696_s26 + $0x8] sm:$0xf] %vm1233_vm2, %v1631_v18  ;;  %v1632_v23 = vpack.c.bf16 %v1156_v20, %v1156_v20  ;;  %v1797_v25 = vpop.f32.mrb[29].mxu0  ;;  %v1733_v27 = vpop.f32.mrb[29].mxu1  ;;  %v869_v19 = vld [vmem:[#allocation2 + $0x50] sm:$0xff] }
 0x2a7   : > { %v1798_v28 = vadd.f32 %v1797_v25, %v1796_v21  ;;  %v1799_v29 = vpop.f32.mrb[30].mxu0  ;;  %v1734_v31 = vadd.f32 %v1733_v27, %v1732_v22  ;;  %v1735_v32 = vpop.f32.mrb[30].mxu1  ;;  %v1016_v25 = vld [vmem:[#allocation3 + $0x58] sm:$0xff] }
 0x2a8   : > { %1237 = vst.msk [vmem:[%s2696_s26 + $0xc] sm:$0xf] %vm1233_vm2, %v1632_v23  ;;  %v1800_v42 = vpop.f32.mrb[31].mxu0  ;;  %v1736_v35 = vpop.f32.mrb[31].mxu1  ;;  %v870_v27 = vld [vmem:[#allocation2 + $0x58] sm:$0xff] }
 0x2a9   : > { %v1124_v36 = vadd.f32 %v1798_v28, %v1011_v24  ;;  %v1801_v37 = vadd.f32 %v1800_v42, %v1799_v29  ;;  %1320 = vrot.lane.b32.xlu1 %v1648_v30, %s2249_s24  ;;  %v978_v39 = vadd.f32 %v1734_v31, %v865_v26  ;;  %v1737_v41 = vadd.f32 %v1736_v35, %v1735_v32 }
 0x2aa   : > { %v1254_v43 = vld [vmem:[#allocation3 + $0x20] sm:$0xff] }
 0x2ab   : > { %v1157_v44 = vld [vmem:[#allocation2 + $0x20] sm:$0xff]  ;;  %1140 = vst.msk [vmem:[#allocation3 + $0x30] sm:$0xff] %vm365_vm1, %v1124_v36  ;;  %v1125_v38 = vadd.f32 %v1801_v37, %v1012_v33  ;;  %v1649_v40 = vpack.c.bf16 %v1254_v43, %v1254_v43  ;;  %995 = vst.msk [vmem:[#allocation2 + $0x30] sm:$0xff] %vm365_vm1, %v978_v39  ;;  %v979_v45 = vadd.f32 %v1737_v41, %v866_v34 }
 0x2ac   : > { %v1633_v46 = vpack.c.bf16 %v1157_v44, %v1157_v44  ;;  %v1255_v47 = vld [vmem:[#allocation3 + $0x28] sm:$0xff] }
 0x2ad   : > { %v1158_v48 = vld [vmem:[#allocation2 + $0x28] sm:$0xff]  ;;  %1141 = vst.msk [vmem:[#allocation3 + $0x38] sm:$0xff] %vm365_vm1, %v1125_v38  ;;  %v1802_v49 = vpop.f32.mrb[32].mxu0  ;;  %1322 = vrot.lane.b32.xlu0 %v1649_v40, %s2249_s24  ;;  %v1650_v50 = vpack.c.bf16 %v1255_v47, %v1255_v47  ;;  %996 = vst.msk [vmem:[#allocation2 + $0x38] sm:$0xff] %vm365_vm1, %v979_v45  ;;  %v1738_v51 = vpop.f32.mrb[32].mxu1  ;;  %v1017_v45 = vld [vmem:[#allocation3 + $0x60] sm:$0xff] }
 0x2ae   : > { %1238 = vst.msk [vmem:[%s2696_s26 + $0x10] sm:$0xf] %vm1233_vm2, %v1633_v46  ;;  %v1634_v52 = vpack.c.bf16 %v1158_v48, %v1158_v48  ;;  %v1803_v54 = vpop.f32.mrb[33].mxu0  ;;  %v1739_v56 = vpop.f32.mrb[33].mxu1  ;;  %v871_v47 = vld [vmem:[#allocation2 + $0x60] sm:$0xff] }
 0x2af   : > { %v1804_v57 = vadd.f32 %v1803_v54, %v1802_v49  ;;  %v1805_v58 = vpop.f32.mrb[34].mxu0  ;;  %1324 = vrot.lane.b32.xlu1 %v1650_v50, %s2249_s24  ;;  %v1740_v59 = vadd.f32 %v1739_v56, %v1738_v51  ;;  %v1741_v60 = vpop.f32.mrb[34].mxu1 }
 0x2b0   : > { %1239 = vst.msk [vmem:[%s2696_s26 + $0x14] sm:$0xf] %vm1233_vm2, %v1634_v52  ;;  %v1806_v62 = vpop.f32.mrb[35].mxu0  ;;  %v1742_v0 = vpop.f32.mrb[35].mxu1 }
 0x2b1   : > { %v1126_v1 = vadd.f32 %v1804_v57, %v1013_v53  ;;  %v1807_v2 = vadd.f32 %v1806_v62, %v1805_v58  ;;  %v980_v3 = vadd.f32 %v1740_v59, %v867_v55  ;;  %v1743_v4 = vadd.f32 %v1742_v0, %v1741_v60  ;;  %v1018_v53 = vld [vmem:[#allocation3 + $0x68] sm:$0xff] }
 0x2b2   : > { %v1256_v5 = vld [vmem:[#allocation3 + $0x30] sm:$0xff]  ;;  %v872_v55 = vld [vmem:[#allocation2 + $0x68] sm:$0xff] }
 0x2b3   : > { %v1159_v6 = vld [vmem:[#allocation2 + $0x30] sm:$0xff]  ;;  %1142 = vst.msk [vmem:[#allocation3 + $0x40] sm:$0xff] %vm365_vm1, %v1126_v1  ;;  %v1127_v7 = vadd.f32 %v1807_v2, %v1014_v61  ;;  %v1651_v8 = vpack.c.bf16 %v1256_v5, %v1256_v5  ;;  %997 = vst.msk [vmem:[#allocation2 + $0x40] sm:$0xff] %vm365_vm1, %v980_v3  ;;  %v981_v9 = vadd.f32 %v1743_v4, %v868_v63 }
 0x2b4   : > { %v1635_v10 = vpack.c.bf16 %v1159_v6, %v1159_v6  ;;  %v1257_v11 = vld [vmem:[#allocation3 + $0x38] sm:$0xff] }
 0x2b5   : > { %v1160_v12 = vld [vmem:[#allocation2 + $0x38] sm:$0xff]  ;;  %1143 = vst.msk [vmem:[#allocation3 + $0x48] sm:$0xff] %vm365_vm1, %v1127_v7  ;;  %v1808_v13 = vpop.f32.mrb[36].mxu0  ;;  %1326 = vrot.lane.b32.xlu0 %v1651_v8, %s2249_s24  ;;  %v1652_v14 = vpack.c.bf16 %v1257_v11, %v1257_v11  ;;  %998 = vst.msk [vmem:[#allocation2 + $0x48] sm:$0xff] %vm365_vm1, %v981_v9  ;;  %v1744_v15 = vpop.f32.mrb[36].mxu1  ;;  %v1019_v9 = vld [vmem:[#allocation3 + $0x70] sm:$0xff] }
 0x2b6   : > { %1240 = vst.msk [vmem:[%s2696_s26 + $0x18] sm:$0xf] %vm1233_vm2, %v1635_v10  ;;  %v1636_v16 = vpack.c.bf16 %v1160_v12, %v1160_v12  ;;  %v1809_v18 = vpop.f32.mrb[37].mxu0  ;;  %v1745_v20 = vpop.f32.mrb[37].mxu1  ;;  %v873_v11 = vld [vmem:[#allocation2 + $0x70] sm:$0xff] }
 0x2b7   : > { %v1810_v21 = vadd.f32 %v1809_v18, %v1808_v13  ;;  %v1811_v22 = vpop.f32.mrb[38].mxu0  ;;  %1328 = vrot.lane.b32.xlu1 %v1652_v14, %s2249_s24  ;;  %v1746_v23 = vadd.f32 %v1745_v20, %v1744_v15  ;;  %v1747_v24 = vpop.f32.mrb[38].mxu1 }
 0x2b8   : > { %1241 = vst.msk [vmem:[%s2696_s26 + $0x1c] sm:$0xf] %vm1233_vm2, %v1636_v16  ;;  %v1812_v26 = vpop.f32.mrb[39].mxu0  ;;  %v1748_v28 = vpop.f32.mrb[39].mxu1 }
 0x2b9   : > { %v1128_v29 = vadd.f32 %v1810_v21, %v1015_v17  ;;  %v1813_v30 = vadd.f32 %v1812_v26, %v1811_v22  ;;  %v982_v31 = vadd.f32 %v1746_v23, %v869_v19  ;;  %v1749_v32 = vadd.f32 %v1748_v28, %v1747_v24  ;;  %v1020_v17 = vld [vmem:[#allocation3 + $0x78] sm:$0xff] }
 0x2ba   : > { %v1258_v33 = vld [vmem:[#allocation3 + $0x40] sm:$0xff]  ;;  %v874_v19 = vld [vmem:[#allocation2 + $0x78] sm:$0xff] }
 0x2bb   : > { %v1161_v42 = vld [vmem:[#allocation2 + $0x40] sm:$0xff]  ;;  %1144 = vst.msk [vmem:[#allocation3 + $0x50] sm:$0xff] %vm365_vm1, %v1128_v29  ;;  %v1129_v34 = vadd.f32 %v1813_v30, %v1016_v25  ;;  %v1653_v35 = vpack.c.bf16 %v1258_v33, %v1258_v33  ;;  %999 = vst.msk [vmem:[#allocation2 + $0x50] sm:$0xff] %vm365_vm1, %v982_v31  ;;  %v983_v36 = vadd.f32 %v1749_v32, %v870_v27 }
 0x2bc   : > { %v1637_v37 = vpack.c.bf16 %v1161_v42, %v1161_v42  ;;  %v1259_v39 = vld [vmem:[#allocation3 + $0x48] sm:$0xff] }
 0x2bd   : > { %v1162_v41 = vld [vmem:[#allocation2 + $0x48] sm:$0xff]  ;;  %1145 = vst.msk [vmem:[#allocation3 + $0x58] sm:$0xff] %vm365_vm1, %v1129_v34  ;;  %v1814_v43 = vpop.f32.mrb[40].mxu0  ;;  %1330 = vrot.lane.b32.xlu0 %v1653_v35, %s2249_s24  ;;  %v1654_v44 = vpack.c.bf16 %v1259_v39, %v1259_v39  ;;  %1000 = vst.msk [vmem:[#allocation2 + $0x58] sm:$0xff] %vm365_vm1, %v983_v36  ;;  %v1750_v38 = vpop.f32.mrb[40].mxu1 }
 0x2be   : > { %1242 = vst.msk [vmem:[%s2696_s26 + $0x20] sm:$0xf] %vm1233_vm2, %v1637_v37  ;;  %v1638_v40 = vpack.c.bf16 %v1162_v41, %v1162_v41  ;;  %v1815_v46 = vpop.f32.mrb[41].mxu0  ;;  %v1751_v48 = vpop.f32.mrb[41].mxu1 }
 0x2bf   : > { %v1816_v49 = vadd.f32 %v1815_v46, %v1814_v43  ;;  %v1817_v50 = vpop.f32.mrb[42].mxu0  ;;  %1332 = vrot.lane.b32.xlu1 %v1654_v44, %s2249_s24  ;;  %v1752_v51 = vadd.f32 %v1751_v48, %v1750_v38  ;;  %v1753_v52 = vpop.f32.mrb[42].mxu1 }
 0x2c0   : > { %1243 = vst.msk [vmem:[%s2696_s26 + $0x24] sm:$0xf] %vm1233_vm2, %v1638_v40  ;;  %v1818_v54 = vpop.f32.mrb[43].mxu0  ;;  %v1754_v56 = vpop.f32.mrb[43].mxu1 }
 0x2c1   : > { %v1130_v57 = vadd.f32 %v1816_v49, %v1017_v45  ;;  %v1819_v58 = vadd.f32 %v1818_v54, %v1817_v50  ;;  %v984_v59 = vadd.f32 %v1752_v51, %v871_v47  ;;  %v1755_v60 = vadd.f32 %v1754_v56, %v1753_v52 }
 0x2c2   : > { %v1260_v61 = vld [vmem:[#allocation3 + $0x50] sm:$0xff] }
 0x2c3   : > { %v1163_v62 = vld [vmem:[#allocation2 + $0x50] sm:$0xff]  ;;  %1146 = vst.msk [vmem:[#allocation3 + $0x60] sm:$0xff] %vm365_vm1, %v1130_v57  ;;  %v1131_v63 = vadd.f32 %v1819_v58, %v1018_v53  ;;  %v1655_v0 = vpack.c.bf16 %v1260_v61, %v1260_v61  ;;  %1001 = vst.msk [vmem:[#allocation2 + $0x60] sm:$0xff] %vm365_vm1, %v984_v59  ;;  %v985_v1 = vadd.f32 %v1755_v60, %v872_v55 }
 0x2c4   : > { %v1639_v2 = vpack.c.bf16 %v1163_v62, %v1163_v62  ;;  %v1261_v3 = vld [vmem:[#allocation3 + $0x58] sm:$0xff] }
 0x2c5   : > { %v1164_v4 = vld [vmem:[#allocation2 + $0x58] sm:$0xff]  ;;  %1147 = vst.msk [vmem:[#allocation3 + $0x68] sm:$0xff] %vm365_vm1, %v1131_v63  ;;  %v1820_v5 = vpop.f32.mrb[44].mxu0  ;;  %1334 = vrot.lane.b32.xlu0 %v1655_v0, %s2249_s24  ;;  %v1656_v6 = vpack.c.bf16 %v1261_v3, %v1261_v3  ;;  %1002 = vst.msk [vmem:[#allocation2 + $0x68] sm:$0xff] %vm365_vm1, %v985_v1  ;;  %v1756_v7 = vpop.f32.mrb[44].mxu1 }
 0x2c6   : > { %1244 = vst.msk [vmem:[%s2696_s26 + $0x28] sm:$0xf] %vm1233_vm2, %v1639_v2  ;;  %v1640_v8 = vpack.c.bf16 %v1164_v4, %v1164_v4  ;;  %v1821_v10 = vpop.f32.mrb[45].mxu0  ;;  %v1757_v12 = vpop.f32.mrb[45].mxu1 }
 0x2c7   : > { %v1822_v13 = vadd.f32 %v1821_v10, %v1820_v5  ;;  %v1823_v14 = vpop.f32.mrb[46].mxu0  ;;  %1336 = vrot.lane.b32.xlu1 %v1656_v6, %s2249_s24  ;;  %v1758_v15 = vadd.f32 %v1757_v12, %v1756_v7  ;;  %v1759_v16 = vpop.f32.mrb[46].mxu1 }
 0x2c8   : > { %1245 = vst.msk [vmem:[%s2696_s26 + $0x2c] sm:$0xf] %vm1233_vm2, %v1640_v8  ;;  %v1824_v18 = vpop.f32.mrb[47].mxu0  ;;  %v1760_v20 = vpop.f32.mrb[47].mxu1 }
 0x2c9   : > { %v1132_v21 = vadd.f32 %v1822_v13, %v1019_v9  ;;  %v1825_v22 = vadd.f32 %v1824_v18, %v1823_v14  ;;  %v986_v23 = vadd.f32 %v1758_v15, %v873_v11  ;;  %v1761_v24 = vadd.f32 %v1760_v20, %v1759_v16 }
 0x2ca   : > { %v1262_v25 = vld [vmem:[#allocation3 + $0x60] sm:$0xff] }
 0x2cb   : > { %v1165_v26 = vld [vmem:[#allocation2 + $0x60] sm:$0xff]  ;;  %1148 = vst.msk [vmem:[#allocation3 + $0x70] sm:$0xff] %vm365_vm1, %v1132_v21  ;;  %v1133_v27 = vadd.f32 %v1825_v22, %v1020_v17  ;;  %v1657_v28 = vpack.c.bf16 %v1262_v25, %v1262_v25  ;;  %1003 = vst.msk [vmem:[#allocation2 + $0x70] sm:$0xff] %vm365_vm1, %v986_v23  ;;  %v987_v29 = vadd.f32 %v1761_v24, %v874_v19 }
 0x2cc   : > { %v1641_v30 = vpack.c.bf16 %v1165_v26, %v1165_v26  ;;  %v1263_v31 = vld [vmem:[#allocation3 + $0x68] sm:$0xff] }
 0x2cd   : > { %v1166_v32 = vld [vmem:[#allocation2 + $0x68] sm:$0xff]  ;;  %1149 = vst.msk [vmem:[#allocation3 + $0x78] sm:$0xff] %vm365_vm1, %v1133_v27  ;;  %1338 = vrot.lane.b32.xlu0 %v1657_v28, %s2249_s24  ;;  %v1658_v33 = vpack.c.bf16 %v1263_v31, %v1263_v31  ;;  %1004 = vst.msk [vmem:[#allocation2 + $0x78] sm:$0xff] %vm365_vm1, %v987_v29 }
 0x2ce   : > { %1246 = vst.msk [vmem:[%s2696_s26 + $0x30] sm:$0xf] %vm1233_vm2, %v1641_v30  ;;  %v1642_v42 = vpack.c.bf16 %v1166_v32, %v1166_v32 }
 0x2cf   : > { %1340 = vrot.lane.b32.xlu1 %v1658_v33, %s2249_s24 }
 0x2d0   : > { %1247 = vst.msk [vmem:[%s2696_s26 + $0x34] sm:$0xf] %vm1233_vm2, %v1642_v42 }
 0x2d2   : > { %v1264_v34 = vld [vmem:[#allocation3 + $0x70] sm:$0xff] }
 0x2d3   : > { %v1167_v35 = vld [vmem:[#allocation2 + $0x70] sm:$0xff]  ;;  %v1659_v36 = vpack.c.bf16 %v1264_v34, %v1264_v34 }
 0x2d4   : > { %v1643_v37 = vpack.c.bf16 %v1167_v35, %v1167_v35  ;;  %v1265_v39 = vld [vmem:[#allocation3 + $0x78] sm:$0xff] }
 0x2d5   : > { %v1168_v41 = vld [vmem:[#allocation2 + $0x78] sm:$0xff]  ;;  %1342 = vrot.lane.b32.xlu0 %v1659_v36, %s2249_s24  ;;  %v1660_v43 = vpack.c.bf16 %v1265_v39, %v1265_v39 }
 0x2d6   : > { %1248 = vst.msk [vmem:[%s2696_s26 + $0x38] sm:$0xf] %vm1233_vm2, %v1643_v37  ;;  %v1644_v44 = vpack.c.bf16 %v1168_v41, %v1168_v41 }
 0x2d7   : > { %1344 = vrot.lane.b32.xlu1 %v1660_v43, %s2249_s24 }
 0x2d8   : > { %1249 = vst.msk [vmem:[%s2696_s26 + $0x3c] sm:$0xf] %vm1233_vm2, %v1644_v44 }
 0x30f   : > { %v1315_v38 = vpop.permute.xlu0 %1314 }
 0x310   : > { %1363 = vst.msk [vmem:[%s2696_s26] sm:$0xf] %vm1362_vm3, %v1315_v38 }
 0x313   : > { %v1317_v40 = vpop.permute.xlu0 %1316 }
 0x314   : > { %1364 = vst.msk [vmem:[%s2696_s26 + $0x4] sm:$0xf] %vm1362_vm3, %v1317_v40 }
 0x317   : > { %v1319_v45 = vpop.permute.xlu1 %1318 }
 0x318   : > { %1365 = vst.msk [vmem:[%s2696_s26 + $0x8] sm:$0xf] %vm1362_vm3, %v1319_v45 }
 0x31b   : > { %v1321_v46 = vpop.permute.xlu1 %1320 }
 0x31c   : > { %1366 = vst.msk [vmem:[%s2696_s26 + $0xc] sm:$0xf] %vm1362_vm3, %v1321_v46 }
 0x31f   : > { %v1323_v47 = vpop.permute.xlu0 %1322 }
 0x320   : > { %1367 = vst.msk [vmem:[%s2696_s26 + $0x10] sm:$0xf] %vm1362_vm3, %v1323_v47 }
 0x321   : > { %v1325_v48 = vpop.permute.xlu1 %1324 }
 0x322   : > { %1368 = vst.msk [vmem:[%s2696_s26 + $0x14] sm:$0xf] %vm1362_vm3, %v1325_v48 }
 0x327   : > { %v1327_v49 = vpop.permute.xlu0 %1326 }
 0x328   : > { %1369 = vst.msk [vmem:[%s2696_s26 + $0x18] sm:$0xf] %vm1362_vm3, %v1327_v49 }
 0x329   : > { %v1329_v50 = vpop.permute.xlu1 %1328 }
 0x32a   : > { %1370 = vst.msk [vmem:[%s2696_s26 + $0x1c] sm:$0xf] %vm1362_vm3, %v1329_v50 }
 0x32f   : > { %v1331_v51 = vpop.permute.xlu0 %1330 }
 0x330   : > { %1371 = vst.msk [vmem:[%s2696_s26 + $0x20] sm:$0xf] %vm1362_vm3, %v1331_v51 }
 0x331   : > { %v1333_v52 = vpop.permute.xlu1 %1332 }
 0x332   : > { %1372 = vst.msk [vmem:[%s2696_s26 + $0x24] sm:$0xf] %vm1362_vm3, %v1333_v52 }
 0x337   : > { %v1335_v53 = vpop.permute.xlu0 %1334 }
 0x338   : > { %1373 = vst.msk [vmem:[%s2696_s26 + $0x28] sm:$0xf] %vm1362_vm3, %v1335_v53 }
 0x339   : > { %v1337_v54 = vpop.permute.xlu1 %1336 }
 0x33a   : > { %1374 = vst.msk [vmem:[%s2696_s26 + $0x2c] sm:$0xf] %vm1362_vm3, %v1337_v54 }
 0x33f   : > { %v1339_v55 = vpop.permute.xlu0 %1338 }
 0x340   : > { %1375 = vst.msk [vmem:[%s2696_s26 + $0x30] sm:$0xf] %vm1362_vm3, %v1339_v55 }
 0x341   : > { %v1341_v56 = vpop.permute.xlu1 %1340 }
 0x342   : > { %1376 = vst.msk [vmem:[%s2696_s26 + $0x34] sm:$0xf] %vm1362_vm3, %v1341_v56 }
 0x347   : > { %v1343_v57 = vpop.permute.xlu0 %1342 }
 0x348   : > { %1377 = vst.msk [vmem:[%s2696_s26 + $0x38] sm:$0xf] %vm1362_vm3, %v1343_v57 }
 0x349   : > { %v1345_v58 = vpop.permute.xlu1 %1344 }
 0x34a   : > { %1378 = vst.msk [vmem:[%s2696_s26 + $0x3c] sm:$0xf] %vm1362_vm3, %v1345_v58 }
 0x34b   : > { %2156 = shalt.err (!%p2153_p11)
}
 0x34c   : > { %s2157_s12 = scalar_lea.hbm %s2802_s7, 1024  ;;  %s2161_s13 = scalar_lea.hbm %s2864_s5, 2048 }
 0x34d   : > { %p2158_p12 = scmp.ne.s32.totalorder %s2802_s7, %s2157_s12  ;;  %p2162_p9 = scmp.lt.u32.totalorder %s2802_s7, %s2864_s5 }
 0x34e   : > { %p2163_p0 = scmp.lt.u32.totalorder %s2161_s13, %s2157_s12  ;;  %p2165_p4 = scmp.lt.u32.totalorder %s2157_s12, %s2802_s7 }
 0x34f   : > { %p2159_p6 = pnand %p2158_p12, %p2429_p10 }
 0x350   : > { %p2164_p1 = por %p2163_p0, %p2162_p9 }
 0x351   : > { %p2160_p7 = pneg %p2159_p6 }
 0x352   : > { %p2166_p8 = por %p2165_p4, %p2164_p1 }
 0x354   : > { %p2167_p2 = pnand %p2166_p8, %p2160_p7 }
 0x356   : > { %2170 = shalt.err (!%p2167_p2)
}
 0x357   : > { %s2251_s9 = smov 4  }
 0x358   : > { %1910 = dma.vmem_to_hbm [thread:$0]  (%p2429_p10), %s2806_s16, 1024, %s2802_s7, %s1380_s29, %s2249_s24, %s2249_s24, %s2251_s9  }
 0x359 PF: > { %s2890_s26 = sld [smem:[#allocation19_spill]]  ;;  %s1408_s15 = sand.u32 1, %s2217_s18  }
 0x35a   : > { %p2892_p3 = scmp.ge.s32.totalorder %s2237_s23, 2  ;;  %s1409_s17 = scalar_lea.sflag [#allocation6], %s1408_s15 }
 0x35f   : > { %p2891_p13 = scmp.ne.s32.totalorder %s2890_s26, 0 }
 0x361   : > { %p1930_p5 = pnand %p2892_p3, %p2891_p13 }
 0x363   : > { %2212 = dma.done.wait (!%p1930_p5), %s1409_s17, 1024  }
 0x364   : > { %2214 = vsyncadd (!%p1930_p5), %s1409_s17, 4294966272  ;;  %s25_s23 = sadd.s32 1, %s2237_s23   ;;  %s2893_s18 = smov %s2221_s19 }
 0x365   : > { %p22_p11 = scmp.ge.s32.totalorder %s25_s23, 4   ;;  %s2894_s19 = smov %s2225_s20 }
 0x366   : > { %s2895_s20 = smov %s2443_s14  ;;  %s2896_s21 = smov %s2233_s22 }
 0x367   : > { %s2897_s22 = smov %s2899_s27  ;;  %24 = sbr.rel (!%p22_p11) target bundleno = 13 (0xd), region = 119 }
 0x36e   :  { %1414 = vsyncpa [#allocation5], 1 }
 0x36f   :  { %1416 = vsyncpa [#allocation5 + $0x1], 1 }
 0x370   :  { %1417 = vsyncpa [#allocation8], 1 }
 0x371   :  { %1419 = vsyncpa [#allocation8 + $0x1], 1 }
 0x372   :  { %1420 = vsyncpa [#allocation11], 1 }
 0x373   :  { %1421 = vsyncpa [#allocation6], 1 }
 0x374   :  { %1423 = vsyncpa [#allocation6 + $0x1], 1 }

// kernel: h2gcn_forward.3
= control target key start
LH: loop header
LB: loop body
LE: loop exit
PB: predicated region body
PF: predicated region fallthrough
CT: control target
= control target key end

     0   :  { %s5177_s0 = inlined_call_operand.hbm [shape: s8[256,256], index: 0, kind: input, shape index: {}]   ;;  %s5178_s1 = inlined_call_operand.hbm [shape: s8[256,256], index: 1, kind: input, shape index: {}]   ;;  %s5179_s2 = inlined_call_operand.hbm [shape: bf16[256,128], index: 2, kind: input, shape index: {}, may-alias: {2,4}]   ;;  %s5180_s3 = inlined_call_operand.hbm [shape: f32[256,32], index: 3, kind: input, shape index: {}]   ;;  %s5181_s4 = inlined_call_operand.hbm [shape: bf16[256,128], index: 4, kind: input, shape index: {}, may-alias: {2,4}]   ;;  %s5182_s5 = inlined_call_operand.hbm [shape: f32[32,64], index: 5, kind: input, shape index: {}]   ;;  %s5183_s6 = inlined_call_operand.hbm [shape: f32[1,64], index: 6, kind: input, shape index: {}]   ;;  %s5184_s7 = inlined_call_operand.hbm [shape: f32[64,128], index: 7, kind: input, shape index: {}]   ;;  %s5185_s8 = inlined_call_operand.hbm [shape: f32[128,128], index: 8, kind: input, shape index: {}]   ;;  %s5186_s9 = inlined_call_operand.hbm [shape: f32[128,128], index: 9, kind: input, shape index: {}]   ;;  %s5187_s10 = inlined_call_operand.hbm [shape: f32[128,128], index: 10, kind: input, shape index: {}]   ;;  %s5188_s11 = inlined_call_operand.hbm [shape: f32[1,128], index: 11, kind: input, shape index: {}]   ;;  %s5189_s12 = inlined_call_operand.hbm [shape: f32[256,128], index: 12, kind: output, shape index: {}]  }
   0x1   :  { %5217 = sst [smem:[#allocation41_spill]] %s5178_s1 }
   0x2   :  { %5218 = sst [smem:[#allocation42_spill]] %s5179_s2 }
   0x3   :  { %5219 = sst [smem:[#allocation43_spill]] %s5180_s3 }
   0x4   :  { %5220 = sst [smem:[#allocation44_spill]] %s5181_s4 }
   0x5   :  { %5221 = sst [smem:[#allocation45_spill]] %s5182_s5 }
   0x6   :  { %5222 = sst [smem:[#allocation46_spill]] %s5184_s7 }
   0x7   :  { %5223 = sst [smem:[#allocation47_spill]] %s5186_s9 }
   0x8   :  { %5224 = sst [smem:[#allocation48_spill]] %s5189_s12 }
   0x9   :  { %17 = vsyncpa [#allocation5], 0 }
   0xa   :  { %19 = vsyncpa [#allocation5 + $0x1], 0 }
   0xb   :  { %20 = vsyncpa [#allocation8], 0 }
   0xc   :  { %22 = vsyncpa [#allocation8 + $0x1], 0 }
   0xd   :  { %23 = vsyncpa [#allocation11], 0 }
   0xe   :  { %25 = vsyncpa [#allocation11 + $0x1], 0 }
   0xf   :  { %26 = vsyncpa [#allocation14], 0 }
  0x10   :  { %27 = vsyncpa [#allocation17], 0 }
  0x11   :  { %28 = vsyncpa [#allocation20], 0 }
  0x12   :  { %29 = vsyncpa [#allocation23], 0 }
  0x13   :  { %30 = vsyncpa [#allocation6], 0 }
  0x14   :  { %32 = vsyncpa [#allocation6 + $0x1], 0  ;;  %s4288_s21 = smov 0   ;;  %s4290_s22 = smov 0  }
  0x15   :  { %s4292_s23 = smov 0   ;;  %s4294_s24 = smov 0  }
  0x16   :  { %s4296_s25 = smov 0   ;;  %s4298_s26 = smov 0  }
  0x17 LB: > { %5225 = sst [smem:[#allocation34_spill]] %s4180_s21  ;;  %s4319_s27 = sadd.s32 4294967295, %s4200_s26   ;;  %s4200_s26 = sphi %s4298_s26, %s38_s26   ;;  %s4196_s25 = sphi %s4296_s25, %s5285_s25   ;;  %s4192_s24 = sphi %s4294_s24, %s5284_s24   ;;  %s4188_s23 = sphi %s4292_s23, %s5280_s23   ;;  %s4184_s22 = sphi %s4290_s22, %s5283_s22   ;;  %s4180_s21 = sphi %s4288_s21, %s5282_s21  }
  0x18   : > { %5226 = sst [smem:[#allocation35_spill]] %s4188_s23  ;;  %p2669_p0 = scmp.ge.s32.totalorder %s4200_s26, 1 }
  0x19   : > { %5227 = sst [smem:[#allocation36_spill]] %s4192_s24  ;;  %p5196_p1 = scmp.eq.s32.totalorder %s4319_s27, 0 }
  0x1a   : > { %p362_p2 = scmp.lt.s32.totalorder %s4200_s26, 3  ;;  %s4202_s29 = smov [#allocation9]  }
  0x1b   : > { %s377_s30 = sshll.u32 %s4202_s29, 4  ;;  %s4203_s14 = smov [#allocation13]   ;;  %s4328_s30 = int_to_ptr.vmem [resolvable:$true] %s377_s30 }
  0x1c   : > { %p4324_p3 = pnand %p2669_p0, %p362_p2  ;;  %s390_s15 = sshll.u32 %s4203_s14, 4  ;;  %s4339_s15 = int_to_ptr.vmem [resolvable:$true] %s390_s15 }
  0x1d   : > { %s5231_s2 = sld [smem:[#allocation42_spill]] }
  0x1e   : > { %s5228_s28 = scalar_select %p4324_p3, 1, 0 }
  0x1f   : > { %p3542_p4 = pneg %p4324_p3 }
  0x20   : > { %5229 = sst [smem:[#allocation37_spill]] %s5228_s28 }
  0x21   : > { %p4335_p6 = pnand %p3542_p4, %p5196_p1 }
  0x23   : > { %s5230_s13 = scalar_select %p4335_p6, 1, 0 }
  0x24   : > { %s3746_s18 = scalar_lea.hbm %s5231_s2, 2048  ;;  %p4349_p8 = pneg %p4335_p6 }
  0x25   : > { %p3747_p7 = scmp.ne.s32.totalorder %s5231_s2, %s3746_s18  ;;  %p3753_p11 = scmp.lt.u32.totalorder %s3746_s18, %s5231_s2 }
  0x26   : > { %s5232_s29 = scalar_select %p4349_p8, 1, 0 }
  0x27   : > { %p3749_p9 = pnand %p4349_p8, %p3747_p7 }
  0x29   : > { %p3750_p10 = pneg %p3749_p9 }
  0x2b   : > { %p3755_p12 = pnand %p3753_p11, %p3750_p10 }
  0x2d   : > { %3758 = shalt.err (!%p3755_p12)
}
  0x2e   : > { %s3759_s16 = scalar_lea.vmem %s4328_s30, 2048  ;;  %p3767_p4 = scmp.lt.s32.totalorder %s4328_s30, %s4328_s30 }
  0x2f   : > { %p3760_p13 = scmp.ne.s32.totalorder %s4328_s30, %s3759_s16  ;;  %p3768_p5 = scmp.lt.s32.totalorder %s3759_s16, %s3759_s16 }
  0x31   : > { %p3762_p0 = pnand %p3760_p13, %p4349_p8  ;;  %p3769_p7 = por %p3768_p5, %p3767_p4 }
  0x33   : > { %p3763_p2 = pneg %p3762_p0 }
  0x35   : > { %p3770_p9 = pnand %p3769_p7, %p3763_p2 }
  0x37   : > { %3773 = shalt.err (!%p3770_p9)
}
  0x38   : > { %s5194_s17 = smov 64   ;;  %s5195_s12 = smov 4  }
  0x39   : > { %3545 = dma.hbm_to_vmem [thread:$0]  (!%p4335_p6), %s5231_s2, 2048, %s4328_s30, [#allocation8], %s5194_s17, %s5194_s17, %s5195_s12  }
  0x3a   : > { %s5233_s5 = sld [smem:[#allocation45_spill]] }
  0x40   : > { %s3774_s16 = scalar_lea.hbm %s5233_s5, 512 }
  0x41   : > { %p3775_p5 = scmp.ne.s32.totalorder %s5233_s5, %s3774_s16  ;;  %p3781_p12 = scmp.lt.u32.totalorder %s3774_s16, %s5233_s5 }
  0x43   : > { %p3777_p10 = pnand %p3775_p5, %p4349_p8 }
  0x45   : > { %p3778_p11 = pneg %p3777_p10 }
  0x47   : > { %p3783_p13 = pnand %p3781_p12, %p3778_p11 }
  0x49   : > { %3786 = shalt.err (!%p3783_p13)
}
  0x4a   : > { %s3787_s30 = scalar_lea.vmem %s4339_s15, 512  ;;  %p3795_p7 = scmp.lt.s32.totalorder %s4339_s15, %s4339_s15 }
  0x4b   : > { %p3788_p0 = scmp.ne.s32.totalorder %s4339_s15, %s3787_s30  ;;  %p3796_p9 = scmp.lt.s32.totalorder %s3787_s30, %s3787_s30 }
  0x4d   : > { %p3790_p2 = pnand %p3788_p0, %p4349_p8  ;;  %p3797_p5 = por %p3796_p9, %p3795_p7 }
  0x4f   : > { %p3791_p4 = pneg %p3790_p2 }
  0x51   : > { %p3798_p10 = pnand %p3797_p5, %p3791_p4 }
  0x53   : > { %3801 = shalt.err (!%p3798_p10)
}
  0x54   : > { %s5198_s24 = smov 128   ;;  %s5200_s1 = smov 8  }
  0x55   : > { %3548 = dma.hbm_to_vmem [thread:$0]  (!%p4335_p6), %s5233_s5, 512, %s4339_s15, [#allocation14], %s5198_s24, %s5198_s24, %s5200_s1  }
  0x56   : > { %s4208_s18 = smov [#allocation16]   ;;  %s4209_s20 = smov [#allocation19]  }
  0x57   : > { %s414_s19 = sshll.u32 %s4208_s18, 4  ;;  %s440_s14 = sshll.u32 %s4209_s20, 4  ;;  %s415_s19 = int_to_ptr.vmem [resolvable:$true] %s414_s19  ;;  %s4399_s14 = int_to_ptr.vmem [resolvable:$true] %s440_s14 }
  0x58   : > { %s5234_s7 = sld [smem:[#allocation46_spill]] }
  0x5e   : > { %s3802_s17 = scalar_lea.hbm %s5234_s7, 1024 }
  0x5f   : > { %p3803_p11 = scmp.ne.s32.totalorder %s5234_s7, %s3802_s17  ;;  %p3809_p0 = scmp.lt.u32.totalorder %s3802_s17, %s5234_s7 }
  0x61   : > { %p3805_p12 = pnand %p3803_p11, %p4349_p8 }
  0x63   : > { %p3806_p13 = pneg %p3805_p12 }
  0x65   : > { %p3811_p2 = pnand %p3809_p0, %p3806_p13 }
  0x67   : > { %3814 = shalt.err (!%p3811_p2)
}
  0x68   : > { %s3815_s28 = scalar_lea.vmem %s415_s19, 1024  ;;  %p3823_p5 = scmp.lt.s32.totalorder %s415_s19, %s415_s19 }
  0x69   : > { %p3816_p4 = scmp.ne.s32.totalorder %s415_s19, %s3815_s28  ;;  %p3824_p10 = scmp.lt.s32.totalorder %s3815_s28, %s3815_s28 }
  0x6b   : > { %p3818_p7 = pnand %p3816_p4, %p4349_p8  ;;  %p3825_p1 = por %p3824_p10, %p3823_p5 }
  0x6d   : > { %p3819_p9 = pneg %p3818_p7 }
  0x6f   : > { %p3826_p3 = pnand %p3825_p1, %p3819_p9 }
  0x71   : > { %3829 = shalt.err (!%p3826_p3)
}
  0x72   : > { %3554 = dma.hbm_to_vmem [thread:$0]  (!%p4335_p6), %s5234_s7, 1024, %s415_s19, [#allocation17], %s5198_s24, %s5198_s24, %s5200_s1  }
  0x73   : > { %s5235_s9 = sld [smem:[#allocation47_spill]] }
  0x79   : > { %s3830_s20 = scalar_lea.hbm %s5235_s9, 2048 }
  0x7a   : > { %p3831_p11 = scmp.ne.s32.totalorder %s5235_s9, %s3830_s20  ;;  %p3837_p12 = scmp.lt.u32.totalorder %s3830_s20, %s5235_s9 }
  0x7c   : > { %p3833_p1 = pnand %p3831_p11, %p4349_p8 }
  0x7e   : > { %p3834_p3 = pneg %p3833_p1 }
  0x80   : > { %p3839_p13 = pnand %p3837_p12, %p3834_p3 }
  0x82   : > { %3842 = shalt.err (!%p3839_p13)
}
  0x83   : > { %s3843_s19 = scalar_lea.vmem %s4399_s14, 2048  ;;  %p3851_p7 = scmp.lt.s32.totalorder %s4399_s14, %s4399_s14 }
  0x84   : > { %p3844_p0 = scmp.ne.s32.totalorder %s4399_s14, %s3843_s19  ;;  %p3852_p9 = scmp.lt.s32.totalorder %s3843_s19, %s3843_s19 }
  0x86   : > { %p3846_p2 = pnand %p3844_p0, %p4349_p8  ;;  %p3853_p5 = por %p3852_p9, %p3851_p7 }
  0x88   : > { %p3847_p4 = pneg %p3846_p2 }
  0x8a   : > { %p3854_p10 = pnand %p3853_p5, %p3847_p4 }
  0x8c   : > { %3857 = shalt.err (!%p3854_p10)
}
  0x8d   : > { %3560 = dma.hbm_to_vmem [thread:$0]  (!%p4335_p6), %s5235_s9, 2048, %s4399_s14, [#allocation20], %s5198_s24, %s5198_s24, %s5200_s1  }
  0x8e   : > { %s2668_s17 = sadd.s32 4294967294, %s4200_s26   ;;  %s50_s12 = sadd.s32 1, %s4196_s25 }
  0x8f   : > { %p52_p11 = scmp.ge.s32.totalorder %s50_s12, 2  ;;  %s59_s18 = sadd.s32 1, %s4188_s23 }
  0x90   : > { %p66_p1 = scmp.ne.s32.totalorder %s4188_s23, %s4184_s22  ;;  %p67_p3 = scmp.eq.s32.totalorder %s4200_s26, 0 }
  0x91   : > { %s5287_s12 = smov (%p52_p11, %s50_s12), 0  ;;  %p72_p13 = scmp.ne.s32.totalorder %s4184_s22, %s4180_s21 }
  0x92   : > { %5236 = sst [smem:[#allocation38_spill]] %s5287_s12  ;;  %p4456_p12 = por %p67_p3, %p66_p1 }
  0x93   : > { %s54_s14 = ssub.s32 %s4196_s25, %s5287_s12  ;;  %p349_p0 = scmp.eq.s32.totalorder %s4319_s27, 1 }
  0x94   : > { %p57_p2 = scmp.eq.s32.totalorder %s54_s14, 0  ;;  %p5238_p4 = scmp.eq.s32.totalorder %s4319_s27, 0 }
  0x95   : > { %p4471_p9 = por %p349_p0, %p66_p1  ;;  %p355_p5 = scmp.eq.s32.totalorder %s2668_s17, 1 }
  0x96   : > { %p4467_p7 = por %p5238_p4, %p72_p13  ;;  %p3592_p11 = scmp.lt.s32.totalorder %s4200_s26, 2 }
  0x97   : > { %s5240_s30 = scalar_select %p4471_p9, 1, 0 }
  0x98   : > { %s5239_s16 = scalar_select %p4467_p7, 1, 0 }
  0x99   : > { %s4476_s4 = scalar_select %p57_p2, %s4188_s23, %s59_s18  }
  0x9a   : > { %p4478_p10 = por %p355_p5, %p72_p13  ;;  %s4484_s19 = sand.u32 1, %s4188_s23  }
  0x9b   : > { %5241 = sst [smem:[#allocation39_spill]] %s4476_s4  ;;  %s5204_s28 = sand.u32 1, %s4200_s26  }
  0x9c   : > { %s5242_s15 = scalar_select %p4478_p10, 1, 0 }
  0x9d   : > { %p4489_p3 = pnand %p3592_p11, %p4456_p12  ;;  %s2687_s14 = sshll.u32 %s4484_s19, 7 }
  0x9e   : > { %5243 = sst [smem:[#allocation40_spill]] %s5242_s15  ;;  %s2766_s24 = sshll.u32 %s4196_s25, 11 }
  0x9f   : > { %s5244_s2 = scalar_select %p4489_p3, 1, 0 }
  0xa0   : > { %s530_s17 = scalar_lea.vmem [#allocation10], %s2687_s14  ;;  %s5245_s3 = sld [smem:[#allocation43_spill]] }
  0xa1   : > { %s537_s18 = sshll.u32 %s530_s17, 4  ;;  %s4504_s20 = scalar_lea.sflag [#allocation11], %s5204_s28  ;;  %s4500_s18 = int_to_ptr.vmem [resolvable:$true] %s537_s18 }
  0xa2   : > { %p4510_p12 = pneg %p4489_p3 }
  0xa4   : > { %s5246_s14 = scalar_select %p4510_p12, 1, 0 }
  0xa6   : > { %s4498_s7 = scalar_lea.hbm %s5245_s3, %s2766_s24  ;;  %s3863_s1 = scalar_lea.hbm %s5245_s3, 4096 }
  0xa7   : > { %s3858_s9 = scalar_lea.hbm %s4498_s7, 2048  ;;  %p3864_p2 = scmp.lt.u32.totalorder %s4498_s7, %s5245_s3 }
  0xa8   : > { %p3859_p1 = scmp.ne.s32.totalorder %s4498_s7, %s3858_s9  ;;  %p3865_p4 = scmp.lt.u32.totalorder %s3863_s1, %s3858_s9 }
  0xa9   : > { %p3867_p11 = scmp.lt.u32.totalorder %s3858_s9, %s4498_s7 }
  0xaa   : > { %p3861_p13 = pnand %p4510_p12, %p3859_p1  ;;  %p3866_p5 = por %p3865_p4, %p3864_p2 }
  0xac   : > { %p3862_p0 = pneg %p3861_p13  ;;  %p3868_p10 = por %p3867_p11, %p3866_p5 }
  0xae   : > { %p3869_p9 = pnand %p3868_p10, %p3862_p0 }
  0xb0   : > { %3872 = shalt.err (!%p3869_p9)
}
  0xb1   : > { %s3873_s28 = scalar_lea.vmem %s4500_s18, 2048  ;;  %s4210_s5 = smov [#allocation10]  }
  0xb2   : > { %p3874_p1 = scmp.ne.s32.totalorder %s4500_s18, %s3873_s28  ;;  %s3878_s24 = sshll.u32 %s4210_s5, 4  ;;  %s3879_s24 = int_to_ptr.vmem [resolvable:$false] %s3878_s24 }
  0xb3   : > { %s3880_s12 = scalar_lea.vmem %s3879_s24, 4096  ;;  %p3881_p6 = scmp.lt.s32.totalorder %s4500_s18, %s3879_s24 }
  0xb4   : > { %p3876_p13 = pnand %p3874_p1, %p4510_p12  ;;  %p3882_p8 = scmp.lt.s32.totalorder %s3880_s12, %s3873_s28 }
  0xb6   : > { %p3877_p7 = pneg %p3876_p13  ;;  %p3883_p2 = por %p3882_p8, %p3881_p6 }
  0xb8   : > { %p3884_p4 = pnand %p3883_p2, %p3877_p7 }
  0xba   : > { %3887 = shalt.err (!%p3884_p4)
}
  0xbb   : > { %s5247_s9 = smov 8   ;;  %s5248_s1 = smov 128  }
  0xbc   : > { %3576 = dma.hbm_to_vmem [thread:$0]  (!%p4489_p3), %s4498_s7, 2048, %s4500_s18, %s4504_s20, %s5248_s1, %s5248_s1, %s5247_s9  }
  0xbd   : > { %s4211_s17 = smov [#allocation15]   ;;  %s4212_s5 = smov [#allocation18]  }
  0xbe   : > { %s404_s3 = sshll.u32 %s4211_s17, 4  ;;  %s427_s4 = sshll.u32 %s4212_s5, 4  ;;  %s405_s3 = int_to_ptr.vmem [resolvable:$true] %s404_s3  ;;  %s4537_s4 = int_to_ptr.vmem [resolvable:$true] %s427_s4 }
  0xbf   : > { %s3888_s12 = scalar_lea.hbm %s5183_s6, 16  ;;  %p5249_p8 = scmp.ne.s32.totalorder %s5232_s29, 0 }
  0xc0   : > { %p3889_p6 = scmp.ne.s32.totalorder %s5183_s6, %s3888_s12  ;;  %p3895_p10 = scmp.lt.u32.totalorder %s3888_s12, %s5183_s6 }
  0xc2   : > { %p3891_p7 = pnand %p3889_p6, %p5249_p8 }
  0xc4   : > { %p3892_p9 = pneg %p3891_p7 }
  0xc6   : > { %p3897_p0 = pnand %p3895_p10, %p3892_p9 }
  0xc8   : > { %3900 = shalt.err (!%p3897_p0)
}
  0xc9   : > { %s3901_s18 = scalar_lea.vmem %s405_s3, 16  ;;  %s3908_s17 = scalar_lea.vmem %s405_s3, 32 }
  0xca   : > { %p3902_p5 = scmp.ne.s32.totalorder %s405_s3, %s3901_s18  ;;  %p3909_p13 = scmp.lt.s32.totalorder %s405_s3, %s405_s3 }
  0xcb   : > { %p3910_p2 = scmp.lt.s32.totalorder %s3908_s17, %s3901_s18 }
  0xcc   : > { %p3904_p11 = pnand %p3902_p5, %p5249_p8 }
  0xcd   : > { %p3911_p4 = por %p3910_p2, %p3909_p13 }
  0xce   : > { %p3905_p1 = pneg %p3904_p11 }
  0xd0   : > { %p3912_p3 = pnand %p3911_p4, %p3905_p1 }
  0xd2   : > { %3915 = shalt.err (!%p3912_p3)
}
  0xd3   : > { %p5250_p6 = scmp.ne.s32.totalorder %s5230_s13, 0  ;;  %s3916_s28 = scalar_lea.hbm %s5185_s8, 2048 }
  0xd4   : > { %p3917_p7 = scmp.ne.s32.totalorder %s5185_s8, %s3916_s28  ;;  %p3923_p3 = scmp.lt.u32.totalorder %s3916_s28, %s5185_s8 }
  0xd5   : > { %3551 = dma.hbm_to_vmem [thread:$0]  (!%p5250_p6), %s5183_s6, 16, %s405_s3, [#allocation14]  }
  0xd6   : > { %p3919_p9 = pnand %p3917_p7, %p5249_p8 }
  0xd8   : > { %p3920_p10 = pneg %p3919_p9 }
  0xda   : > { %p3925_p0 = pnand %p3923_p3, %p3920_p10 }
  0xdc   : > { %3928 = shalt.err (!%p3925_p0)
}
  0xdd   : > { %s3929_s3 = scalar_lea.vmem %s4537_s4, 2048  ;;  %p3937_p13 = scmp.lt.s32.totalorder %s4537_s4, %s4537_s4 }
  0xde   : > { %p3930_p5 = scmp.ne.s32.totalorder %s4537_s4, %s3929_s3  ;;  %p3938_p2 = scmp.lt.s32.totalorder %s3929_s3, %s3929_s3 }
  0xe0   : > { %p3932_p11 = pnand %p3930_p5, %p5249_p8  ;;  %p3939_p4 = por %p3938_p2, %p3937_p13 }
  0xe2   : > { %p3933_p1 = pneg %p3932_p11 }
  0xe4   : > { %p3940_p7 = pnand %p3939_p4, %p3933_p1 }
  0xe6   : > { %3943 = shalt.err (!%p3940_p7)
}
  0xe7   : > { %3557 = dma.hbm_to_vmem [thread:$0]  (!%p5250_p6), %s5185_s8, 2048, %s4537_s4, [#allocation17], %s5248_s1, %s5248_s1, %s5247_s9  }
  0xe8   : > { %s4213_s15 = smov [#allocation21]   ;;  %s4214_s5 = smov [#allocation22]  }
  0xe9   : > { %s453_s21 = sshll.u32 %s4213_s15, 4  ;;  %s467_s28 = sshll.u32 %s4214_s5, 4  ;;  %s454_s21 = int_to_ptr.vmem [resolvable:$true] %s453_s21  ;;  %s4583_s28 = int_to_ptr.vmem [resolvable:$true] %s467_s28 }
  0xea   : > { %s3944_s7 = scalar_lea.hbm %s5187_s10, 2048 }
  0xeb   : > { %p3945_p9 = scmp.ne.s32.totalorder %s5187_s10, %s3944_s7  ;;  %p3951_p0 = scmp.lt.u32.totalorder %s3944_s7, %s5187_s10 }
  0xed   : > { %p3947_p10 = pnand %p3945_p9, %p5249_p8 }
  0xef   : > { %p3948_p3 = pneg %p3947_p10 }
  0xf1   : > { %p3953_p5 = pnand %p3951_p0, %p3948_p3 }
  0xf3   : > { %3956 = shalt.err (!%p3953_p5)
}
  0xf4   : > { %s3957_s23 = scalar_lea.vmem %s454_s21, 2048  ;;  %p3965_p2 = scmp.lt.s32.totalorder %s454_s21, %s454_s21 }
  0xf5   : > { %p3958_p11 = scmp.ne.s32.totalorder %s454_s21, %s3957_s23  ;;  %p3966_p4 = scmp.lt.s32.totalorder %s3957_s23, %s3957_s23 }
  0xf7   : > { %p3960_p1 = pnand %p3958_p11, %p5249_p8  ;;  %p3967_p7 = por %p3966_p4, %p3965_p2 }
  0xf9   : > { %p3961_p13 = pneg %p3960_p1 }
  0xfb   : > { %p3968_p12 = pnand %p3967_p7, %p3961_p13 }
  0xfd   : > { %3971 = shalt.err (!%p3968_p12)
}
  0xfe   : > { %3563 = dma.hbm_to_vmem [thread:$0]  (!%p5250_p6), %s5187_s10, 2048, %s454_s21, [#allocation20], %s5248_s1, %s5248_s1, %s5247_s9  }
  0xff   : > { %s3972_s7 = scalar_lea.hbm %s5188_s11, 16 }
 0x100   : > { %p3973_p9 = scmp.ne.s32.totalorder %s5188_s11, %s3972_s7  ;;  %p3979_p3 = scmp.lt.u32.totalorder %s3972_s7, %s5188_s11 }
 0x102   : > { %p3975_p12 = pnand %p3973_p9, %p5249_p8 }
 0x104   : > { %p3976_p10 = pneg %p3975_p12 }
 0x106   : > { %p3981_p0 = pnand %p3979_p3, %p3976_p10 }
 0x108   : > { %3984 = shalt.err (!%p3981_p0)
}
 0x109   : > { %s3985_s9 = scalar_lea.vmem %s4583_s28, 16  ;;  %s3992_s1 = scalar_lea.vmem %s4583_s28, 32 }
 0x10a   : > { %p3986_p5 = scmp.ne.s32.totalorder %s4583_s28, %s3985_s9  ;;  %p3993_p13 = scmp.lt.s32.totalorder %s4583_s28, %s4583_s28 }
 0x10b   : > { %p3994_p2 = scmp.lt.s32.totalorder %s3992_s1, %s3985_s9 }
 0x10c   : > { %p3988_p11 = pnand %p3986_p5, %p5249_p8 }
 0x10d   : > { %p3995_p4 = por %p3994_p2, %p3993_p13 }
 0x10e   : > { %p3989_p1 = pneg %p3988_p11 }
 0x110   : > { %p3996_p7 = pnand %p3995_p4, %p3989_p1 }
 0x112   : > { %3999 = shalt.err (!%p3996_p7)
}
 0x113   : > { %3566 = dma.hbm_to_vmem [thread:$0]  (!%p5250_p6), %s5188_s11, 16, %s4583_s28, [#allocation23]  }
 0x114   : > { %s4631_s29 = sshll.u32 %s4484_s19, 6  ;;  %s4634_s15 = sshll.u32 %s4196_s25, 10 }
 0x115   : > { %s4640_s12 = scalar_lea.hbm %s5177_s0, %s4634_s15  ;;  %s482_s13 = scalar_lea.vmem [#allocation4], %s4631_s29 }
 0x116   : > { %s492_s7 = sshll.u32 %s482_s13, 4  ;;  %s479_s28 = scalar_lea.sflag [#allocation5], %s4484_s19  ;;  %s4643_s7 = int_to_ptr.vmem [resolvable:$true] %s492_s7 }
 0x117   : > { %s4000_s18 = scalar_lea.hbm %s4640_s12, 1024  ;;  %p5251_p6 = scmp.ne.s32.totalorder %s5246_s14, 0 }
 0x118   : > { %p4001_p8 = scmp.ne.s32.totalorder %s4640_s12, %s4000_s18  ;;  %s4005_s4 = scalar_lea.hbm %s5177_s0, 2048 }
 0x119   : > { %p4006_p10 = scmp.lt.u32.totalorder %s4640_s12, %s5177_s0  ;;  %p4007_p3 = scmp.lt.u32.totalorder %s4005_s4, %s4000_s18 }
 0x11a   : > { %p4003_p9 = pnand %p4001_p8, %p5251_p6  ;;  %p4009_p5 = scmp.lt.u32.totalorder %s4000_s18, %s4640_s12 }
 0x11b   : > { %p4008_p0 = por %p4007_p3, %p4006_p10 }
 0x11c   : > { %p4004_p12 = pneg %p4003_p9 }
 0x11d   : > { %p4010_p11 = por %p4009_p5, %p4008_p0 }
 0x11f   : > { %p4011_p1 = pnand %p4010_p11, %p4004_p12 }
 0x121   : > { %4014 = shalt.err (!%p4011_p1)
}
 0x122   : > { %s4015_s21 = scalar_lea.vmem %s4643_s7, 1024  ;;  %s4215_s23 = smov [#allocation4]  }
 0x123   : > { %p4016_p13 = scmp.ne.s32.totalorder %s4643_s7, %s4015_s21  ;;  %s4020_s5 = sshll.u32 %s4215_s23, 4  ;;  %s4021_s5 = int_to_ptr.vmem [resolvable:$false] %s4020_s5 }
 0x124   : > { %s4022_s24 = scalar_lea.vmem %s4021_s5, 2048  ;;  %p4023_p7 = scmp.lt.s32.totalorder %s4643_s7, %s4021_s5 }
 0x125   : > { %p4018_p2 = pnand %p4016_p13, %p5251_p6  ;;  %p4024_p8 = scmp.lt.s32.totalorder %s4022_s24, %s4015_s21 }
 0x127   : > { %p4019_p4 = pneg %p4018_p2  ;;  %p4025_p9 = por %p4024_p8, %p4023_p7 }
 0x129   : > { %p4026_p10 = pnand %p4025_p9, %p4019_p4 }
 0x12b   : > { %4029 = shalt.err (!%p4026_p10)
}
 0x12c   : > { %s4216_s13 = smov 256   ;;  %s4217_s18 = smov 16  }
 0x12d   : > { %p5252_p12 = scmp.ne.s32.totalorder %s5244_s2, 0  ;;  %s5253_s4 = sld [smem:[#allocation41_spill]] }
 0x12e   : > { %s506_s1 = scalar_lea.vmem [#allocation7], %s4631_s29  ;;  %s5254_s23 = sand.u32 1, %s4200_s26  }
 0x12f   : > { %3570 = dma.hbm_to_vmem [thread:$0]  (!%p5252_p12), %s4640_s12, 1024, %s4643_s7, %s479_s28, %s4216_s13, %s4216_s13, %s4217_s18  }
 0x130   : > { %s516_s21 = sshll.u32 %s506_s1, 4  ;;  %s4683_s5 = scalar_lea.sflag [#allocation8], %s5254_s23  ;;  %s4679_s21 = int_to_ptr.vmem [resolvable:$true] %s516_s21 }
 0x133   : > { %s4676_s9 = scalar_lea.hbm %s5253_s4, %s4634_s15  ;;  %s4035_s7 = scalar_lea.hbm %s5253_s4, 2048 }
 0x134   : > { %s4030_s24 = scalar_lea.hbm %s4676_s9, 1024  ;;  %p4036_p11 = scmp.lt.u32.totalorder %s4676_s9, %s5253_s4 }
 0x135   : > { %p4031_p3 = scmp.ne.s32.totalorder %s4676_s9, %s4030_s24  ;;  %p4037_p1 = scmp.lt.u32.totalorder %s4035_s7, %s4030_s24 }
 0x136   : > { %p4039_p2 = scmp.lt.u32.totalorder %s4030_s24, %s4676_s9 }
 0x137   : > { %p4033_p0 = pnand %p4031_p3, %p5251_p6  ;;  %p4038_p13 = por %p4037_p1, %p4036_p11 }
 0x139   : > { %p4034_p5 = pneg %p4033_p0  ;;  %p4040_p4 = por %p4039_p2, %p4038_p13 }
 0x13b   : > { %p4041_p7 = pnand %p4040_p4, %p4034_p5 }
 0x13d   : > { %4044 = shalt.err (!%p4041_p7)
}
 0x13e   : > { %s4045_s17 = scalar_lea.vmem %s4679_s21, 1024  ;;  %s4218_s1 = smov [#allocation7]  }
 0x13f   : > { %p4046_p8 = scmp.ne.s32.totalorder %s4679_s21, %s4045_s17  ;;  %s4050_s23 = sshll.u32 %s4218_s1, 4  ;;  %s4051_s23 = int_to_ptr.vmem [resolvable:$false] %s4050_s23 }
 0x140   : > { %s4052_s19 = scalar_lea.vmem %s4051_s23, 2048  ;;  %p4053_p3 = scmp.lt.s32.totalorder %s4679_s21, %s4051_s23 }
 0x141   : > { %p4048_p9 = pnand %p4046_p8, %p5251_p6  ;;  %p4054_p0 = scmp.lt.s32.totalorder %s4052_s19, %s4045_s17 }
 0x143   : > { %p4049_p10 = pneg %p4048_p9  ;;  %p4055_p11 = por %p4054_p0, %p4053_p3 }
 0x145   : > { %p4056_p1 = pnand %p4055_p11, %p4049_p10 }
 0x147   : > { %4059 = shalt.err (!%p4056_p1)
}
 0x148   : > { %3573 = dma.hbm_to_vmem [thread:$0]  (!%p5252_p12), %s4676_s9, 1024, %s4679_s21, %s4683_s5, %s4216_s13, %s4216_s13, %s4217_s18  }
 0x149   : > { %s5255_s7 = sld [smem:[#allocation44_spill]]  ;;  %s551_s3 = scalar_lea.vmem [#allocation12], %s4631_s29 }
 0x14a   : > { %s558_s17 = sshll.u32 %s551_s3, 4  ;;  %s4717_s17 = int_to_ptr.vmem [resolvable:$true] %s558_s17 }
 0x14f   : > { %s4714_s28 = scalar_lea.hbm %s5255_s7, %s4634_s15  ;;  %s4065_s18 = scalar_lea.hbm %s5255_s7, 2048 }
 0x150   : > { %s4060_s1 = scalar_lea.hbm %s4714_s28, 1024  ;;  %p4066_p4 = scmp.lt.u32.totalorder %s4714_s28, %s5255_s7 }
 0x151   : > { %p4061_p5 = scmp.ne.s32.totalorder %s4714_s28, %s4060_s1  ;;  %p4067_p7 = scmp.lt.u32.totalorder %s4065_s18, %s4060_s1 }
 0x152   : > { %p4069_p9 = scmp.lt.u32.totalorder %s4060_s1, %s4714_s28 }
 0x153   : > { %p4063_p13 = pnand %p4061_p5, %p5251_p6  ;;  %p4068_p8 = por %p4067_p7, %p4066_p4 }
 0x155   : > { %p4064_p2 = pneg %p4063_p13  ;;  %p4070_p10 = por %p4069_p9, %p4068_p8 }
 0x157   : > { %p4071_p3 = pnand %p4070_p10, %p4064_p2 }
 0x159   : > { %4074 = shalt.err (!%p4071_p3)
}
 0x15a   : > { %s4075_s29 = scalar_lea.vmem %s4717_s17, 1024  ;;  %s4219_s21 = smov [#allocation12]  }
 0x15b   : > { %p4076_p0 = scmp.ne.s32.totalorder %s4717_s17, %s4075_s29  ;;  %s4080_s5 = sshll.u32 %s4219_s21, 4  ;;  %s4081_s5 = int_to_ptr.vmem [resolvable:$false] %s4080_s5 }
 0x15c   : > { %s4082_s19 = scalar_lea.vmem %s4081_s5, 2048  ;;  %p4083_p5 = scmp.lt.s32.totalorder %s4717_s17, %s4081_s5 }
 0x15d   : > { %p4078_p11 = pnand %p4076_p0, %p5251_p6  ;;  %p4084_p13 = scmp.lt.s32.totalorder %s4082_s19, %s4075_s29 }
 0x15f   : > { %p4079_p1 = pneg %p4078_p11  ;;  %p4085_p4 = por %p4084_p13, %p4083_p5 }
 0x161   : > { %p4086_p7 = pnand %p4085_p4, %p4079_p1 }
 0x163   : > { %4089 = shalt.err (!%p4086_p7)
}
 0x164   : > { %s5256_s24 = smov 4   ;;  %s5257_s12 = smov 64  }
 0x165   : > { %3579 = dma.hbm_to_vmem [thread:$0]  (!%p5252_p12), %s4714_s28, 1024, %s4717_s17, %s4504_s20, %s5257_s12, %s5257_s12, %s5256_s24  }
 0x166   : > { %s5258_s14 = sld [smem:[#allocation37_spill]] }
 0x16c   : > { %p5259_p6 = scmp.ne.s32.totalorder %s5258_s14, 0 }
 0x16d   : > { %s4747_s3 = sand.u32 (!%p5259_p6), 1, %s4184_s22   ;;  %p5260_p2 = scmp.ne.s32.totalorder (!%p5259_p6), %s5239_s16, 0 }
 0x16e   : > { %570 = sbr.rel (%p5259_p6) target bundleno = 1311 (0x51f), region = 68  ;;  %s2694_s1 = sshll.u32 (!%p5259_p6), %s4747_s3, 6 }
 0x16f   : > { %s573_s23 = scalar_lea.sflag (!%p5259_p6), [#allocation5], %s4747_s3  ;;  %s4751_s13 = scalar_lea.vmem (!%p5259_p6), [#allocation4], %s2694_s1 }
 0x175   : > { %4143 = dma.done.wait (%p5260_p2), %s573_s23, 1024  }
 0x176   : > { %4145 = vsyncadd (%p5260_p2), %s573_s23, 4294966272  ;;  %s581_s2 = sand.u32 1, %s4319_s27   ;;  %s4758_s28 = scalar_lea.vmem [#allocation7], %s2694_s1 }
 0x177   : > { %s582_s20 = scalar_lea.sflag [#allocation8], %s581_s2 }
 0x178   : > { %4147 = dma.done.wait (%p5260_p2), %s582_s20, 1024  }
 0x179   : > { %4149 = vsyncadd (%p5260_p2), %s582_s20, 4294966272  ;;  %p5261_p12 = scmp.eq.s32.totalorder %s4319_s27, 0 }
 0x17b   : > { %4151 = dma.done.wait (%p5261_p12), [#allocation8], 2048   ;;  %p5262_p8 = pmov %p5261_p12 }
 0x17c   : > { %s2697_s17 = sshll.u32 %s4747_s3, 7  ;;  %s595_s18 = scalar_lea.sflag [#allocation11], %s581_s2 }
 0x17d   : > { %4153 = vsyncadd (%p5262_p8), [#allocation8], 4294965248  ;;  %s4771_s9 = scalar_lea.vmem [#allocation10], %s2697_s17 }
 0x17e   : > { %4155 = dma.done.wait (%p5260_p2), %s595_s18, 3072  }
 0x17f   : > { %4157 = vsyncadd (%p5260_p2), %s595_s18, 4294964224  ;;  %s4777_s15 = scalar_lea.vmem [#allocation12], %s2694_s1  ;;  %p5263_p9 = pmov %p5262_p8 }
 0x180   : > { %p5264_p10 = pmov %p5262_p8 }
 0x181   : > { %4159 = dma.done.wait (%p5263_p9), [#allocation14], 528  }
 0x182   : > { %4161 = vsyncadd (%p5264_p10), [#allocation14], 4294966768  ;;  %p5265_p3 = pmov %p5262_p8 }
 0x184   : > { %4163 = dma.done.wait (%p5265_p3), [#allocation17], 3072   ;;  %p5266_p0 = pmov %p5265_p3 }
 0x186   : > { %4165 = vsyncadd (%p5266_p0), [#allocation17], 4294964224  ;;  %p5267_p11 = pmov %p5266_p0 }
 0x187   : > { %p5268_p1 = pmov %p5266_p0 }
 0x188   : > { %4167 = dma.done.wait (%p5267_p11), [#allocation20], 4096  }
 0x189   : > { %4169 = vsyncadd (%p5268_p1), [#allocation20], 4294963200  ;;  %p5269_p5 = pmov %p5266_p0 }
 0x18a   : > { %p5270_p13 = pmov %p5266_p0 }
 0x18b   : > { %4171 = dma.done.wait (%p5269_p5), [#allocation23], 16  }
 0x18c   : > { %4173 = vsyncadd (%p5270_p13), [#allocation23], 4294967280  ;;  %v4795_v0 = vld [vmem:[#allocation9 + $0x40] sm:$0xff]   ;;  %v1222_v2 = vld [vmem:[#allocation13 + $0x8] sm:$0xff]  ;;  %vm1232_vm0 = vcmask 261120   ;;  %vm1643_vm1 = vcmask 523264  }
 0x18d   : > { %v1221_v1 = vld [vmem:[#allocation13] sm:$0xff]  ;;  %2808 = vmatprep.subr.bf16.mxu0 %v4795_v0  ;;  %v4800_v5 = vld [vmem:[#allocation9 + $0x48] sm:$0xff]   ;;  %v1223_v6 = vld [vmem:[#allocation13 + $0x10] sm:$0xff]  ;;  %s5088_s27 = scalar_lea.vmem [#allocation24], %s2697_s17  ;;  %s5271_s16 = sld [smem:[#allocation36_spill]] }
 0x18e   : > { %v3316_v3 = vpack.c.bf16 %v1222_v2, %v1221_v1  ;;  %v4798_v4 = vld [vmem:[#allocation9] sm:$0xff]   ;;  %v1224_v7 = vld [vmem:[#allocation13 + $0x18] sm:$0xff]  ;;  %v4804_v9 = vld [vmem:[#allocation9 + $0x8] sm:$0xff]   ;;  %s2436_s21 = sshll.u32 %s5088_s27, 4  ;;  %s5272_s24 = sld [smem:[#allocation48_spill]]  ;;  %s5125_s21 = int_to_ptr.vmem [resolvable:$true] %s2436_s21 }
 0x18f   : > { %2809 = vmatpush3.bf16.msra.mxu0 %v4798_v4  ;;  %v3320_v8 = vpack.c.bf16 %v1224_v7, %v1223_v6  ;;  %v1205_v10 = vld [vmem:[%s4771_s9] sm:$0xff]  ;;  %v4808_v11 = vld [vmem:[#allocation9 + $0x50] sm:$0xff]   ;;  %v1206_v13 = vld [vmem:[%s4771_s9 + $0x8] sm:$0xff]  ;;  %s2423_s1 = scalar_lea.sflag [#allocation6], %s4747_s3  ;;  %s4090_s23 = scalar_lea.vmem %s5125_s21, 2048 }
 0x190   : > { %3317 = vmatprep.subr.bf16.mxu1 %v3316_v3  ;;  %2810 = vmatprep.subr.bf16.mxu0 %v4800_v5  ;;  %v4811_v12 = vld [vmem:[#allocation9 + $0x10] sm:$0xff]   ;;  %v4815_v14 = vld [vmem:[#allocation9 + $0x58] sm:$0xff]   ;;  %v4825_v18 = vld [vmem:[#allocation9 + $0x60] sm:$0xff]   ;;  %p4091_p4 = scmp.ne.s32.totalorder %s5125_s21, %s4090_s23  ;;  %p5274_p7 = scmp.ne.s32.totalorder %s5240_s30, 0 }
 0x191   : > { %3319 = vmatpush3.bf16.msra.mxu1 %v3316_v3  ;;  %3084 = vmatprep.mubr.msk.f32.mxu1 %vm1232_vm0, %v1205_v10  ;;  %v1207_v15 = vld [vmem:[%s4771_s9 + $0x10] sm:$0xff]  ;;  %v4820_v16 = vld [vmem:[#allocation9 + $0x18] sm:$0xff]   ;;  %v1209_v19 = vld [vmem:[%s4771_s9 + $0x20] sm:$0xff] }
 0x192   : > { %3321 = vmatprep.subr.bf16.mxu1 %v3320_v8  ;;  %v1208_v17 = vld [vmem:[%s4771_s9 + $0x18] sm:$0xff]  ;;  %v4830_v20 = vld [vmem:[#allocation9 + $0x20] sm:$0xff]   ;;  %v1210_v21 = vld [vmem:[%s4771_s9 + $0x28] sm:$0xff]  ;;  %p4092_p6 = pnand %p4091_p4, %p5274_p7 }
 0x193   : > { %2811 = vmatpush3.bf16.msra.mxu0 %v4804_v9  ;;  %v4835_v22 = vld [vmem:[#allocation9 + $0x68] sm:$0xff]   ;;  %v1211_v23 = vld [vmem:[%s4771_s9 + $0x30] sm:$0xff]  ;;  %v1212_v25 = vld [vmem:[%s4771_s9 + $0x38] sm:$0xff]  ;;  %s2768_s29 = sshll.u32 %s5271_s16, 11 }
 0x194   : > { %2812 = vmatprep.subr.bf16.mxu0 %v4808_v11  ;;  %v4840_v24 = vld [vmem:[#allocation9 + $0x28] sm:$0xff]   ;;  %v4845_v26 = vld [vmem:[#allocation9 + $0x70] sm:$0xff]   ;;  %v1213_v28 = vld [vmem:[%s4771_s9 + $0x40] sm:$0xff]  ;;  %s5273_s12 = smov %s5272_s24  ;;  %s5123_s14 = scalar_lea.hbm %s5272_s24, %s2768_s29 }
 0x195   : > { %3323 = vmatpush3.bf16.msra.mxu1 %v3320_v8  ;;  %v769_v27 = vld [vmem:[%s4751_s13 + $0x8] sm:$0xff]  ;;  %v4851_v30 = vld [vmem:[#allocation9 + $0x30] sm:$0xff]   ;;  %v4856_v32 = vld [vmem:[#allocation9 + $0x78] sm:$0xff]   ;;  %p4093_p2 = pneg %p4092_p6 }
 0x196   : > { %v777_v29 = vunpack.c.l.s8.bf16 %v769_v27  ;;  %v1214_v31 = vld [vmem:[%s4771_s9 + $0x48] sm:$0xff]  ;;  %v1215_v33 = vld [vmem:[%s4771_s9 + $0x50] sm:$0xff]  ;;  %v4859_v34 = vld [vmem:[#allocation9 + $0x38] sm:$0xff]   ;;  %v779_v44 = vunpack.c.h.s8.bf16 %v769_v27 }
 0x197   : > { %2813 = vmatpush3.bf16.msra.mxu0 %v4811_v12  ;;  %v768_v35 = vld [vmem:[%s4751_s13] sm:$0xff]  ;;  %v1483_v37 = vld [vmem:[#allocation18 + $0x8] sm:$0xff]  ;;  %v1216_v38 = vld [vmem:[%s4771_s9 + $0x58] sm:$0xff] }
 0x198   : > { %3085 = vmatmul.mubr.msk.f32.vlgmr.msra.gmra.mrb[0].mxu1 %vm1232_vm0, %v1206_v13  ;;  %2814 = vmatprep.subr.bf16.mxu0 %v4815_v14  ;;  %v1482_v36 = vld [vmem:[#allocation18] sm:$0xff]  ;;  %v776_v40 = vunpack.c.l.s8.bf16 %v768_v35  ;;  %v1484_v42 = vld [vmem:[#allocation18 + $0x10] sm:$0xff]  ;;  %v1485_v43 = vld [vmem:[#allocation18 + $0x18] sm:$0xff]  ;;  %v778_v57 = vunpack.c.h.s8.bf16 %v768_v35 }
 0x199   : > { %3087 = vmatprep.mubr.msk.f32.mxu1 %vm1232_vm0, %v1207_v15  ;;  %960 = vmatprep.mubr.bf16.mxu0 %v777_v29  ;;  %v1217_v39 = vld [vmem:[%s4771_s9 + $0x60] sm:$0xff]  ;;  %v4868_v41 = vpack.c.bf16 %v1483_v37, %v1482_v36  ;;  %v1218_v45 = vld [vmem:[%s4771_s9 + $0x68] sm:$0xff]  ;;  %v1219_v46 = vld [vmem:[%s4771_s9 + $0x70] sm:$0xff]  ;;  %v4877_v47 = vpack.c.bf16 %v1485_v43, %v1484_v42 }
 0x19a   : > { %v1486_v48 = vld [vmem:[#allocation18 + $0x20] sm:$0xff]  ;;  %v1487_v49 = vld [vmem:[#allocation18 + $0x28] sm:$0xff]  ;;  %v1220_v51 = vld [vmem:[%s4771_s9 + $0x78] sm:$0xff] }
 0x19b   : > { %2815 = vmatpush3.bf16.msra.mxu0 %v4820_v16  ;;  %3436 = vmatprep.subr.bf16.mxu1 %v4868_v41  ;;  %v4881_v50 = vld [vmem:[%s4777_s15 + $0x8] sm:$0xff]   ;;  %v771_v52 = vld [vmem:[%s4751_s13 + $0x18] sm:$0xff]  ;;  %v4888_v53 = vpack.c.bf16 %v1487_v49, %v1486_v48  ;;  %v770_v62 = vld [vmem:[%s4751_s13 + $0x10] sm:$0xff] }
 0x19c   : > { %3088 = vmatmul.mubr.msk.f32.gmra.mrb[2].mxu1 %vm1232_vm0, %v1208_v17  ;;  %2816 = vmatprep.subr.bf16.mxu0 %v4825_v18  ;;  %v1488_v54 = vld [vmem:[#allocation18 + $0x30] sm:$0xff]  ;;  %v1489_v55 = vld [vmem:[#allocation18 + $0x38] sm:$0xff]  ;;  %v2775_v56 = vunpack.c.l.bf16 %v4881_v50  ;;  %v781_v58 = vunpack.c.l.s8.bf16 %v771_v52  ;;  %v1490_v60 = vld [vmem:[#allocation18 + $0x40] sm:$0xff]  ;;  %v780_v2 = vunpack.c.l.s8.bf16 %v770_v62  ;;  %v783_v3 = vunpack.c.h.s8.bf16 %v771_v52 }
 0x19d   : > { %3090 = vmatprep.mubr.msk.f32.mxu1 %vm1232_vm0, %v1209_v19  ;;  %3444 = vmatpush3.bf16.msra.mxu1 %v4868_v41  ;;  %v4898_v59 = vpack.c.bf16 %v1489_v55, %v1488_v54  ;;  %v1491_v61 = vld [vmem:[#allocation18 + $0x48] sm:$0xff]  ;;  %v1493_v1 = vld [vmem:[#allocation18 + $0x58] sm:$0xff]  ;;  %v2776_v19 = vunpack.c.h.bf16 %v4881_v50 }
 0x19e   : > { %3437 = vmatprep.subr.bf16.mxu1 %v4877_v47  ;;  %v4903_v63 = vpack.c.bf16 %v1491_v61, %v1490_v60  ;;  %v1495_v6 = vld [vmem:[#allocation18 + $0x68] sm:$0xff]  ;;  %v1497_v10 = vld [vmem:[#allocation18 + $0x78] sm:$0xff] }
 0x19f   : > { %2817 = vmatpush3.bf16.msra.mxu0 %v4830_v20  ;;  %v773_v8 = vld [vmem:[%s4751_s13 + $0x28] sm:$0xff]  ;;  %v2802_v17 = vld [vmem:[%s4777_s15 + $0x10] sm:$0xff]   ;;  %v792_v54 = vld [vmem:[%s4758_s28] sm:$0xff] }
 0x1a0   : > { %3091 = vmatmul.mubr.msk.f32.gmra.mrb[4].mxu1 %vm1232_vm0, %v1210_v21  ;;  %2818 = vmatprep.subr.bf16.mxu0 %v4835_v22  ;;  %v1475_v15 = vld [vmem:[#allocation16 + $0x8] sm:$0xff]  ;;  %v1477_v21 = vld [vmem:[#allocation16 + $0x18] sm:$0xff]  ;;  %v2780_v27 = vunpack.c.h.bf16 %v2802_v17 }
 0x1a1   : > { %3093 = vmatprep.mubr.msk.f32.mxu1 %vm1232_vm0, %v1211_v23  ;;  %3445 = vmatpush3.bf16.msra.mxu1 %v4877_v47  ;;  %v2779_v23 = vunpack.c.l.bf16 %v2802_v17  ;;  %v1479_v29 = vld [vmem:[#allocation16 + $0x28] sm:$0xff]  ;;  %v2807_v55 = vld [vmem:[%s4777_s15 + $0x38] sm:$0xff]  }
 0x1a2   : > { %3438 = vmatprep.subr.bf16.mxu1 %v4888_v53  ;;  %v774_v42 = vld [vmem:[%s4751_s13 + $0x30] sm:$0xff]  ;;  %v793_v50 = vld [vmem:[%s4758_s28 + $0x8] sm:$0xff]  ;;  %v1481_v60 = vld [vmem:[#allocation16 + $0x38] sm:$0xff] }
 0x1a3   : > { %2819 = vmatpush3.bf16.msra.mxu0 %v4840_v24  ;;  %v2806_v43 = vld [vmem:[%s4777_s15 + $0x30] sm:$0xff]   ;;  %v801_v52 = vunpack.c.l.s8.bf16 %v793_v50  ;;  %v803_v61 = vunpack.c.h.s8.bf16 %v793_v50 }
 0x1a4   : > { %3094 = vmatmul.mubr.msk.f32.gmra.mrb[6].mxu1 %vm1232_vm0, %v1212_v25  ;;  %2820 = vmatprep.subr.bf16.mxu0 %v4845_v26  ;;  %v2803_v25 = vld [vmem:[%s4777_s15 + $0x18] sm:$0xff]   ;;  %v2796_v49 = vunpack.c.h.bf16 %v2806_v43 }
 0x1a5   : > { %3096 = vmatprep.mubr.msk.f32.mxu1 %vm1232_vm0, %v1213_v28  ;;  %3446 = vmatpush3.bf16.msra.mxu1 %v4888_v53  ;;  %v1478_v28 = vld [vmem:[#allocation16 + $0x20] sm:$0xff] }
 0x1a6   : > { %3439 = vmatprep.subr.bf16.mxu1 %v4898_v59 }
 0x1a7   : > { %2821 = vmatpush3.bf16.msra.mxu0 %v4851_v30 }
 0x1a8   : > { %3097 = vmatmul.mubr.msk.f32.gmra.mrb[8].mxu1 %vm1232_vm0, %v1214_v31  ;;  %2822 = vmatprep.subr.bf16.mxu0 %v4856_v32  ;;  %v2804_v31 = vld [vmem:[%s4777_s15 + $0x20] sm:$0xff]  }
 0x1a9   : > { %3099 = vmatprep.mubr.msk.f32.mxu1 %vm1232_vm0, %v1215_v33  ;;  %3447 = vmatpush3.bf16.msra.mxu1 %v4898_v59  ;;  %v3364_v33 = vpack.c.bf16 %v1479_v29, %v1478_v28  ;;  %v2787_v36 = vunpack.c.l.bf16 %v2804_v31 }
 0x1aa   : > { %3440 = vmatprep.subr.bf16.mxu1 %v4903_v63 }
 0x1ab   : > { %2823 = vmatpush3.bf16.msra.mxu0 %v4859_v34 }
 0x1ac   : > { %3100 = vmatmul.mubr.msk.f32.gmra.mrb[10].mxu1 %vm1232_vm0, %v1216_v38  ;;  %2872 = vmatprep.subr.bf16.mxu0 %v4795_v0  ;;  %v1492_v0 = vld [vmem:[#allocation18 + $0x50] sm:$0xff]  ;;  %v2805_v38 = vld [vmem:[%s4777_s15 + $0x28] sm:$0xff]  }
 0x1ad   : > { %3102 = vmatprep.mubr.msk.f32.mxu1 %vm1232_vm0, %v1217_v39  ;;  %3448 = vmatpush3.bf16.msra.mxu1 %v4903_v63  ;;  %v2788_v39 = vunpack.c.h.bf16 %v2804_v31 }
 0x1ae   : > { %961 = vmatmul.mubr.bf16.vlgmr.msra.gmra.mrb[0].mxu0 %v776_v40  ;;  %v2791_v40 = vunpack.c.l.bf16 %v2805_v38 }
 0x1af   : > { %2873 = vmatpush3.bf16.msra.mxu0 %v4798_v4  ;;  %968 = vmatprep.mubr.bf16.mxu0 %v779_v44  ;;  %v4911_v4 = vpack.c.bf16 %v1493_v1, %v1492_v0  ;;  %v2792_v44 = vunpack.c.h.bf16 %v2805_v38  ;;  %v1853_v1 = vld [vmem:[#allocation19] sm:$0xff] }
 0x1b0   : > { %3103 = vmatmul.mubr.msk.f32.gmra.mrb[12].mxu1 %vm1232_vm0, %v1218_v45  ;;  %2874 = vmatprep.subr.bf16.mxu0 %v4800_v5  ;;  %v1494_v5 = vld [vmem:[#allocation18 + $0x60] sm:$0xff]  ;;  %v788_v45 = vunpack.c.l.s8.bf16 %v774_v42 }
 0x1b1   : > { %3105 = vmatprep.mubr.msk.f32.mxu1 %vm1232_vm0, %v1219_v46  ;;  %v4915_v7 = vpack.c.bf16 %v1495_v6, %v1494_v5  ;;  %3441 = vmatprep.subr.bf16.mxu1 %v4911_v4  ;;  %v2795_v46 = vunpack.c.l.bf16 %v2806_v43  ;;  %v795_v5 = vld [vmem:[%s4758_s28 + $0x18] sm:$0xff]  ;;  %v802_v6 = vunpack.c.h.s8.bf16 %v792_v54 }
 0x1b2   : > { %3449 = vmatpush3.bf16.msra.mxu1 %v4911_v4 }
 0x1b3   : > { %2875 = vmatpush3.bf16.msra.mxu0 %v4804_v9  ;;  %v1496_v9 = vld [vmem:[#allocation18 + $0x70] sm:$0xff]  ;;  %3442 = vmatprep.subr.bf16.mxu1 %v4915_v7 }
 0x1b4   : > { %3106 = vmatmul.mubr.msk.f32.gmra.mrb[14].mxu1 %vm1232_vm0, %v1220_v51  ;;  %2876 = vmatprep.subr.bf16.mxu0 %v4808_v11  ;;  %v782_v11 = vunpack.c.h.s8.bf16 %v770_v62  ;;  %v4924_v13 = vpack.c.bf16 %v1497_v10, %v1496_v9  ;;  %v790_v51 = vunpack.c.h.s8.bf16 %v774_v42  ;;  %v2800_v62 = vunpack.c.h.bf16 %v2807_v55  ;;  %v794_v9 = vld [vmem:[%s4758_s28 + $0x10] sm:$0xff] }
 0x1b5   : > { %3143 = vmatprep.mubr.f32.mxu1 %v2775_v56  ;;  %v800_v56 = vunpack.c.l.s8.bf16 %v792_v54  ;;  %v807_v10 = vunpack.c.h.s8.bf16 %v795_v5 }
 0x1b6   : > { %969 = vmatmul.mubr.bf16.gmra.mrb[4].mxu0 %v778_v57  ;;  %3450 = vmatpush3.bf16.msra.mxu1 %v4915_v7  ;;  %v2799_v57 = vunpack.c.l.bf16 %v2807_v55 }
 0x1b7   : > { %976 = vmatprep.mubr.bf16.mxu0 %v781_v58  ;;  %2877 = vmatpush3.bf16.msra.mxu0 %v4811_v12  ;;  %v785_v12 = vunpack.c.l.s8.bf16 %v773_v8  ;;  %v1480_v58 = vld [vmem:[#allocation16 + $0x30] sm:$0xff] }
 0x1b8   : > { %2878 = vmatprep.subr.bf16.mxu0 %v4815_v14  ;;  %v1474_v14 = vld [vmem:[#allocation16] sm:$0xff]  ;;  %3443 = vmatprep.subr.bf16.mxu1 %v4924_v13  ;;  %v3368_v0 = vpack.c.bf16 %v1481_v60, %v1480_v58 }
 0x1ba   : > { %3451 = vmatpush3.bf16.msra.mxu1 %v4924_v13 }
 0x1bb   : > { %2879 = vmatpush3.bf16.msra.mxu0 %v4820_v16  ;;  %v772_v16 = vld [vmem:[%s4751_s13 + $0x20] sm:$0xff] }
 0x1bc   : > { %2880 = vmatprep.subr.bf16.mxu0 %v4825_v18  ;;  %v3356_v18 = vpack.c.bf16 %v1475_v15, %v1474_v14  ;;  %v786_v35 = vunpack.c.h.s8.bf16 %v772_v16  ;;  %v799_v14 = vld [vmem:[%s4758_s28 + $0x38] sm:$0xff] }
 0x1bd   : > { %3144 = vmatmul.mubr.f32.vlgmr.msra.gmra.mrb[16].mxu1 %v2776_v19  ;;  %v2770_v19 = vld [vmem:[%s4777_s15] sm:$0xff]  }
 0x1be   : > { %977 = vmatmul.mubr.bf16.gmra.mrb[8].mxu0 %v780_v2  ;;  %3357 = vmatprep.subr.bf16.mxu1 %v3356_v18  ;;  %v1854_v2 = vld [vmem:[#allocation19 + $0x8] sm:$0xff] }
 0x1bf   : > { %984 = vmatprep.mubr.bf16.mxu0 %v783_v3  ;;  %2881 = vmatpush3.bf16.msra.mxu0 %v4830_v20  ;;  %v1476_v20 = vld [vmem:[#allocation16 + $0x10] sm:$0xff]  ;;  %v4945_v3 = vpack.c.bf16 %v1854_v2, %v1853_v1 }
 0x1c0   : > { %2882 = vmatprep.subr.bf16.mxu0 %v4835_v22  ;;  %v784_v22 = vunpack.c.l.s8.bf16 %v772_v16  ;;  %3146 = vmatprep.mubr.f32.mxu1 %v2779_v23  ;;  %v798_v16 = vld [vmem:[%s4758_s28 + $0x30] sm:$0xff] }
 0x1c1   : > { %3359 = vmatpush3.bf16.msra.mxu1 %v3356_v18  ;;  %v812_v17 = vunpack.c.l.s8.bf16 %v798_v16  ;;  %v815_v18 = vunpack.c.h.s8.bf16 %v799_v14 }
 0x1c2   : > { %3147 = vmatmul.mubr.f32.gmra.mrb[18].mxu1 %v2780_v27  ;;  %v1856_v27 = vld [vmem:[#allocation19 + $0x18] sm:$0xff] }
 0x1c3   : > { %2883 = vmatpush3.bf16.msra.mxu0 %v4840_v24  ;;  %v787_v24 = vunpack.c.h.s8.bf16 %v773_v8  ;;  %v805_v8 = vunpack.c.l.s8.bf16 %v795_v5  ;;  %v1864_v5 = vld [vmem:[#allocation19 + $0x58] sm:$0xff] }
 0x1c4   : > { %2884 = vmatprep.subr.bf16.mxu0 %v4845_v26  ;;  %v3360_v26 = vpack.c.bf16 %v1477_v21, %v1476_v20  ;;  %v2771_v20 = vunpack.c.l.bf16 %v2770_v19  ;;  %v2772_v21 = vunpack.c.h.bf16 %v2770_v19 }
 0x1c6   : > { %985 = vmatmul.mubr.bf16.gmra.mrb[12].mxu0 %v782_v11  ;;  %3361 = vmatprep.subr.bf16.mxu1 %v3360_v26  ;;  %v806_v11 = vunpack.c.h.s8.bf16 %v794_v9 }
 0x1c7   : > { %992 = vmatprep.mubr.bf16.mxu0 %v785_v12  ;;  %2885 = vmatpush3.bf16.msra.mxu0 %v4851_v30  ;;  %v2783_v30 = vunpack.c.l.bf16 %v2803_v25 }
 0x1c8   : > { %2886 = vmatprep.subr.bf16.mxu0 %v4856_v32  ;;  %v775_v32 = vld [vmem:[%s4751_s13 + $0x38] sm:$0xff]  ;;  %3363 = vmatpush3.bf16.msra.mxu1 %v3360_v26  ;;  %s4220_s13 = smov [#allocation24]  }
 0x1c9   : > { %3149 = vmatprep.mubr.f32.mxu1 %v2783_v30  ;;  %v789_v37 = vunpack.c.l.s8.bf16 %v775_v32  ;;  %3365 = vmatprep.subr.bf16.mxu1 %v3364_v33  ;;  %v791_v48 = vunpack.c.h.s8.bf16 %v775_v32  ;;  %v1855_v26 = vld [vmem:[#allocation19 + $0x10] sm:$0xff]  ;;  %s4094_s2 = sshll.u32 %s4220_s13, 4  ;;  %s4095_s2 = int_to_ptr.vmem [resolvable:$false] %s4094_s2 }
 0x1ca   : > { %s4096_s20 = scalar_lea.vmem %s4095_s2, 4096  ;;  %p4097_p12 = scmp.lt.s32.totalorder %s5125_s21, %s4095_s2 }
 0x1cb   : > { %2887 = vmatpush3.bf16.msra.mxu0 %v4859_v34  ;;  %v2784_v34 = vunpack.c.h.bf16 %v2803_v25  ;;  %p4098_p8 = scmp.lt.s32.totalorder %s4096_s20, %s4090_s23 }
 0x1cc   : > { %3325 = vmatprep.subr.bf16.mxu0 %v4868_v41  ;;  %3367 = vmatpush3.bf16.msra.mxu1 %v3364_v33  ;;  %v3376_v33 = vpack.c.bf16 %v1856_v27, %v1855_v26 }
 0x1cd   : > { %3150 = vmatmul.mubr.f32.gmra.mrb[20].mxu1 %v2784_v34  ;;  %3369 = vmatprep.subr.bf16.mxu1 %v3368_v0  ;;  %p4099_p9 = por %p4098_p8, %p4097_p12 }
 0x1ce   : > { %993 = vmatmul.mubr.bf16.gmra.mrb[16].mxu0 %v784_v22  ;;  %3152 = vmatprep.mubr.f32.mxu1 %v2787_v36  ;;  %v1858_v36 = vld [vmem:[#allocation19 + $0x28] sm:$0xff] }
 0x1cf   : > { %1000 = vmatprep.mubr.bf16.mxu0 %v787_v24  ;;  %p4100_p10 = pnand %p4099_p9, %p4093_p2 }
 0x1d0   : > { %3371 = vmatpush3.bf16.msra.mxu1 %v3368_v0 }
 0x1d1   : > { %3153 = vmatmul.mubr.f32.gmra.mrb[22].mxu1 %v2788_v39  ;;  %3373 = vmatprep.subr.bf16.mxu1 %v4945_v3 }
 0x1d2   : > { %3155 = vmatprep.mubr.f32.mxu1 %v2791_v40 }
 0x1d5   : > { %3156 = vmatmul.mubr.f32.gmra.mrb[24].mxu1 %v2792_v44 }
 0x1d6   : > { %1001 = vmatmul.mubr.bf16.gmra.mrb[20].mxu0 %v786_v35  ;;  %3158 = vmatprep.mubr.f32.mxu1 %v2795_v46  ;;  %v1857_v35 = vld [vmem:[#allocation19 + $0x20] sm:$0xff]  ;;  %v1860_v46 = vld [vmem:[#allocation19 + $0x38] sm:$0xff] }
 0x1d7   : > { %1008 = vmatprep.mubr.bf16.mxu0 %v789_v37  ;;  %v3380_v43 = vpack.c.bf16 %v1858_v36, %v1857_v35 }
 0x1d9   : > { %3159 = vmatmul.mubr.f32.gmra.mrb[26].mxu1 %v2796_v49 }
 0x1da   : > { %3161 = vmatprep.mubr.f32.mxu1 %v2799_v57  ;;  %v1862_v57 = vld [vmem:[#allocation19 + $0x48] sm:$0xff] }
 0x1dd   : > { %3162 = vmatmul.mubr.f32.gmra.mrb[28].mxu1 %v2800_v62 }
 0x1de   : > { %1009 = vmatmul.mubr.bf16.gmra.mrb[24].mxu0 %v788_v45  ;;  %v1859_v45 = vld [vmem:[#allocation19 + $0x30] sm:$0xff] }
 0x1df   : > { %1016 = vmatprep.mubr.bf16.mxu0 %v791_v48  ;;  %v3384_v54 = vpack.c.bf16 %v1860_v46, %v1859_v45  ;;  %v2050_v46 = vld [vmem:[#allocation21 + $0x20] sm:$0xff] }
 0x1e6   : > { %1017 = vmatmul.mubr.bf16.gmra.mrb[28].mxu0 %v790_v51 }
 0x1e7   : > { %1105 = vmatprep.mubr.bf16.mxu0 %v801_v52 }
 0x1ee   : > { %1106 = vmatmul.mubr.bf16.vlgmr.msra.gmra.mrb[32].mxu0 %v800_v56  ;;  %v1861_v56 = vld [vmem:[#allocation19 + $0x40] sm:$0xff] }
 0x1ef   : > { %1113 = vmatprep.mubr.bf16.mxu0 %v803_v61  ;;  %3327 = vmatpush3.bf16.msra.mxu0 %v4868_v41  ;;  %v804_v41 = vunpack.c.l.s8.bf16 %v794_v9  ;;  %v3388_v1 = vpack.c.bf16 %v1862_v57, %v1861_v56  ;;  %v2052_v56 = vld [vmem:[#allocation21 + $0x30] sm:$0xff]  ;;  %v2053_v57 = vld [vmem:[#allocation21 + $0x38] sm:$0xff] }
 0x1f0   : > { %3329 = vmatprep.subr.bf16.mxu0 %v4877_v47 }
 0x1f3   : > { %3331 = vmatpush3.bf16.msra.mxu0 %v4877_v47  ;;  %v797_v47 = vld [vmem:[%s4758_s28 + $0x28] sm:$0xff] }
 0x1f4   : > { %3333 = vmatprep.subr.bf16.mxu0 %v4888_v53  ;;  %v809_v12 = vunpack.c.l.s8.bf16 %v797_v47 }
 0x1f6   : > { %1114 = vmatmul.mubr.bf16.gmra.mrb[36].mxu0 %v802_v6 }
 0x1f7   : > { %1121 = vmatprep.mubr.bf16.mxu0 %v805_v8  ;;  %3335 = vmatpush3.bf16.msra.mxu0 %v4888_v53  ;;  %v796_v53 = vld [vmem:[%s4758_s28 + $0x20] sm:$0xff] }
 0x1f8   : > { %3337 = vmatprep.subr.bf16.mxu0 %v4898_v59  ;;  %v810_v15 = vunpack.c.h.s8.bf16 %v796_v53 }
 0x1fb   : > { %3339 = vmatpush3.bf16.msra.mxu0 %v4898_v59  ;;  %v808_v59 = vunpack.c.l.s8.bf16 %v796_v53  ;;  %v1866_v53 = vld [vmem:[#allocation19 + $0x68] sm:$0xff] }
 0x1fc   : > { %3341 = vmatprep.subr.bf16.mxu0 %v4903_v63 }
 0x1fe   : > { %1122 = vmatmul.mubr.bf16.gmra.mrb[40].mxu0 %v804_v41 }
 0x1ff   : > { %1129 = vmatprep.mubr.bf16.mxu0 %v807_v10  ;;  %3343 = vmatpush3.bf16.msra.mxu0 %v4903_v63  ;;  %v811_v63 = vunpack.c.h.s8.bf16 %v797_v47 }
 0x200   : > { %3345 = vmatprep.subr.bf16.mxu0 %v4911_v4 }
 0x203   : > { %3347 = vmatpush3.bf16.msra.mxu0 %v4911_v4  ;;  %v813_v4 = vunpack.c.l.s8.bf16 %v799_v14 }
 0x204   : > { %3349 = vmatprep.subr.bf16.mxu0 %v4915_v7 }
 0x206   : > { %1130 = vmatmul.mubr.bf16.gmra.mrb[44].mxu0 %v806_v11 }
 0x207   : > { %1137 = vmatprep.mubr.bf16.mxu0 %v809_v12  ;;  %3351 = vmatpush3.bf16.msra.mxu0 %v4915_v7  ;;  %v814_v7 = vunpack.c.h.s8.bf16 %v798_v16  ;;  %v1865_v12 = vld [vmem:[#allocation19 + $0x60] sm:$0xff] }
 0x208   : > { %3353 = vmatprep.subr.bf16.mxu0 %v4924_v13  ;;  %v3396_v19 = vpack.c.bf16 %v1866_v53, %v1865_v12 }
 0x20b   : > { %3355 = vmatpush3.bf16.msra.mxu0 %v4924_v13  ;;  %v4970_v13 = vld [vmem:[#allocation15] ss:$0 sm:$0xff] }
 0x20e   : > { %1138 = vmatmul.mubr.bf16.gmra.mrb[48].mxu0 %v808_v59 }
 0x20f   : > { %1145 = vmatprep.mubr.bf16.mxu0 %v811_v63 }
 0x216   : > { %1146 = vmatmul.mubr.bf16.gmra.mrb[52].mxu0 %v810_v15 }
 0x217   : > { %1153 = vmatprep.mubr.bf16.mxu0 %v813_v4 }
 0x21e   : > { %1154 = vmatmul.mubr.bf16.gmra.mrb[56].mxu0 %v812_v17 }
 0x21f   : > { %1161 = vmatprep.mubr.bf16.mxu0 %v815_v18 }
 0x226   : > { %1162 = vmatmul.mubr.bf16.gmra.mrb[60].mxu0 %v814_v7 }
 0x227   : > { %3140 = vmatprep.mubr.f32.mxu0 %v2771_v20 }
 0x22e   : > { %3141 = vmatmul.mubr.f32.vlgmr.msra.gmra.mrb[64].mxu0 %v2772_v21 }
 0x26b   : > { %v3086_v22 = vpop.f32.mrb[0].mxu1 }
 0x26c   : > { %v1353_v23 = vadd.f32 %v3086_v22, %v4970_v13  ;;  %v1347_v24 = vpop.f32.mrb[1].mxu1  ;;  %v1867_v22 = vld [vmem:[#allocation19 + $0x70] sm:$0xff] }
 0x26d   : > { %v1348_v25 = vadd.f32 %v4970_v13, %v1347_v24 }
 0x26e   : > { %v1427_v28 = vmax.f32 %v1353_v23, 0.0  ;;  %v1868_v23 = vld [vmem:[#allocation19 + $0x78] sm:$0xff] }
 0x26f   : > { %v1426_v29 = vmax.f32 %v1348_v25, 0.0  ;;  %v3089_v30 = vpop.f32.mrb[2].mxu1 }
 0x270   : > { %v1363_v31 = vadd.f32 %v3089_v30, %v4970_v13  ;;  %v1357_v32 = vpop.f32.mrb[3].mxu1  ;;  %v3400_v30 = vpack.c.bf16 %v1868_v23, %v1867_v22 }
 0x271   : > { %v1358_v34 = vadd.f32 %v4970_v13, %v1357_v32  ;;  %3180 = vmatprep.mubr.msk.f32.mxu1 %vm1643_vm1, %v1426_v29  ;;  %v2046_v32 = vld [vmem:[#allocation21] sm:$0xff] }
 0x272   : > { %v1429_v37 = vmax.f32 %v1363_v31, 0.0  ;;  %3181 = vmatmul.mubr.msk.f32.vlgmr.msra.gmra.mrb[30].mxu1 %vm1643_vm1, %v1427_v28 }
 0x273   : > { %v1428_v38 = vmax.f32 %v1358_v34, 0.0  ;;  %v3092_v39 = vpop.f32.mrb[4].mxu1  ;;  %3375 = vmatpush3.bf16.msra.mxu1 %v4945_v3  ;;  %v1863_v3 = vld [vmem:[#allocation19 + $0x50] sm:$0xff] }
 0x274   : > { %v1373_v40 = vadd.f32 %v3092_v39, %v4970_v13  ;;  %v1367_v42 = vpop.f32.mrb[5].mxu1  ;;  %3377 = vmatprep.subr.bf16.mxu1 %v3376_v33  ;;  %v3392_v47 = vpack.c.bf16 %v1864_v5, %v1863_v3 }
 0x275   : > { %v1368_v44 = vadd.f32 %v4970_v13, %v1367_v42  ;;  %3183 = vmatprep.mubr.msk.f32.mxu1 %vm1643_vm1, %v1428_v38 }
 0x276   : > { %v1431_v48 = vmax.f32 %v1373_v40, 0.0  ;;  %3184 = vmatmul.mubr.msk.f32.gmra.mrb[16].mxu1 %vm1643_vm1, %v1429_v37 }
 0x277   : > { %v1430_v49 = vmax.f32 %v1368_v44, 0.0  ;;  %v3095_v50 = vpop.f32.mrb[6].mxu1  ;;  %3379 = vmatpush3.bf16.msra.mxu1 %v3376_v33  ;;  %v2047_v33 = vld [vmem:[#allocation21 + $0x8] sm:$0xff] }
 0x278   : > { %v1383_v51 = vadd.f32 %v3095_v50, %v4970_v13  ;;  %v1377_v52 = vpop.f32.mrb[7].mxu1  ;;  %3381 = vmatprep.subr.bf16.mxu1 %v3380_v43  ;;  %v3404_v40 = vpack.c.bf16 %v2047_v33, %v2046_v32 }
 0x279   : > { %v1378_v55 = vadd.f32 %v4970_v13, %v1377_v52  ;;  %3186 = vmatprep.mubr.msk.f32.mxu1 %vm1643_vm1, %v1430_v49 }
 0x27a   : > { %v1433_v58 = vmax.f32 %v1383_v51, 0.0  ;;  %3187 = vmatmul.mubr.msk.f32.gmra.mrb[18].mxu1 %vm1643_vm1, %v1431_v48  ;;  %v2051_v48 = vld [vmem:[#allocation21 + $0x28] sm:$0xff] }
 0x27b   : > { %v1432_v60 = vmax.f32 %v1378_v55, 0.0  ;;  %v3098_v61 = vpop.f32.mrb[8].mxu1  ;;  %3383 = vmatpush3.bf16.msra.mxu1 %v3380_v43  ;;  %v2048_v43 = vld [vmem:[#allocation21 + $0x10] sm:$0xff] }
 0x27c   : > { %v1393_v62 = vadd.f32 %v3098_v61, %v4970_v13  ;;  %v1387_v0 = vpop.f32.mrb[9].mxu1  ;;  %3385 = vmatprep.subr.bf16.mxu1 %v3384_v54  ;;  %v2054_v61 = vld [vmem:[#allocation21 + $0x40] sm:$0xff] }
 0x27d   : > { %v1388_v2 = vadd.f32 %v4970_v13, %v1387_v0  ;;  %3189 = vmatprep.mubr.msk.f32.mxu1 %vm1643_vm1, %v1432_v60  ;;  %v3416_v60 = vpack.c.bf16 %v2053_v57, %v2052_v56 }
 0x27e   : > { %v1435_v6 = vmax.f32 %v1393_v62, 0.0  ;;  %3190 = vmatmul.mubr.msk.f32.gmra.mrb[20].mxu1 %vm1643_vm1, %v1433_v58  ;;  %v2055_v62 = vld [vmem:[#allocation21 + $0x48] sm:$0xff] }
 0x27f   : > { %v1434_v8 = vmax.f32 %v1388_v2, 0.0  ;;  %v3101_v9 = vpop.f32.mrb[10].mxu1  ;;  %3387 = vmatpush3.bf16.msra.mxu1 %v3384_v54  ;;  %v3412_v54 = vpack.c.bf16 %v2051_v48, %v2050_v46  ;;  %v3420_v5 = vpack.c.bf16 %v2055_v62, %v2054_v61 }
 0x280   : > { %v1403_v41 = vadd.f32 %v3101_v9, %v4970_v13  ;;  %v1397_v10 = vpop.f32.mrb[11].mxu1  ;;  %3389 = vmatprep.subr.bf16.mxu1 %v3388_v1  ;;  %v2057_v9 = vld [vmem:[#allocation21 + $0x58] sm:$0xff] }
 0x281   : > { %v1398_v11 = vadd.f32 %v4970_v13, %v1397_v10  ;;  %3192 = vmatprep.mubr.msk.f32.mxu1 %vm1643_vm1, %v1434_v8  ;;  %v2824_v63 = vpop.f32.mrb[0].mxu0  ;;  %v2056_v8 = vld [vmem:[#allocation21 + $0x50] sm:$0xff] }
 0x282   : > { %v1437_v59 = vmax.f32 %v1403_v41, 0.0  ;;  %3193 = vmatmul.mubr.msk.f32.gmra.mrb[22].mxu1 %vm1643_vm1, %v1435_v6  ;;  %v2825_v4 = vpop.f32.mrb[1].mxu0  ;;  %v3424_v10 = vpack.c.bf16 %v2057_v9, %v2056_v8 }
 0x283   : > { %v1436_v14 = vmax.f32 %v1398_v11, 0.0  ;;  %v3104_v15 = vpop.f32.mrb[12].mxu1  ;;  %3391 = vmatpush3.bf16.msra.mxu1 %v3388_v1  ;;  %v2826_v17 = vadd.f32 %v2825_v4, %v2824_v63  ;;  %v2827_v7 = vpop.f32.mrb[2].mxu0  ;;  %v2059_v11 = vld [vmem:[#allocation21 + $0x68] sm:$0xff]  ;;  %v2060_v4 = vld [vmem:[#allocation21 + $0x70] sm:$0xff] }
 0x284   : > { %v1413_v16 = vadd.f32 %v3104_v15, %v4970_v13  ;;  %v1407_v18 = vpop.f32.mrb[13].mxu1  ;;  %3393 = vmatprep.subr.bf16.mxu1 %v3392_v47  ;;  %v2828_v21 = vpop.f32.mrb[3].mxu0 }
 0x285   : > { %v1408_v20 = vadd.f32 %v4970_v13, %v1407_v18  ;;  %3195 = vmatprep.mubr.msk.f32.mxu1 %vm1643_vm1, %v1436_v14  ;;  %v2829_v25 = vadd.f32 %v2828_v21, %v2827_v7 }
 0x286   : > { %v1439_v24 = vmax.f32 %v1413_v16, 0.0  ;;  %3196 = vmatmul.mubr.msk.f32.gmra.mrb[24].mxu1 %vm1643_vm1, %v1437_v59  ;;  %v2061_v16 = vld [vmem:[#allocation21 + $0x78] sm:$0xff] }
 0x287   : > { %v1438_v26 = vmax.f32 %v1408_v20, 0.0  ;;  %v3107_v27 = vpop.f32.mrb[14].mxu1  ;;  %3395 = vmatpush3.bf16.msra.mxu1 %v3392_v47  ;;  %v2058_v47 = vld [vmem:[#allocation21 + $0x60] sm:$0xff]  ;;  %v3432_v18 = vpack.c.bf16 %v2061_v16, %v2060_v4 }
 0x288   : > { %v1423_v28 = vadd.f32 %v3107_v27, %v4970_v13  ;;  %v1417_v29 = vpop.f32.mrb[15].mxu1  ;;  %3397 = vmatprep.subr.bf16.mxu1 %v3396_v19  ;;  %v3428_v14 = vpack.c.bf16 %v2059_v11, %v2058_v47 }
 0x289   : > { %v1418_v31 = vadd.f32 %v4970_v13, %v1417_v29  ;;  %3198 = vmatprep.mubr.msk.f32.mxu1 %vm1643_vm1, %v1438_v26  ;;  %v2830_v35 = vpop.f32.mrb[4].mxu0  ;;  %v2049_v13 = vld [vmem:[#allocation21 + $0x18] sm:$0xff] }
 0x28a   : > { %v1441_v34 = vmax.f32 %v1423_v28, 0.0  ;;  %3199 = vmatmul.mubr.msk.f32.gmra.mrb[26].mxu1 %vm1643_vm1, %v1439_v24  ;;  %v2831_v37 = vpop.f32.mrb[5].mxu0  ;;  %v3408_v45 = vpack.c.bf16 %v2049_v13, %v2048_v43 }
 0x28b   : > { %v1440_v36 = vmax.f32 %v1418_v31, 0.0  ;;  %3399 = vmatpush3.bf16.msra.mxu1 %v3396_v19  ;;  %v2832_v38 = vadd.f32 %v2831_v37, %v2830_v35  ;;  %v2833_v39 = vpop.f32.mrb[6].mxu0 }
 0x28c   : > { %3401 = vmatprep.subr.bf16.mxu1 %v3400_v30  ;;  %v2834_v42 = vpop.f32.mrb[7].mxu0 }
 0x28d   : > { %3201 = vmatprep.mubr.msk.f32.mxu1 %vm1643_vm1, %v1440_v36  ;;  %v2835_v44 = vadd.f32 %v2834_v42, %v2833_v39 }
 0x28e   : > { %3202 = vmatmul.mubr.msk.f32.gmra.mrb[28].mxu1 %vm1643_vm1, %v1441_v34 }
 0x28f   : > { %3403 = vmatpush3.bf16.msra.mxu1 %v3400_v30  ;;  %3236 = vmatprep.mubr.f32.mxu1 %v2826_v17 }
 0x290   : > { %3405 = vmatprep.subr.bf16.mxu1 %v3404_v40 }
 0x291   : > { %v2836_v49 = vpop.f32.mrb[8].mxu0 }
 0x292   : > { %3237 = vmatmul.mubr.f32.vlgmr.msra.gmra.mrb[30].mxu1 %v2829_v25  ;;  %v2837_v50 = vpop.f32.mrb[9].mxu0 }
 0x293   : > { %3239 = vmatprep.mubr.f32.mxu1 %v2832_v38  ;;  %3407 = vmatpush3.bf16.msra.mxu1 %v3404_v40  ;;  %v2838_v51 = vadd.f32 %v2837_v50, %v2836_v49  ;;  %v2839_v52 = vpop.f32.mrb[10].mxu0 }
 0x294   : > { %3409 = vmatprep.subr.bf16.mxu1 %v3408_v45  ;;  %v2840_v55 = vpop.f32.mrb[11].mxu0 }
 0x295   : > { %v2841_v58 = vadd.f32 %v2840_v55, %v2839_v52 }
 0x296   : > { %3240 = vmatmul.mubr.f32.gmra.mrb[16].mxu1 %v2835_v44 }
 0x297   : > { %3242 = vmatprep.mubr.f32.mxu1 %v2838_v51  ;;  %3411 = vmatpush3.bf16.msra.mxu1 %v3408_v45 }
 0x298   : > { %3413 = vmatprep.subr.bf16.mxu1 %v3412_v54 }
 0x299   : > { %v2842_v0 = vpop.f32.mrb[12].mxu0 }
 0x29a   : > { %3243 = vmatmul.mubr.f32.gmra.mrb[18].mxu1 %v2841_v58  ;;  %v2843_v1 = vpop.f32.mrb[13].mxu0 }
 0x29b   : > { %3415 = vmatpush3.bf16.msra.mxu1 %v3412_v54  ;;  %v2844_v2 = vadd.f32 %v2843_v1, %v2842_v0  ;;  %v2845_v3 = vpop.f32.mrb[14].mxu0 }
 0x29c   : > { %3417 = vmatprep.subr.bf16.mxu1 %v3416_v60  ;;  %v2846_v6 = vpop.f32.mrb[15].mxu0 }
 0x29d   : > { %v2847_v41 = vadd.f32 %v2846_v6, %v2845_v3  ;;  %3245 = vmatprep.mubr.f32.mxu1 %v2844_v2 }
 0x29f   : > { %3419 = vmatpush3.bf16.msra.mxu1 %v3416_v60 }
 0x2a0   : > { %3246 = vmatmul.mubr.f32.gmra.mrb[20].mxu1 %v2847_v41  ;;  %3421 = vmatprep.subr.bf16.mxu1 %v3420_v5 }
 0x2a1   : > { %v2848_v12 = vpop.f32.mrb[16].mxu0 }
 0x2a2   : > { %v2849_v53 = vpop.f32.mrb[17].mxu0 }
 0x2a3   : > { %3423 = vmatpush3.bf16.msra.mxu1 %v3420_v5  ;;  %v2850_v59 = vadd.f32 %v2849_v53, %v2848_v12  ;;  %v2851_v63 = vpop.f32.mrb[18].mxu0 }
 0x2a4   : > { %3425 = vmatprep.subr.bf16.mxu1 %v3424_v10  ;;  %v2852_v15 = vpop.f32.mrb[19].mxu0 }
 0x2a5   : > { %v2853_v17 = vadd.f32 %v2852_v15, %v2851_v63  ;;  %3248 = vmatprep.mubr.f32.mxu1 %v2850_v59 }
 0x2a7   : > { %3427 = vmatpush3.bf16.msra.mxu1 %v3424_v10 }
 0x2a8   : > { %3249 = vmatmul.mubr.f32.gmra.mrb[22].mxu1 %v2853_v17  ;;  %3429 = vmatprep.subr.bf16.mxu1 %v3428_v14 }
 0x2a9   : > { %v2854_v7 = vpop.f32.mrb[20].mxu0 }
 0x2aa   : > { %v2855_v19 = vpop.f32.mrb[21].mxu0 }
 0x2ab   : > { %3431 = vmatpush3.bf16.msra.mxu1 %v3428_v14  ;;  %v2856_v20 = vadd.f32 %v2855_v19, %v2854_v7  ;;  %v2857_v21 = vpop.f32.mrb[22].mxu0 }
 0x2ac   : > { %3433 = vmatprep.subr.bf16.mxu1 %v3432_v18  ;;  %v2858_v22 = vpop.f32.mrb[23].mxu0 }
 0x2ad   : > { %v2859_v23 = vadd.f32 %v2858_v22, %v2857_v21  ;;  %3251 = vmatprep.mubr.f32.mxu1 %v2856_v20 }
 0x2af   : > { %3435 = vmatpush3.bf16.msra.mxu1 %v3432_v18 }
 0x2b0   : > { %3252 = vmatmul.mubr.f32.gmra.mrb[24].mxu1 %v2859_v23  ;;  %v2756_v23 = vld [vmem:[#allocation22] ss:$0 sm:$0xff] }
 0x2b1   : > { %v2860_v24 = vpop.f32.mrb[24].mxu0 }
 0x2b2   : > { %v2861_v25 = vpop.f32.mrb[25].mxu0 }
 0x2b3   : > { %v2862_v26 = vadd.f32 %v2861_v25, %v2860_v24  ;;  %v2863_v27 = vpop.f32.mrb[26].mxu0 }
 0x2b4   : > { %v2864_v28 = vpop.f32.mrb[27].mxu0 }
 0x2b5   : > { %v2865_v29 = vadd.f32 %v2864_v28, %v2863_v27  ;;  %3254 = vmatprep.mubr.f32.mxu1 %v2862_v26 }
 0x2b7   : > { %3255 = vmatmul.mubr.f32.gmra.mrb[26].mxu1 %v2865_v29 }
 0x2b9   : > { %v2866_v30 = vpop.f32.mrb[28].mxu0 }
 0x2ba   : > { %v2867_v31 = vpop.f32.mrb[29].mxu0 }
 0x2bb   : > { %v2868_v32 = vadd.f32 %v2867_v31, %v2866_v30  ;;  %v2869_v33 = vpop.f32.mrb[30].mxu0 }
 0x2bc   : > { %v2870_v34 = vpop.f32.mrb[31].mxu0 }
 0x2bd   : > { %v2871_v35 = vadd.f32 %v2870_v34, %v2869_v33  ;;  %3257 = vmatprep.mubr.f32.mxu1 %v2868_v32 }
 0x2bf   : > { %3258 = vmatmul.mubr.f32.gmra.mrb[28].mxu1 %v2871_v35 }
 0x2c1   : > { %v2888_v36 = vpop.f32.mrb[32].mxu0 }
 0x2c2   : > { %v2889_v37 = vpop.f32.mrb[33].mxu0 }
 0x2c3   : > { %v2890_v38 = vadd.f32 %v2889_v37, %v2888_v36  ;;  %v2891_v39 = vpop.f32.mrb[34].mxu0 }
 0x2c4   : > { %v2892_v40 = vpop.f32.mrb[35].mxu0 }
 0x2c5   : > { %v2893_v42 = vadd.f32 %v2892_v40, %v2891_v39  ;;  %3292 = vmatprep.mubr.f32.mxu1 %v2890_v38 }
 0x2c7   : > { %3293 = vmatmul.mubr.f32.vlgmr.msra.gmra.mrb[30].mxu1 %v2893_v42 }
 0x2c9   : > { %v2894_v43 = vpop.f32.mrb[36].mxu0 }
 0x2ca   : > { %v2895_v13 = vpop.f32.mrb[37].mxu0 }
 0x2cb   : > { %v2896_v44 = vadd.f32 %v2895_v13, %v2894_v43  ;;  %v2897_v45 = vpop.f32.mrb[38].mxu0 }
 0x2cc   : > { %v2898_v46 = vpop.f32.mrb[39].mxu0 }
 0x2cd   : > { %v2899_v48 = vadd.f32 %v2898_v46, %v2897_v45  ;;  %3295 = vmatprep.mubr.f32.mxu1 %v2896_v44 }
 0x2cf   : > { %3296 = vmatmul.mubr.f32.gmra.mrb[16].mxu1 %v2899_v48 }
 0x2d1   : > { %v2900_v49 = vpop.f32.mrb[40].mxu0 }
 0x2d2   : > { %v2901_v50 = vpop.f32.mrb[41].mxu0 }
 0x2d3   : > { %v2902_v51 = vadd.f32 %v2901_v50, %v2900_v49  ;;  %v2903_v52 = vpop.f32.mrb[42].mxu0 }
 0x2d4   : > { %v2904_v54 = vpop.f32.mrb[43].mxu0 }
 0x2d5   : > { %v2905_v55 = vadd.f32 %v2904_v54, %v2903_v52  ;;  %3298 = vmatprep.mubr.f32.mxu1 %v2902_v51 }
 0x2d7   : > { %3299 = vmatmul.mubr.f32.gmra.mrb[18].mxu1 %v2905_v55 }
 0x2d9   : > { %v2906_v56 = vpop.f32.mrb[44].mxu0 }
 0x2da   : > { %v2907_v57 = vpop.f32.mrb[45].mxu0 }
 0x2db   : > { %v2908_v58 = vadd.f32 %v2907_v57, %v2906_v56  ;;  %v2909_v60 = vpop.f32.mrb[46].mxu0 }
 0x2dc   : > { %v2910_v61 = vpop.f32.mrb[47].mxu0 }
 0x2dd   : > { %v2911_v62 = vadd.f32 %v2910_v61, %v2909_v60  ;;  %3301 = vmatprep.mubr.f32.mxu1 %v2908_v58 }
 0x2df   : > { %3302 = vmatmul.mubr.f32.gmra.mrb[20].mxu1 %v2911_v62 }
 0x2e1   : > { %v2912_v0 = vpop.f32.mrb[48].mxu0 }
 0x2e2   : > { %v2913_v1 = vpop.f32.mrb[49].mxu0 }
 0x2e3   : > { %v2914_v2 = vadd.f32 %v2913_v1, %v2912_v0  ;;  %v2915_v3 = vpop.f32.mrb[50].mxu0 }
 0x2e4   : > { %v2916_v5 = vpop.f32.mrb[51].mxu0 }
 0x2e5   : > { %v2917_v6 = vadd.f32 %v2916_v5, %v2915_v3  ;;  %3304 = vmatprep.mubr.f32.mxu1 %v2914_v2 }
 0x2e7   : > { %3305 = vmatmul.mubr.f32.gmra.mrb[22].mxu1 %v2917_v6 }
 0x2e9   : > { %v2918_v8 = vpop.f32.mrb[52].mxu0 }
 0x2ea   : > { %v2919_v9 = vpop.f32.mrb[53].mxu0 }
 0x2eb   : > { %v2920_v41 = vadd.f32 %v2919_v9, %v2918_v8  ;;  %v2921_v10 = vpop.f32.mrb[54].mxu0 }
 0x2ec   : > { %v2922_v47 = vpop.f32.mrb[55].mxu0 }
 0x2ed   : > { %v2923_v11 = vadd.f32 %v2922_v47, %v2921_v10  ;;  %3307 = vmatprep.mubr.f32.mxu1 %v2920_v41 }
 0x2ef   : > { %3308 = vmatmul.mubr.f32.gmra.mrb[24].mxu1 %v2923_v11 }
 0x2f1   : > { %v2924_v12 = vpop.f32.mrb[56].mxu0 }
 0x2f2   : > { %v2925_v53 = vpop.f32.mrb[57].mxu0 }
 0x2f3   : > { %v2926_v59 = vadd.f32 %v2925_v53, %v2924_v12  ;;  %v2927_v63 = vpop.f32.mrb[58].mxu0 }
 0x2f4   : > { %v2928_v14 = vpop.f32.mrb[59].mxu0 }
 0x2f5   : > { %v2929_v15 = vadd.f32 %v2928_v14, %v2927_v63  ;;  %3310 = vmatprep.mubr.f32.mxu1 %v2926_v59 }
 0x2f7   : > { %3311 = vmatmul.mubr.f32.gmra.mrb[26].mxu1 %v2929_v15 }
 0x2f9   : > { %v2930_v4 = vpop.f32.mrb[60].mxu0 }
 0x2fa   : > { %v2931_v16 = vpop.f32.mrb[61].mxu0 }
 0x2fb   : > { %v2932_v17 = vadd.f32 %v2931_v16, %v2930_v4  ;;  %v2933_v18 = vpop.f32.mrb[62].mxu0 }
 0x2fc   : > { %v2934_v7 = vpop.f32.mrb[63].mxu0 }
 0x2fd   : > { %v2935_v19 = vadd.f32 %v2934_v7, %v2933_v18  ;;  %3313 = vmatprep.mubr.f32.mxu1 %v2932_v17 }
 0x2ff   : > { %3314 = vmatmul.mubr.f32.gmra.mrb[28].mxu1 %v2935_v19 }
 0x301   : > { %v3142_v20 = vpop.f32.mrb[64].mxu0 }
 0x302   : > { %v1564_v21 = vpop.f32.mrb[65].mxu0 }
 0x39a   : > { %v3294_v22 = vpop.f32.mrb[30].mxu1 }
 0x39b   : > { %v3452_v24 = vadd.f32 %v3294_v22, %v3142_v20  ;;  %v2128_v25 = vpop.f32.mrb[31].mxu1 }
 0x39c   : > { %v3453_v26 = vadd.f32 %v2128_v25, %v1564_v21 }
 0x39d   : > { %v2231_v27 = vadd.f32 %v3452_v24, %v2756_v23 }
 0x39e   : > { %v2230_v28 = vadd.f32 %v3453_v26, %v2756_v23 }
 0x39f   : > { %2248 = vmax.xlane.f32.xlu0 %v2231_v27 }
 0x3a2   : > { %v3297_v29 = vpop.f32.mrb[16].mxu1 }
 0x3a3   : > { %v2233_v30 = vadd.f32 %v3297_v29, %v2756_v23  ;;  %2246 = vmax.xlane.f32.xlu0 %v2230_v28  ;;  %v2138_v31 = vpop.f32.mrb[17].mxu1 }
 0x3a4   : > { %v2232_v32 = vadd.f32 %v2756_v23, %v2138_v31 }
 0x3a5   : > { %2252 = vmax.xlane.f32.xlu1 %v2233_v30 }
 0x3a9   : > { %2250 = vmax.xlane.f32.xlu1 %v2232_v32 }
 0x3aa   : > { %v3300_v33 = vpop.f32.mrb[18].mxu1 }
 0x3ab   : > { %v2235_v34 = vadd.f32 %v3300_v33, %v2756_v23  ;;  %v2148_v35 = vpop.f32.mrb[19].mxu1 }
 0x3ac   : > { %v2234_v36 = vadd.f32 %v2756_v23, %v2148_v35 }
 0x3ad   : > { %2256 = vmax.xlane.f32.xlu1 %v2235_v34 }
 0x3ae   : > { %2254 = vmax.xlane.f32.xlu0 %v2234_v36 }
 0x3b2   : > { %v3303_v37 = vpop.f32.mrb[20].mxu1 }
 0x3b3   : > { %v2237_v38 = vadd.f32 %v3303_v37, %v2756_v23  ;;  %v2158_v39 = vpop.f32.mrb[21].mxu1 }
 0x3b4   : > { %v2236_v40 = vadd.f32 %v2756_v23, %v2158_v39 }
 0x3b5   : > { %2260 = vmax.xlane.f32.xlu1 %v2237_v38 }
 0x3b6   : > { %2258 = vmax.xlane.f32.xlu0 %v2236_v40 }
 0x3ba   : > { %v3306_v42 = vpop.f32.mrb[22].mxu1 }
 0x3bb   : > { %v5005_v43 = vadd.f32 %v3306_v42, %v2756_v23  ;;  %v2168_v13 = vpop.f32.mrb[23].mxu1 }
 0x3bc   : > { %v5007_v44 = vadd.f32 %v2756_v23, %v2168_v13 }
 0x3bd   : > { %2264 = vmax.xlane.f32.xlu1 %v5005_v43 }
 0x3be   : > { %2262 = vmax.xlane.f32.xlu0 %v5007_v44 }
 0x3c2   : > { %v3309_v45 = vpop.f32.mrb[24].mxu1 }
 0x3c3   : > { %v5011_v46 = vadd.f32 %v3309_v45, %v2756_v23  ;;  %v2178_v48 = vpop.f32.mrb[25].mxu1 }
 0x3c4   : > { %v5013_v49 = vadd.f32 %v2756_v23, %v2178_v48 }
 0x3c5   : > { %2268 = vmax.xlane.f32.xlu1 %v5011_v46 }
 0x3c6   : > { %2266 = vmax.xlane.f32.xlu0 %v5013_v49 }
 0x3ca   : > { %v3312_v50 = vpop.f32.mrb[26].mxu1 }
 0x3cb   : > { %v5017_v51 = vadd.f32 %v3312_v50, %v2756_v23  ;;  %v2188_v52 = vpop.f32.mrb[27].mxu1 }
 0x3cc   : > { %v5019_v54 = vadd.f32 %v2756_v23, %v2188_v52 }
 0x3cd   : > { %2272 = vmax.xlane.f32.xlu1 %v5017_v51 }
 0x3ce   : > { %2270 = vmax.xlane.f32.xlu0 %v5019_v54 }
 0x3d2   : > { %v3315_v55 = vpop.f32.mrb[28].mxu1 }
 0x3d3   : > { %v5023_v56 = vadd.f32 %v3315_v55, %v2756_v23  ;;  %v2198_v57 = vpop.f32.mrb[29].mxu1 }
 0x3d4   : > { %v5025_v58 = vadd.f32 %v2756_v23, %v2198_v57 }
 0x3d5   : > { %2276 = vmax.xlane.f32.xlu1 %v5023_v56 }
 0x3d6   : > { %2274 = vmax.xlane.f32.xlu0 %v5025_v58 }
 0x42c   : > { %v2249_v60 = vpop.xlane.xlu0 %2248 }
 0x42d   : > { %v5029_v61 = vsub.f32 %v2231_v27, %v2249_v60 }
 0x42f   : > { %v2296_v62 = vmul.f32 1.442695, %v5029_v61 }
 0x430   : > { %v2247_v0 = vpop.xlane.xlu0 %2246 }
 0x431   : > { %3682 = vpow2.f32 %v2296_v62  ;;  %v5032_v1 = vsub.f32 %v2230_v28, %v2247_v0 }
 0x432   : > { %v2253_v2 = vpop.xlane.xlu1 %2252 }
 0x433   : > { %v2294_v3 = vmul.f32 1.442695, %v5032_v1  ;;  %v5035_v5 = vsub.f32 %v2233_v30, %v2253_v2 }
 0x435   : > { %3684 = vpow2.f32 %v2294_v3  ;;  %v2300_v6 = vmul.f32 1.442695, %v5035_v5 }
 0x436   : > { %v2251_v8 = vpop.xlane.xlu1 %2250 }
 0x437   : > { %3686 = vpow2.f32 %v2300_v6  ;;  %v5038_v9 = vsub.f32 %v2232_v32, %v2251_v8 }
 0x439   : > { %v2298_v41 = vmul.f32 1.442695, %v5038_v9 }
 0x43a   : > { %v2257_v10 = vpop.xlane.xlu1 %2256 }
 0x43b   : > { %v3683_v47 = vpop.eup %3682  ;;  %3688 = vpow2.f32 %v2298_v41  ;;  %v5041_v11 = vsub.f32 %v2235_v34, %v2257_v10  ;;  %v2255_v12 = vpop.xlane.xlu0 %2254 }
 0x43c   : > { %v5043_v53 = vsub.f32 %v2234_v36, %v2255_v12  ;;  %2328 = vadd.xlane.f32.xlu1 %v3683_v47 }
 0x43d   : > { %v2304_v59 = vmul.f32 1.442695, %v5041_v11 }
 0x43e   : > { %v2302_v63 = vmul.f32 1.442695, %v5043_v53 }
 0x43f   : > { %v3685_v14 = vpop.eup %3684  ;;  %3690 = vpow2.f32 %v2304_v59 }
 0x440   : > { %3692 = vpow2.f32 %v2302_v63  ;;  %2326 = vadd.xlane.f32.xlu0 %v3685_v14 }
 0x441   : > { %v3687_v15 = vpop.eup %3686 }
 0x442   : > { %v2261_v4 = vpop.xlane.xlu1 %2260  ;;  %2332 = vadd.xlane.f32.xlu1 %v3687_v15 }
 0x443   : > { %v5047_v16 = vsub.f32 %v2237_v38, %v2261_v4  ;;  %v2259_v17 = vpop.xlane.xlu0 %2258 }
 0x444   : > { %v5049_v18 = vsub.f32 %v2236_v40, %v2259_v17 }
 0x445   : > { %v3689_v7 = vpop.eup %3688  ;;  %v2308_v19 = vmul.f32 1.442695, %v5047_v16 }
 0x446   : > { %v2306_v20 = vmul.f32 1.442695, %v5049_v18  ;;  %2330 = vadd.xlane.f32.xlu0 %v3689_v7 }
 0x447   : > { %3694 = vpow2.f32 %v2308_v19 }
 0x448   : > { %3696 = vpow2.f32 %v2306_v20 }
 0x449   : > { %v3691_v21 = vpop.eup %3690 }
 0x44a   : > { %v3693_v22 = vpop.eup %3692  ;;  %v2265_v23 = vpop.xlane.xlu1 %2264  ;;  %2336 = vadd.xlane.f32.xlu1 %v3691_v21 }
 0x44b   : > { %v5054_v24 = vsub.f32 %v5005_v43, %v2265_v23  ;;  %v2263_v25 = vpop.xlane.xlu0 %2262  ;;  %2334 = vadd.xlane.f32.xlu0 %v3693_v22 }
 0x44c   : > { %v5057_v26 = vsub.f32 %v5007_v44, %v2263_v25 }
 0x44d   : > { %v2312_v27 = vmul.f32 1.442695, %v5054_v24 }
 0x44e   : > { %v2310_v28 = vmul.f32 1.442695, %v5057_v26 }
 0x44f   : > { %3698 = vpow2.f32 %v2312_v27 }
 0x450   : > { %3700 = vpow2.f32 %v2310_v28 }
 0x451   : > { %v3695_v29 = vpop.eup %3694 }
 0x452   : > { %v3697_v30 = vpop.eup %3696  ;;  %v2269_v31 = vpop.xlane.xlu1 %2268  ;;  %2340 = vadd.xlane.f32.xlu1 %v3695_v29 }
 0x453   : > { %v5062_v32 = vsub.f32 %v5011_v46, %v2269_v31  ;;  %v2267_v33 = vpop.xlane.xlu0 %2266  ;;  %2338 = vadd.xlane.f32.xlu0 %v3697_v30 }
 0x454   : > { %v5065_v34 = vsub.f32 %v5013_v49, %v2267_v33 }
 0x455   : > { %v2316_v35 = vmul.f32 1.442695, %v5062_v32 }
 0x456   : > { %v2314_v36 = vmul.f32 1.442695, %v5065_v34 }
 0x457   : > { %3702 = vpow2.f32 %v2316_v35 }
 0x458   : > { %3704 = vpow2.f32 %v2314_v36 }
 0x459   : > { %v3699_v37 = vpop.eup %3698 }
 0x45a   : > { %v3701_v38 = vpop.eup %3700  ;;  %v2273_v39 = vpop.xlane.xlu1 %2272  ;;  %2344 = vadd.xlane.f32.xlu1 %v3699_v37 }
 0x45b   : > { %v5070_v40 = vsub.f32 %v5017_v51, %v2273_v39  ;;  %v2271_v42 = vpop.xlane.xlu0 %2270  ;;  %2342 = vadd.xlane.f32.xlu0 %v3701_v38 }
 0x45c   : > { %v5073_v43 = vsub.f32 %v5019_v54, %v2271_v42 }
 0x45d   : > { %v2320_v13 = vmul.f32 1.442695, %v5070_v40 }
 0x45e   : > { %v2318_v44 = vmul.f32 1.442695, %v5073_v43 }
 0x45f   : > { %3706 = vpow2.f32 %v2320_v13 }
 0x460   : > { %3708 = vpow2.f32 %v2318_v44 }
 0x461   : > { %v3703_v45 = vpop.eup %3702 }
 0x462   : > { %v3705_v46 = vpop.eup %3704  ;;  %2348 = vadd.xlane.f32.xlu1 %v3703_v45  ;;  %v2277_v48 = vpop.xlane.xlu1 %2276 }
 0x463   : > { %v5078_v49 = vsub.f32 %v5023_v56, %v2277_v48  ;;  %2346 = vadd.xlane.f32.xlu0 %v3705_v46  ;;  %v2275_v50 = vpop.xlane.xlu0 %2274 }
 0x464   : > { %v5081_v51 = vsub.f32 %v5025_v58, %v2275_v50 }
 0x465   : > { %v2324_v52 = vmul.f32 1.442695, %v5078_v49 }
 0x466   : > { %v2322_v54 = vmul.f32 1.442695, %v5081_v51 }
 0x467   : > { %3710 = vpow2.f32 %v2324_v52 }
 0x468   : > { %3712 = vpow2.f32 %v2322_v54 }
 0x469   : > { %v3707_v55 = vpop.eup %3706 }
 0x46a   : > { %v3709_v57 = vpop.eup %3708  ;;  %2352 = vadd.xlane.f32.xlu1 %v3707_v55 }
 0x46b   : > { %2350 = vadd.xlane.f32.xlu0 %v3709_v57 }
 0x471   : > { %v3711_v60 = vpop.eup %3710 }
 0x472   : > { %v3713_v62 = vpop.eup %3712  ;;  %2356 = vadd.xlane.f32.xlu1 %v3711_v60 }
 0x473   : > { %2354 = vadd.xlane.f32.xlu0 %v3713_v62 }
 0x4c9   : > { %v2329_v56 = vpop.xlane.xlu1 %2328 }
 0x4ca   : > { %3714 = vlog2.f32 %v2329_v56 }
 0x4cd   : > { %v2327_v0 = vpop.xlane.xlu0 %2326 }
 0x4ce   : > { %3716 = vlog2.f32 %v2327_v0 }
 0x4cf   : > { %v2333_v58 = vpop.xlane.xlu1 %2332 }
 0x4d0   : > { %3718 = vlog2.f32 %v2333_v58 }
 0x4d3   : > { %v2331_v2 = vpop.xlane.xlu0 %2330 }
 0x4d4   : > { %v3715_v3 = vpop.eup %3714  ;;  %3720 = vlog2.f32 %v2331_v2 }
 0x4d5   : > { %v2361_v6 = vmul.f32 0.6931472, %v3715_v3 }
 0x4d7   : > { %v2391_v8 = vsub.f32 %v5029_v61, %v2361_v6  ;;  %v2337_v41 = vpop.xlane.xlu1 %2336 }
 0x4d8   : > { %v3717_v10 = vpop.eup %3716  ;;  %3722 = vlog2.f32 %v2337_v41  ;;  %v2335_v47 = vpop.xlane.xlu0 %2334 }
 0x4d9   : > { %2407 = vst [vmem:[%s5088_s27 + $0x8] sm:$0xff] %v2391_v8  ;;  %v2359_v12 = vmul.f32 0.6931472, %v3717_v10  ;;  %3724 = vlog2.f32 %v2335_v47 }
 0x4da   : > { %v3719_v59 = vpop.eup %3718 }
 0x4db   : > { %v2390_v63 = vsub.f32 %v5032_v1, %v2359_v12  ;;  %v2365_v14 = vmul.f32 0.6931472, %v3719_v59 }
 0x4dd   : > { %2406 = vst [vmem:[%s5088_s27] sm:$0xff] %v2390_v63  ;;  %v2393_v61 = vsub.f32 %v5035_v5, %v2365_v14 }
 0x4de   : > { %v3721_v15 = vpop.eup %3720 }
 0x4df   : > { %2409 = vst [vmem:[%s5088_s27 + $0x18] sm:$0xff] %v2393_v61  ;;  %v2363_v4 = vmul.f32 0.6931472, %v3721_v15  ;;  %v2341_v17 = vpop.xlane.xlu1 %2340 }
 0x4e0   : > { %3726 = vlog2.f32 %v2341_v17  ;;  %v2339_v7 = vpop.xlane.xlu0 %2338 }
 0x4e1   : > { %v2392_v19 = vsub.f32 %v5038_v9, %v2363_v4  ;;  %3728 = vlog2.f32 %v2339_v7 }
 0x4e2   : > { %v3723_v20 = vpop.eup %3722 }
 0x4e3   : > { %v3725_v21 = vpop.eup %3724  ;;  %2408 = vst [vmem:[%s5088_s27 + $0x10] sm:$0xff] %v2392_v19  ;;  %v2369_v22 = vmul.f32 0.6931472, %v3723_v20 }
 0x4e4   : > { %v2367_v1 = vmul.f32 0.6931472, %v3725_v21 }
 0x4e5   : > { %v2395_v23 = vsub.f32 %v5041_v11, %v2369_v22 }
 0x4e6   : > { %v2394_v5 = vsub.f32 %v5043_v53, %v2367_v1 }
 0x4e7   : > { %2411 = vst [vmem:[%s5088_s27 + $0x28] sm:$0xff] %v2395_v23  ;;  %v2345_v25 = vpop.xlane.xlu1 %2344 }
 0x4e8   : > { %2410 = vst [vmem:[%s5088_s27 + $0x20] sm:$0xff] %v2394_v5  ;;  %3730 = vlog2.f32 %v2345_v25  ;;  %v2343_v27 = vpop.xlane.xlu0 %2342 }
 0x4e9   : > { %3732 = vlog2.f32 %v2343_v27 }
 0x4ea   : > { %v3727_v28 = vpop.eup %3726 }
 0x4eb   : > { %v3729_v9 = vpop.eup %3728  ;;  %v2373_v29 = vmul.f32 0.6931472, %v3727_v28 }
 0x4ec   : > { %v2371_v30 = vmul.f32 0.6931472, %v3729_v9 }
 0x4ed   : > { %v2397_v31 = vsub.f32 %v5047_v16, %v2373_v29 }
 0x4ee   : > { %v2396_v33 = vsub.f32 %v5049_v18, %v2371_v30 }
 0x4ef   : > { %2413 = vst [vmem:[%s5088_s27 + $0x38] sm:$0xff] %v2397_v31  ;;  %v2349_v11 = vpop.xlane.xlu1 %2348 }
 0x4f0   : > { %2412 = vst [vmem:[%s5088_s27 + $0x30] sm:$0xff] %v2396_v33  ;;  %3734 = vlog2.f32 %v2349_v11  ;;  %v2347_v53 = vpop.xlane.xlu0 %2346 }
 0x4f1   : > { %3736 = vlog2.f32 %v2347_v53 }
 0x4f2   : > { %v3731_v35 = vpop.eup %3730 }
 0x4f3   : > { %v3733_v36 = vpop.eup %3732  ;;  %v2377_v37 = vmul.f32 0.6931472, %v3731_v35 }
 0x4f4   : > { %v2375_v38 = vmul.f32 0.6931472, %v3733_v36 }
 0x4f5   : > { %v2399_v39 = vsub.f32 %v5054_v24, %v2377_v37 }
 0x4f6   : > { %v2398_v42 = vsub.f32 %v5057_v26, %v2375_v38 }
 0x4f7   : > { %2415 = vst [vmem:[%s5088_s27 + $0x48] sm:$0xff] %v2399_v39  ;;  %v2353_v16 = vpop.xlane.xlu1 %2352 }
 0x4f8   : > { %2414 = vst [vmem:[%s5088_s27 + $0x40] sm:$0xff] %v2398_v42  ;;  %3738 = vlog2.f32 %v2353_v16  ;;  %v2351_v18 = vpop.xlane.xlu0 %2350 }
 0x4f9   : > { %3740 = vlog2.f32 %v2351_v18 }
 0x4fa   : > { %v3735_v13 = vpop.eup %3734 }
 0x4fb   : > { %v3737_v44 = vpop.eup %3736  ;;  %v2381_v45 = vmul.f32 0.6931472, %v3735_v13 }
 0x4fc   : > { %v2379_v46 = vmul.f32 0.6931472, %v3737_v44 }
 0x4fd   : > { %v2401_v48 = vsub.f32 %v5062_v32, %v2381_v45 }
 0x4fe   : > { %v2400_v50 = vsub.f32 %v5065_v34, %v2379_v46 }
 0x4ff   : > { %2417 = vst [vmem:[%s5088_s27 + $0x58] sm:$0xff] %v2401_v48  ;;  %v2357_v24 = vpop.xlane.xlu1 %2356 }
 0x500   : > { %2416 = vst [vmem:[%s5088_s27 + $0x50] sm:$0xff] %v2400_v50  ;;  %3742 = vlog2.f32 %v2357_v24  ;;  %v2355_v26 = vpop.xlane.xlu0 %2354 }
 0x501   : > { %3744 = vlog2.f32 %v2355_v26 }
 0x502   : > { %v3739_v52 = vpop.eup %3738 }
 0x503   : > { %v3741_v54 = vpop.eup %3740  ;;  %v2385_v55 = vmul.f32 0.6931472, %v3739_v52 }
 0x504   : > { %v2383_v57 = vmul.f32 0.6931472, %v3741_v54 }
 0x505   : > { %v2403_v60 = vsub.f32 %v5070_v40, %v2385_v55 }
 0x506   : > { %v2402_v32 = vsub.f32 %v5073_v43, %v2383_v57 }
 0x507   : > { %2419 = vst [vmem:[%s5088_s27 + $0x68] sm:$0xff] %v2403_v60 }
 0x508   : > { %2418 = vst [vmem:[%s5088_s27 + $0x60] sm:$0xff] %v2402_v32 }
 0x50a   : > { %v3743_v34 = vpop.eup %3742 }
 0x50b   : > { %v3745_v62 = vpop.eup %3744  ;;  %v2389_v56 = vmul.f32 0.6931472, %v3743_v34 }
 0x50c   : > { %v2387_v0 = vmul.f32 0.6931472, %v3745_v62 }
 0x50d   : > { %v2405_v58 = vsub.f32 %v5078_v49, %v2389_v56 }
 0x50e   : > { %v2404_v40 = vsub.f32 %v5081_v51, %v2387_v0 }
 0x50f   : > { %2421 = vst [vmem:[%s5088_s27 + $0x78] sm:$0xff] %v2405_v58 }
 0x510   : > { %2420 = vst [vmem:[%s5088_s27 + $0x70] sm:$0xff] %v2404_v40 }
 0x511   : > { %4103 = shalt.err (!%p4100_p10)
}
 0x512   : > { %s4104_s28 = scalar_lea.hbm %s5123_s14, 2048  ;;  %s4108_s9 = scalar_lea.hbm %s5273_s12, 4096 }
 0x513   : > { %p4105_p3 = scmp.ne.s32.totalorder %s5123_s14, %s4104_s28  ;;  %p4109_p1 = scmp.lt.u32.totalorder %s5123_s14, %s5273_s12 }
 0x514   : > { %p4110_p5 = scmp.lt.u32.totalorder %s4108_s9, %s4104_s28  ;;  %p4112_p4 = scmp.lt.u32.totalorder %s4104_s28, %s5123_s14 }
 0x515   : > { %p4106_p0 = pnand %p4105_p3, %p5274_p7 }
 0x516   : > { %p4111_p13 = por %p4110_p5, %p4109_p1 }
 0x517   : > { %p4107_p11 = pneg %p4106_p0 }
 0x518   : > { %p4113_p6 = por %p4112_p4, %p4111_p13 }
 0x51a   : > { %p4114_p2 = pnand %p4113_p6, %p4107_p11 }
 0x51c   : > { %4117 = shalt.err (!%p4114_p2)
}
 0x51d   : > { %s4221_s16 = smov 128   ;;  %s4222_s29 = smov 8  }
 0x51e   : > { %3540 = dma.vmem_to_hbm [thread:$0]  (%p5274_p7), %s5125_s21, 2048, %s5123_s14, %s2423_s1, %s4221_s16, %s4221_s16, %s4222_s29  }
 0x51f PF: > { %s5275_s5 = sld [smem:[#allocation34_spill]]  ;;  %s5276_s19 = sld [smem:[#allocation40_spill]] }
 0x520   : > { %p5278_p8 = scmp.ge.s32.totalorder %s4200_s26, 2 }
 0x525   : > { %s2451_s24 = sand.u32 1, %s5275_s5   ;;  %p5277_p12 = scmp.ne.s32.totalorder %s5276_s19, 0 }
 0x526   : > { %s2452_s23 = scalar_lea.sflag [#allocation6], %s2451_s24 }
 0x527   : > { %p3581_p9 = pnand %p5278_p8, %p5277_p12 }
 0x529   : > { %4175 = dma.done.wait (!%p3581_p9), %s2452_s23, 2048  }
 0x52a   : > { %4177 = vsyncadd (!%p3581_p9), %s2452_s23, 4294965248  ;;  %s38_s26 = sadd.s32 1, %s4200_s26   ;;  %s5279_s13 = sld [smem:[#allocation35_spill]] }
 0x52b   : > { %p35_p10 = scmp.ge.s32.totalorder %s38_s26, 4   ;;  %s5280_s23 = sld [smem:[#allocation39_spill]] }
 0x52c   : > { %s5281_s30 = sld [smem:[#allocation38_spill]]  ;;  %s5282_s21 = smov %s4184_s22 }
 0x52d   : > { %s5284_s24 = smov %s4196_s25  ;;  %37 = sbr.rel (!%p35_p10) target bundleno = 23 (0x17), region = 191 }
 0x530   : > { %s5283_s22 = smov %s5279_s13 }
 0x532   : > { %s5285_s25 = smov %s5281_s30 }
 0x534   :  { %2457 = vsyncpa [#allocation5], 1 }
 0x535   :  { %2459 = vsyncpa [#allocation5 + $0x1], 1 }
 0x536   :  { %2460 = vsyncpa [#allocation8], 1 }
 0x537   :  { %2462 = vsyncpa [#allocation8 + $0x1], 1 }
 0x538   :  { %2463 = vsyncpa [#allocation11], 1 }
 0x539   :  { %2465 = vsyncpa [#allocation11 + $0x1], 1 }
 0x53a   :  { %2466 = vsyncpa [#allocation14], 1 }
 0x53b   :  { %2467 = vsyncpa [#allocation17], 1 }
 0x53c   :  { %2468 = vsyncpa [#allocation20], 1 }
 0x53d   :  { %2469 = vsyncpa [#allocation23], 1 }
 0x53e   :  { %2470 = vsyncpa [#allocation6], 1 }
 0x53f   :  { %2472 = vsyncpa [#allocation6 + $0x1], 1 }

</bundles_post_ra>
